<compile_context>
chip_gen: v7x
topology: tpu7x:2x2x1
jax: 0.10.0
libtpu: 0.0.40
codegen_flags: <defaults>
</compile_context>

<pallas_src>
import functools

import jax
import jax.numpy as jnp
from jax.experimental import pallas as pl
from jax.experimental.pallas import tpu as pltpu

EPS = 1e-5
LANE = 128


def _round_up(x, m):
    return (x + m - 1) // m * m


def _largest_divisor(n, cap):
    cap = max(1, min(n, cap))
    for t in range(cap, 0, -1):
        if n % t == 0:
            return t
    return 1


def _vmem_limit_bytes():
    # ~75% of physical VMEM, clamped to [32 MiB, 100 MiB]:
    #   v5e/v6e (128 MiB) -> 96 MiB,   v7x (64 MiB) -> 48 MiB.
    cap = 64 * 1024 * 1024
    try:
        cap = int(pltpu.get_tpu_info().vmem_capacity_bytes)
    except Exception:
        pass
    return int(min(100 * 1024 * 1024, max(32 * 1024 * 1024, cap * 3 // 4)))


def _make_conv_stats_kernel(kh, kw, pad, th, h, w, cp_in, cp_out):
    """Pass 1: im2col-in-VMEM conv (single MXU matmul per tile) + BN statistics."""
    taps = [(dh, dw) for dh in range(kh) for dw in range(kw)]
    wo = w
    m = th * wo

    def kernel(x_ref, w_ref, y_ref, s1_ref, s2_ref, xp_ref, lhs_ref, acc_ref):
        # x_ref  : (h, w, cp_in)        current batch element (unpadded)
        # w_ref  : (kh*kw*cp_in, cp_out) tap-major weights, resident
        # y_ref  : (th, wo, cp_out)     pre-BN conv output tile (matmul dtype)
        # s1/s2  : (1, cp_out)          per-batch f32 accumulators (sum, sum sq)
        # xp_ref : (hp, wp, cp_in)      VMEM scratch: spatially padded image
        # lhs_ref: (th*wo, kh*kw*cp_in) VMEM scratch: im2col LHS
        # acc_ref: (th*wo, cp_out) f32  VMEM scratch: matmul result
        j = pl.program_id(1)

        @pl.when(j == 0)
        def _prep():
            # Spatial zero-padding done in VMEM (no XLA pad/cast HBM roundtrip)
            # and per-batch-element reset of the BN statistics accumulators.
            xp_ref[...] = jnp.zeros_like(xp_ref)
            xp_ref[pad:pad + h, pad:pad + w, :] = x_ref[...]
            s1_ref[...] = jnp.zeros_like(s1_ref)
            s2_ref[...] = jnp.zeros_like(s2_ref)

        h0 = j * th
        # Build the im2col LHS: fold all taps into the contraction dim so one
        # matmul with K = kh*kw*cp_in feeds the MXU (256-wide on v6e/v7x).
        for t, (dh, dw) in enumerate(taps):
            patch = xp_ref[pl.ds(h0 + dh, th), pl.ds(dw, wo), :]
            lhs_ref[:, t * cp_in:(t + 1) * cp_in] = patch.reshape(m, cp_in)

        acc_ref[...] = jnp.dot(lhs_ref[...], w_ref[...],
                               preferred_element_type=jnp.float32)
        y_ref[...] = acc_ref[...].reshape(th, wo, cp_out).astype(y_ref.dtype)
        s1_ref[...] += jnp.sum(acc_ref[...], axis=0, keepdims=True)
        s2_ref[...] += jnp.sum(acc_ref[...] * acc_ref[...], axis=0, keepdims=True)

    return kernel


def _bn_silu_kernel(y_ref, scale_ref, shift_ref, o_ref):
    z = y_ref[...].astype(jnp.float32) * scale_ref[...] + shift_ref[...]
    o_ref[...] = (z * (1.0 / (1.0 + jnp.exp(-z)))).astype(o_ref.dtype)


def _bn_silu_res_kernel(y_ref, scale_ref, shift_ref, r_ref, o_ref):
    z = y_ref[...].astype(jnp.float32) * scale_ref[...] + shift_ref[...]
    silu = z * (1.0 / (1.0 + jnp.exp(-z)))
    o_ref[...] = (silu + r_ref[...].astype(jnp.float32)).astype(o_ref.dtype)


def conv_bn_silu(x_nhwc, c_in, weight, gamma, beta, *, residual=None,
                 matmul_dtype=jnp.bfloat16, out_dtype=jnp.float32):
    """One ultralytics Conv: Conv2d(bias=False, stride=1, autopad) -> BN(train) -> SiLU.

    x_nhwc:   (N, H, W, Cp_in); true channels `c_in` in the leading lanes, zeros beyond.
    weight:   (c_out, c_in, kh, kw) in PyTorch layout.
    residual: optional (N, H, W, Cp_out) f32 added after SiLU (padded lanes zero).
    Returns   (N, H, W, Cp_out) in `out_dtype`; padded lanes are exactly zero.
    """
    n, h, w, cp_in = x_nhwc.shape
    c_out, c_in_w, kh, kw = weight.shape
    assert c_in_w == c_in and kh == kw
    pad = kh // 2
    ho, wo = h, w                      # stride 1 + autopad preserves spatial dims
    hp, wp = h + 2 * pad, w + 2 * pad
    cp_out = _round_up(c_out, LANE)    # lane-dense output channels
    ktot = kh * kw * cp_in
    mdt = jnp.dtype(matmul_dtype)
    vmem_limit = _vmem_limit_bytes()

    # Tap-major weights (kh*kw*cp_in, cp_out): row (dh*kw+dw)*cp_in + c holds
    # weight[:, c, dh, dw]; zero padding keeps padded lanes exactly zero.
    w_t = jnp.transpose(weight, (2, 3, 1, 0))                    # (kh, kw, c_in, c_out)
    w_t = jnp.pad(w_t, ((0, 0), (0, 0), (0, cp_in - c_in), (0, cp_out - c_out)))
    w_t = w_t.reshape(ktot, cp_out).astype(mdt)
    x_in = x_nhwc.astype(mdt)

    # Row tile: largest divisor of H keeping the im2col LHS <= ~8 MiB and
    # M <= 4096 rows (amortizes per-step overhead without blowing VMEM).
    m_cap = max(1, min(4096, (8 * 1024 * 1024) // max(1, ktot * mdt.itemsize)))
    th = _largest_divisor(ho, max(1, m_cap // max(wo, 1)))
    grid1 = (n, ho // th)

    kernel1 = _make_conv_stats_kernel(kh, kw, pad, th, h, w, cp_in, cp_out)
    y, s1, s2 = pl.pallas_call(
        kernel1,
        grid=grid1,
        in_specs=[
            # Unpadded image of the current batch element; resident across row tiles.
            pl.BlockSpec((None, h, w, cp_in), lambda ni, j: (ni, 0, 0, 0)),
            # Tap-major weights; resident across the whole grid.
            pl.BlockSpec((ktot, cp_out), lambda ni, j: (0, 0)),
        ],
        out_specs=[
            pl.BlockSpec((None, th, wo, cp_out), lambda ni, j: (ni, j, 0, 0)),
            # Per-batch stats partials -> the batch axis can be "parallel".
            pl.BlockSpec((None, 1, cp_out), lambda ni, j: (ni, 0, 0)),
            pl.BlockSpec((None, 1, cp_out), lambda ni, j: (ni, 0, 0)),
        ],
        out_shape=[
            jax.ShapeDtypeStruct((n, ho, wo, cp_out), mdt),       # pre-BN conv out
            jax.ShapeDtypeStruct((n, 1, cp_out), jnp.float32),    # per-batch sum
            jax.ShapeDtypeStruct((n, 1, cp_out), jnp.float32),    # per-batch sum sq
        ],
        scratch_shapes=[
            pltpu.VMEM((hp, wp, cp_in), mdt),           # padded image
            pltpu.VMEM((th * wo, ktot), mdt),           # im2col LHS
            pltpu.VMEM((th * wo, cp_out), jnp.float32), # matmul result
        ],
        compiler_params=pltpu.CompilerParams(
            dimension_semantics=("parallel", "arbitrary"),
            vmem_limit_bytes=vmem_limit),
    )(x_in, w_t)

    # BN training statistics over (N, H, W), biased variance, f32 accumulators.
    m_total = float(n * ho * wo)
    mean = jnp.sum(s1, axis=0) / m_total                 # (1, cp_out)
    var = jnp.maximum(jnp.sum(s2, axis=0) / m_total - mean * mean, 0.0)
    gamma_p = jnp.pad(gamma.astype(jnp.float32), (0, cp_out - c_out)).reshape(1, cp_out)
    beta_p = jnp.pad(beta.astype(jnp.float32), (0, cp_out - c_out)).reshape(1, cp_out)
    scale = gamma_p * jax.lax.rsqrt(var + EPS)
    shift = beta_p - mean * scale

    # Pass 2: lane-dense, row-tiled normalize + SiLU (+ residual); fully parallel.
    th2 = _largest_divisor(ho, max(1, (2 * 1024 * 1024) // max(1, wo * cp_out * 4)))
    grid2 = (n, ho // th2)
    row_spec = pl.BlockSpec((None, th2, wo, cp_out), lambda ni, j: (ni, j, 0, 0))
    vec_spec = pl.BlockSpec((1, cp_out), lambda ni, j: (0, 0))
    params2 = pltpu.CompilerParams(dimension_semantics=("parallel", "parallel"),
                                   vmem_limit_bytes=vmem_limit)
    out_shape2 = jax.ShapeDtypeStruct((n, ho, wo, cp_out), out_dtype)
    if residual is None:
        out = pl.pallas_call(
            _bn_silu_kernel, grid=grid2,
            in_specs=[row_spec, vec_spec, vec_spec],
            out_specs=row_spec, out_shape=out_shape2,
            compiler_params=params2,
        )(y, scale, shift)
    else:
        assert residual.shape == (n, ho, wo, cp_out)
        out = pl.pallas_call(
            _bn_silu_res_kernel, grid=grid2,
            in_specs=[row_spec, vec_spec, vec_spec, row_spec],
            out_specs=row_spec, out_shape=out_shape2,
            compiler_params=params2,
        )(y, scale, shift, residual)
    return out


def bottleneck_forward(x_nchw, w1, g1, b1, w2, g2, b2, *, shortcut=True,
                       matmul_dtype=jnp.bfloat16):
    """Bottleneck.forward with training-mode BatchNorm statistics."""
    n, c1, h, w = x_nchw.shape
    c_mid = w1.shape[0]
    c2 = w2.shape[0]
    add = shortcut and (c1 == c2)

    cp1 = _round_up(c1, LANE)
    x_nhwc = jnp.transpose(x_nchw, (0, 2, 3, 1)).astype(jnp.float32)
    x_pad = jnp.pad(x_nhwc, ((0, 0), (0, 0), (0, 0), (0, cp1 - c1)))

    # conv1 emits its activation in the matmul dtype so conv2's MXU pass
    # consumes it directly (no XLA pad/cast roundtrip between the two convs).
    h1 = conv_bn_silu(x_pad, c1, w1, g1, b1,
                      matmul_dtype=matmul_dtype, out_dtype=matmul_dtype)
    h2 = conv_bn_silu(h1, c_mid, w2, g2, b2,
                      residual=x_pad if add else None,      # f32 residual
                      matmul_dtype=matmul_dtype, out_dtype=jnp.float32)

    out = h2[..., :c2]                       # drop lane padding
    return jnp.transpose(out, (0, 3, 1, 2))  # back to NCHW once, at the very end


# ----------------------------- pure-JAX reference -----------------------------

def _ref_conv_bn_silu(x_nchw, weight, gamma, beta):
    p = weight.shape[-1] // 2
    y = jax.lax.conv_general_dilated(
        x_nchw, weight, window_strides=(1, 1), padding=((p, p), (p, p)),
        dimension_numbers=("NCHW", "OIHW", "NCHW"),
        precision=jax.lax.Precision.HIGHEST)
    mean = y.mean(axis=(0, 2, 3), keepdims=True)
    var = ((y - mean) ** 2).mean(axis=(0, 2, 3), keepdims=True)
    z = (y - mean) * jax.lax.rsqrt(var + EPS)
    z = z * gamma.reshape(1, -1, 1, 1) + beta.reshape(1, -1, 1, 1)
    return z * jax.nn.sigmoid(z)


def _ref_bottleneck(x, w1, g1, b1, w2, g2, b2, add):
    h1 = _ref_conv_bn_silu(x, w1, g1, b1)
    h2 = _ref_conv_bn_silu(h1, w2, g2, b2)
    return x + h2 if add else h2


if __name__ == "__main__":
    # Bottleneck(c1=4, c2=4, shortcut=True, k=(3,3), e=0.5) -> c_ = 2, add = True
    N, C1, H, W = 2, 4, 16, 16
    C2, C_MID = 4, 2

    key = jax.random.PRNGKey(0)
    kx, k1, k2, k3, k4, k5, k6 = jax.random.split(key, 7)
    x = jax.random.normal(kx, (N, C1, H, W), dtype=jnp.float32)
    w1 = 0.3 * jax.random.normal(k1, (C_MID, C1, 3, 3), dtype=jnp.float32)
    g1 = 1.0 + 0.1 * jax.random.normal(k2, (C_MID,), dtype=jnp.float32)
    b1 = 0.1 * jax.random.normal(k3, (C_MID,), dtype=jnp.float32)
    w2 = 0.3 * jax.random.normal(k4, (C2, C_MID, 3, 3), dtype=jnp.float32)
    g2 = 1.0 + 0.1 * jax.random.normal(k5, (C2,), dtype=jnp.float32)
    b2 = 0.1 * jax.random.normal(k6, (C2,), dtype=jnp.float32)

    ref = _ref_bottleneck(x, w1, g1, b1, w2, g2, b2, add=True)

    # Strict numerical check: f32 MXU inputs.
    fwd_f32 = jax.jit(functools.partial(bottleneck_forward, shortcut=True,
                                        matmul_dtype=jnp.float32))
    out_f32 = jax.block_until_ready(fwd_f32(x, w1, g1, b1, w2, g2, b2))
    assert out_f32.shape == (N, C2, H, W)
    err_f32 = float(jnp.max(jnp.abs(out_f32 - ref)))
    assert jnp.allclose(out_f32, ref, atol=2e-3, rtol=2e-3), err_f32

    # Default performance path: bf16 MXU inputs, f32 accumulation + f32 BN math.
    fwd_bf16 = jax.jit(functools.partial(bottleneck_forward, shortcut=True))
    out_bf16 = jax.block_until_ready(fwd_bf16(x, w1, g1, b1, w2, g2, b2))
    assert out_bf16.shape == (N, C2, H, W)
    err_bf16 = float(jnp.max(jnp.abs(out_bf16 - ref)))
    assert jnp.allclose(out_bf16, ref, atol=2e-1, rtol=2e-1), err_bf16

    print("KERNEL_OK")
</pallas_src>

<mosaic_0001>
module attributes {stable_mosaic.version = 11 : i64} {
  func.func @kernel(%arg0: i32, %arg1: i32, %arg2: memref<1x16x16x128xf32, #tpu.memory_space<vmem>>, %arg3: memref<1152x128xf32, #tpu.memory_space<vmem>>, %arg4: memref<1x16x16x128xf32, #tpu.memory_space<vmem>>, %arg5: memref<1x1x128xf32, #tpu.memory_space<vmem>>, %arg6: memref<1x1x128xf32, #tpu.memory_space<vmem>>, %arg7: memref<18x18x128xf32, #tpu.memory_space<vmem>>, %arg8: memref<256x1152xf32, #tpu.memory_space<vmem>>, %arg9: memref<256x128xf32, #tpu.memory_space<vmem>>) attributes {dimension_semantics = [#tpu.dimension_semantics<parallel>, #tpu.dimension_semantics<arbitrary>], iteration_bounds = array<i64: 2, 1>, scalar_prefetch = 0 : i64, scratch_operands = 3 : i64, tpu.core_type = #tpu.core_type<tc>, window_params = [{transform_indices = @transform_0, window_bounds = array<i64: 1, 16, 16, 128>}, {pipeline_mode = #tpu.pipeline_mode<synchronous>, transform_indices = @transform_1, window_bounds = array<i64: 1152, 128>}, {transform_indices = @transform_2, window_bounds = array<i64: 1, 16, 16, 128>}, {transform_indices = @transform_3, window_bounds = array<i64: 1, 1, 128>}, {transform_indices = @transform_4, window_bounds = array<i64: 1, 1, 128>}]} {
    %c0_i32 = arith.constant 0 : i32
    %0 = arith.cmpi eq, %arg1, %c0_i32 : i32
    %1 = arith.extui %0 : i1 to i32
    %c0_i32_0 = arith.constant 0 : i32
    %2 = arith.cmpi ne, %1, %c0_i32_0 : i32
    scf.if %2 {
      %cst_65 = arith.constant 0.000000e+00 : f32
      %78 = vector.broadcast %cst_65 : f32 to vector<18x18x128xf32>
      %c0_66 = arith.constant 0 : index
      %c0_67 = arith.constant 0 : index
      %c0_68 = arith.constant 0 : index
      %79 = vector.load %arg7[%c0_66, %c0_67, %c0_68] : memref<18x18x128xf32, #tpu.memory_space<vmem>>, vector<18x18x128xf32>
      tpu.vector_store %arg7[%c0_66, %c0_67, %c0_68], %78 {strides = array<i32>} : memref<18x18x128xf32, #tpu.memory_space<vmem>>, vector<18x18x128xf32>,
      %c0_69 = arith.constant 0 : index
      %c0_70 = arith.constant 0 : index
      %c0_71 = arith.constant 0 : index
      %c0_72 = arith.constant 0 : index
      %80 = vector.load %arg2[%c0_69, %c0_70, %c0_71, %c0_72] : memref<1x16x16x128xf32, #tpu.memory_space<vmem>>, vector<1x16x16x128xf32>
      %81 = vector.shape_cast %80 : vector<1x16x16x128xf32> to vector<16x16x128xf32>
      %c1_73 = arith.constant 1 : index
      %c1_74 = arith.constant 1 : index
      %c0_75 = arith.constant 0 : index
      %82 = vector.load %arg7[%c1_73, %c1_74, %c0_75] : memref<18x18x128xf32, #tpu.memory_space<vmem>>, vector<16x16x128xf32>
      tpu.vector_store %arg7[%c1_73, %c1_74, %c0_75], %81 {strides = array<i32>} : memref<18x18x128xf32, #tpu.memory_space<vmem>>, vector<16x16x128xf32>,
      %cst_76 = arith.constant 0.000000e+00 : f32
      %83 = vector.broadcast %cst_76 : f32 to vector<1x128xf32>
      %c0_77 = arith.constant 0 : index
      %c0_78 = arith.constant 0 : index
      %c0_79 = arith.constant 0 : index
      %84 = vector.load %arg5[%c0_77, %c0_78, %c0_79] : memref<1x1x128xf32, #tpu.memory_space<vmem>>, vector<1x1x128xf32>
      %85 = vector.shape_cast %84 : vector<1x1x128xf32> to vector<1x128xf32>
      %86 = vector.shape_cast %83 : vector<1x128xf32> to vector<1x1x128xf32>
      tpu.vector_store %arg5[%c0_77, %c0_78, %c0_79], %86 {strides = array<i32>} : memref<1x1x128xf32, #tpu.memory_space<vmem>>, vector<1x1x128xf32>,
      %cst_80 = arith.constant 0.000000e+00 : f32
      %87 = vector.broadcast %cst_80 : f32 to vector<1x128xf32>
      %c0_81 = arith.constant 0 : index
      %c0_82 = arith.constant 0 : index
      %c0_83 = arith.constant 0 : index
      %88 = vector.load %arg6[%c0_81, %c0_82, %c0_83] : memref<1x1x128xf32, #tpu.memory_space<vmem>>, vector<1x1x128xf32>
      %89 = vector.shape_cast %88 : vector<1x1x128xf32> to vector<1x128xf32>
      %90 = vector.shape_cast %87 : vector<1x128xf32> to vector<1x1x128xf32>
      tpu.vector_store %arg6[%c0_81, %c0_82, %c0_83], %90 {strides = array<i32>} : memref<1x1x128xf32, #tpu.memory_space<vmem>>, vector<1x1x128xf32>,
    } else {
    }
    %c16_i32 = arith.constant 16 : i32
    %3 = arith.muli %arg1, %c16_i32 : i32
    %c0_i32_1 = arith.constant 0 : i32
    %4 = arith.addi %3, %c0_i32_1 : i32
    %5 = arith.index_cast %4 : i32 to index
    %c0 = arith.constant 0 : index
    %c0_2 = arith.constant 0 : index
    %6 = vector.load %arg7[%5, %c0, %c0_2] : memref<18x18x128xf32, #tpu.memory_space<vmem>>, vector<16x16x128xf32>
    %7 = vector.shape_cast %6 : vector<16x16x128xf32> to vector<256x128xf32>
    %c0_3 = arith.constant 0 : index
    %c0_4 = arith.constant 0 : index
    %8 = vector.load %arg8[%c0_3, %c0_4] : memref<256x1152xf32, #tpu.memory_space<vmem>>, vector<256x128xf32>
    tpu.vector_store %arg8[%c0_3, %c0_4], %7 {strides = array<i32>} : memref<256x1152xf32, #tpu.memory_space<vmem>>, vector<256x128xf32>,
    %c0_i32_5 = arith.constant 0 : i32
    %9 = arith.addi %3, %c0_i32_5 : i32
    %10 = arith.index_cast %9 : i32 to index
    %c1 = arith.constant 1 : index
    %c0_6 = arith.constant 0 : index
    %11 = vector.load %arg7[%10, %c1, %c0_6] : memref<18x18x128xf32, #tpu.memory_space<vmem>>, vector<16x16x128xf32>
    %12 = vector.shape_cast %11 : vector<16x16x128xf32> to vector<256x128xf32>
    %c0_7 = arith.constant 0 : index
    %c128 = arith.constant 128 : index
    %13 = vector.load %arg8[%c0_7, %c128] : memref<256x1152xf32, #tpu.memory_space<vmem>>, vector<256x128xf32>
    tpu.vector_store %arg8[%c0_7, %c128], %12 {strides = array<i32>} : memref<256x1152xf32, #tpu.memory_space<vmem>>, vector<256x128xf32>,
    %c0_i32_8 = arith.constant 0 : i32
    %14 = arith.addi %3, %c0_i32_8 : i32
    %15 = arith.index_cast %14 : i32 to index
    %c2 = arith.constant 2 : index
    %c0_9 = arith.constant 0 : index
    %16 = vector.load %arg7[%15, %c2, %c0_9] : memref<18x18x128xf32, #tpu.memory_space<vmem>>, vector<16x16x128xf32>
    %17 = vector.shape_cast %16 : vector<16x16x128xf32> to vector<256x128xf32>
    %c0_10 = arith.constant 0 : index
    %c256 = arith.constant 256 : index
    %18 = vector.load %arg8[%c0_10, %c256] : memref<256x1152xf32, #tpu.memory_space<vmem>>, vector<256x128xf32>
    tpu.vector_store %arg8[%c0_10, %c256], %17 {strides = array<i32>} : memref<256x1152xf32, #tpu.memory_space<vmem>>, vector<256x128xf32>,
    %c1_i32 = arith.constant 1 : i32
    %19 = arith.addi %3, %c1_i32 : i32
    %20 = arith.index_cast %19 : i32 to index
    %c0_11 = arith.constant 0 : index
    %c0_12 = arith.constant 0 : index
    %21 = vector.load %arg7[%20, %c0_11, %c0_12] : memref<18x18x128xf32, #tpu.memory_space<vmem>>, vector<16x16x128xf32>
    %22 = vector.shape_cast %21 : vector<16x16x128xf32> to vector<256x128xf32>
    %c0_13 = arith.constant 0 : index
    %c384 = arith.constant 384 : index
    %23 = vector.load %arg8[%c0_13, %c384] : memref<256x1152xf32, #tpu.memory_space<vmem>>, vector<256x128xf32>
    tpu.vector_store %arg8[%c0_13, %c384], %22 {strides = array<i32>} : memref<256x1152xf32, #tpu.memory_space<vmem>>, vector<256x128xf32>,
    %c1_i32_14 = arith.constant 1 : i32
    %24 = arith.addi %3, %c1_i32_14 : i32
    %25 = arith.index_cast %24 : i32 to index
    %c1_15 = arith.constant 1 : index
    %c0_16 = arith.constant 0 : index
    %26 = vector.load %arg7[%25, %c1_15, %c0_16] : memref<18x18x128xf32, #tpu.memory_space<vmem>>, vector<16x16x128xf32>
    %27 = vector.shape_cast %26 : vector<16x16x128xf32> to vector<256x128xf32>
    %c0_17 = arith.constant 0 : index
    %c512 = arith.constant 512 : index
    %28 = vector.load %arg8[%c0_17, %c512] : memref<256x1152xf32, #tpu.memory_space<vmem>>, vector<256x128xf32>
    tpu.vector_store %arg8[%c0_17, %c512], %27 {strides = array<i32>} : memref<256x1152xf32, #tpu.memory_space<vmem>>, vector<256x128xf32>,
    %c1_i32_18 = arith.constant 1 : i32
    %29 = arith.addi %3, %c1_i32_18 : i32
    %30 = arith.index_cast %29 : i32 to index
    %c2_19 = arith.constant 2 : index
    %c0_20 = arith.constant 0 : index
    %31 = vector.load %arg7[%30, %c2_19, %c0_20] : memref<18x18x128xf32, #tpu.memory_space<vmem>>, vector<16x16x128xf32>
    %32 = vector.shape_cast %31 : vector<16x16x128xf32> to vector<256x128xf32>
    %c0_21 = arith.constant 0 : index
    %c640 = arith.constant 640 : index
    %33 = vector.load %arg8[%c0_21, %c640] : memref<256x1152xf32, #tpu.memory_space<vmem>>, vector<256x128xf32>
    tpu.vector_store %arg8[%c0_21, %c640], %32 {strides = array<i32>} : memref<256x1152xf32, #tpu.memory_space<vmem>>, vector<256x128xf32>,
    %c2_i32 = arith.constant 2 : i32
    %34 = arith.addi %3, %c2_i32 : i32
    %35 = arith.index_cast %34 : i32 to index
    %c0_22 = arith.constant 0 : index
    %c0_23 = arith.constant 0 : index
    %36 = vector.load %arg7[%35, %c0_22, %c0_23] : memref<18x18x128xf32, #tpu.memory_space<vmem>>, vector<16x16x128xf32>
    %37 = vector.shape_cast %36 : vector<16x16x128xf32> to vector<256x128xf32>
    %c0_24 = arith.constant 0 : index
    %c768 = arith.constant 768 : index
    %38 = vector.load %arg8[%c0_24, %c768] : memref<256x1152xf32, #tpu.memory_space<vmem>>, vector<256x128xf32>
    tpu.vector_store %arg8[%c0_24, %c768], %37 {strides = array<i32>} : memref<256x1152xf32, #tpu.memory_space<vmem>>, vector<256x128xf32>,
    %c2_i32_25 = arith.constant 2 : i32
    %39 = arith.addi %3, %c2_i32_25 : i32
    %40 = arith.index_cast %39 : i32 to index
    %c1_26 = arith.constant 1 : index
    %c0_27 = arith.constant 0 : index
    %41 = vector.load %arg7[%40, %c1_26, %c0_27] : memref<18x18x128xf32, #tpu.memory_space<vmem>>, vector<16x16x128xf32>
    %42 = vector.shape_cast %41 : vector<16x16x128xf32> to vector<256x128xf32>
    %c0_28 = arith.constant 0 : index
    %c896 = arith.constant 896 : index
    %43 = vector.load %arg8[%c0_28, %c896] : memref<256x1152xf32, #tpu.memory_space<vmem>>, vector<256x128xf32>
    tpu.vector_store %arg8[%c0_28, %c896], %42 {strides = array<i32>} : memref<256x1152xf32, #tpu.memory_space<vmem>>, vector<256x128xf32>,
    %c2_i32_29 = arith.constant 2 : i32
    %44 = arith.addi %3, %c2_i32_29 : i32
    %45 = arith.index_cast %44 : i32 to index
    %c2_30 = arith.constant 2 : index
    %c0_31 = arith.constant 0 : index
    %46 = vector.load %arg7[%45, %c2_30, %c0_31] : memref<18x18x128xf32, #tpu.memory_space<vmem>>, vector<16x16x128xf32>
    %47 = vector.shape_cast %46 : vector<16x16x128xf32> to vector<256x128xf32>
    %c0_32 = arith.constant 0 : index
    %c1024 = arith.constant 1024 : index
    %48 = vector.load %arg8[%c0_32, %c1024] : memref<256x1152xf32, #tpu.memory_space<vmem>>, vector<256x128xf32>
    tpu.vector_store %arg8[%c0_32, %c1024], %47 {strides = array<i32>} : memref<256x1152xf32, #tpu.memory_space<vmem>>, vector<256x128xf32>,
    %c0_33 = arith.constant 0 : index
    %c0_34 = arith.constant 0 : index
    %49 = vector.load %arg8[%c0_33, %c0_34] : memref<256x1152xf32, #tpu.memory_space<vmem>>, vector<256x1152xf32>
    %c0_35 = arith.constant 0 : index
    %c0_36 = arith.constant 0 : index
    %50 = vector.load %arg3[%c0_35, %c0_36] : memref<1152x128xf32, #tpu.memory_space<vmem>>, vector<1152x128xf32>
    %cst = arith.constant dense<0.000000e+00> : vector<256x128xf32>
    %51 = tpu.matmul %49, %50, %cst {dimension_numbers = #tpu.dot_dimension_numbers<[1], [0], [0], [1], [0, 0, 1, 1], [], []>} : vector<256x1152xf32>, vector<1152x128xf32>, vector<256x128xf32> -> vector<256x128xf32>
    %c0_37 = arith.constant 0 : index
    %c0_38 = arith.constant 0 : index
    %52 = vector.load %arg9[%c0_37, %c0_38] : memref<256x128xf32, #tpu.memory_space<vmem>>, vector<256x128xf32>
    tpu.vector_store %arg9[%c0_37, %c0_38], %51 {strides = array<i32>} : memref<256x128xf32, #tpu.memory_space<vmem>>, vector<256x128xf32>,
    %c0_39 = arith.constant 0 : index
    %c0_40 = arith.constant 0 : index
    %53 = vector.load %arg9[%c0_39, %c0_40] : memref<256x128xf32, #tpu.memory_space<vmem>>, vector<256x128xf32>
    %54 = vector.shape_cast %53 : vector<256x128xf32> to vector<16x16x128xf32>
    %c0_41 = arith.constant 0 : index
    %c0_42 = arith.constant 0 : index
    %c0_43 = arith.constant 0 : index
    %c0_44 = arith.constant 0 : index
    %55 = vector.load %arg4[%c0_41, %c0_42, %c0_43, %c0_44] : memref<1x16x16x128xf32, #tpu.memory_space<vmem>>, vector<1x16x16x128xf32>
    %56 = vector.shape_cast %55 : vector<1x16x16x128xf32> to vector<16x16x128xf32>
    %57 = vector.shape_cast %54 : vector<16x16x128xf32> to vector<1x16x16x128xf32>
    tpu.vector_store %arg4[%c0_41, %c0_42, %c0_43, %c0_44], %57 {strides = array<i32>} : memref<1x16x16x128xf32, #tpu.memory_space<vmem>>, vector<1x16x16x128xf32>,
    %c0_45 = arith.constant 0 : index
    %c0_46 = arith.constant 0 : index
    %c0_47 = arith.constant 0 : index
    %58 = vector.load %arg5[%c0_45, %c0_46, %c0_47] : memref<1x1x128xf32, #tpu.memory_space<vmem>>, vector<1x1x128xf32>
    %59 = vector.shape_cast %58 : vector<1x1x128xf32> to vector<1x128xf32>
    %c0_48 = arith.constant 0 : index
    %c0_49 = arith.constant 0 : index
    %60 = vector.load %arg9[%c0_48, %c0_49] : memref<256x128xf32, #tpu.memory_space<vmem>>, vector<256x128xf32>
    %cst_50 = arith.constant dense<0.000000e+00> : vector<128xf32>
    %61 = vector.multi_reduction <add>, %60, %cst_50 [0] : vector<256x128xf32> to vector<128xf32>
    %62 = vector.shape_cast %61 : vector<128xf32> to vector<1x128xf32>
    %63 = arith.addf %59, %62 : vector<1x128xf32>
    %c0_51 = arith.constant 0 : index
    %c0_52 = arith.constant 0 : index
    %c0_53 = arith.constant 0 : index
    %64 = vector.load %arg5[%c0_51, %c0_52, %c0_53] : memref<1x1x128xf32, #tpu.memory_space<vmem>>, vector<1x1x128xf32>
    %65 = vector.shape_cast %64 : vector<1x1x128xf32> to vector<1x128xf32>
    %66 = vector.shape_cast %63 : vector<1x128xf32> to vector<1x1x128xf32>
    tpu.vector_store %arg5[%c0_51, %c0_52, %c0_53], %66 {strides = array<i32>} : memref<1x1x128xf32, #tpu.memory_space<vmem>>, vector<1x1x128xf32>,
    %c0_54 = arith.constant 0 : index
    %c0_55 = arith.constant 0 : index
    %c0_56 = arith.constant 0 : index
    %67 = vector.load %arg6[%c0_54, %c0_55, %c0_56] : memref<1x1x128xf32, #tpu.memory_space<vmem>>, vector<1x1x128xf32>
    %68 = vector.shape_cast %67 : vector<1x1x128xf32> to vector<1x128xf32>
    %c0_57 = arith.constant 0 : index
    %c0_58 = arith.constant 0 : index
    %69 = vector.load %arg9[%c0_57, %c0_58] : memref<256x128xf32, #tpu.memory_space<vmem>>, vector<256x128xf32>
    %c0_59 = arith.constant 0 : index
    %c0_60 = arith.constant 0 : index
    %70 = vector.load %arg9[%c0_59, %c0_60] : memref<256x128xf32, #tpu.memory_space<vmem>>, vector<256x128xf32>
    %71 = arith.mulf %69, %70 : vector<256x128xf32>
    %cst_61 = arith.constant dense<0.000000e+00> : vector<128xf32>
    %72 = vector.multi_reduction <add>, %71, %cst_61 [0] : vector<256x128xf32> to vector<128xf32>
    %73 = vector.shape_cast %72 : vector<128xf32> to vector<1x128xf32>
    %74 = arith.addf %68, %73 : vector<1x128xf32>
    %c0_62 = arith.constant 0 : index
    %c0_63 = arith.constant 0 : index
    %c0_64 = arith.constant 0 : index
    %75 = vector.load %arg6[%c0_62, %c0_63, %c0_64] : memref<1x1x128xf32, #tpu.memory_space<vmem>>, vector<1x1x128xf32>
    %76 = vector.shape_cast %75 : vector<1x1x128xf32> to vector<1x128xf32>
    %77 = vector.shape_cast %74 : vector<1x128xf32> to vector<1x1x128xf32>
    tpu.vector_store %arg6[%c0_62, %c0_63, %c0_64], %77 {strides = array<i32>} : memref<1x1x128xf32, #tpu.memory_space<vmem>>, vector<1x1x128xf32>,
    return
  }
  func.func @transform_0(%arg0: i32, %arg1: i32) -> (i32, i32, i32, i32) {
    %c0_i32 = arith.constant 0 : i32
    %c0_i32_0 = arith.constant 0 : i32
    %c0_i32_1 = arith.constant 0 : i32
    %c0_i32_2 = arith.constant 0 : i32
    return %arg0, %c0_i32, %c0_i32_0, %c0_i32_1 : i32, i32, i32, i32
  }
  func.func @transform_1(%arg0: i32, %arg1: i32) -> (i32, i32) {
    %c0_i32 = arith.constant 0 : i32
    %c0_i32_0 = arith.constant 0 : i32
    %c0_i32_1 = arith.constant 0 : i32
    return %c0_i32, %c0_i32_0 : i32, i32
  }
  func.func @transform_2(%arg0: i32, %arg1: i32) -> (i32, i32, i32, i32) {
    %c0_i32 = arith.constant 0 : i32
    %c0_i32_0 = arith.constant 0 : i32
    %c0_i32_1 = arith.constant 0 : i32
    return %arg0, %arg1, %c0_i32, %c0_i32_0 : i32, i32, i32, i32
  }
  func.func @transform_3(%arg0: i32, %arg1: i32) -> (i32, i32, i32) {
    %c0_i32 = arith.constant 0 : i32
    %c0_i32_0 = arith.constant 0 : i32
    %c0_i32_1 = arith.constant 0 : i32
    return %arg0, %c0_i32, %c0_i32_0 : i32, i32, i32
  }
  func.func @transform_4(%arg0: i32, %arg1: i32) -> (i32, i32, i32) {
    %c0_i32 = arith.constant 0 : i32
    %c0_i32_0 = arith.constant 0 : i32
    %c0_i32_1 = arith.constant 0 : i32
    return %arg0, %c0_i32, %c0_i32_0 : i32, i32, i32
  }
}

module attributes {stable_mosaic.version = 11 : i64} {
  func.func @_bn_silu_res_kernel(%arg0: i32, %arg1: i32, %arg2: memref<1x16x16x128xf32, #tpu.memory_space<vmem>>, %arg3: memref<1x128xf32, #tpu.memory_space<vmem>>, %arg4: memref<1x128xf32, #tpu.memory_space<vmem>>, %arg5: memref<1x16x16x128xf32, #tpu.memory_space<vmem>>, %arg6: memref<1x16x16x128xf32, #tpu.memory_space<vmem>>) attributes {dimension_semantics = [#tpu.dimension_semantics<parallel>, #tpu.dimension_semantics<parallel>], iteration_bounds = array<i64: 2, 1>, scalar_prefetch = 0 : i64, scratch_operands = 0 : i64, tpu.core_type = #tpu.core_type<tc>, window_params = [{transform_indices = @transform_0, window_bounds = array<i64: 1, 16, 16, 128>}, {pipeline_mode = #tpu.pipeline_mode<synchronous>, transform_indices = @transform_1, window_bounds = array<i64: 1, 128>}, {pipeline_mode = #tpu.pipeline_mode<synchronous>, transform_indices = @transform_2, window_bounds = array<i64: 1, 128>}, {transform_indices = @transform_3, window_bounds = array<i64: 1, 16, 16, 128>}, {transform_indices = @transform_4, window_bounds = array<i64: 1, 16, 16, 128>}]} {
    %c0 = arith.constant 0 : index
    %c0_0 = arith.constant 0 : index
    %c0_1 = arith.constant 0 : index
    %c0_2 = arith.constant 0 : index
    %0 = vector.load %arg2[%c0, %c0_0, %c0_1, %c0_2] : memref<1x16x16x128xf32, #tpu.memory_space<vmem>>, vector<1x16x16x128xf32>
    %1 = vector.shape_cast %0 : vector<1x16x16x128xf32> to vector<16x16x128xf32>
    %c0_3 = arith.constant 0 : index
    %c0_4 = arith.constant 0 : index
    %2 = vector.load %arg3[%c0_3, %c0_4] : memref<1x128xf32, #tpu.memory_space<vmem>>, vector<1x128xf32>
    %3 = vector.shape_cast %2 : vector<1x128xf32> to vector<1x1x128xf32>
    %4 = vector.broadcast %3 : vector<1x1x128xf32> to vector<16x16x128xf32>
    %5 = arith.mulf %1, %4 : vector<16x16x128xf32>
    %c0_5 = arith.constant 0 : index
    %c0_6 = arith.constant 0 : index
    %6 = vector.load %arg4[%c0_5, %c0_6] : memref<1x128xf32, #tpu.memory_space<vmem>>, vector<1x128xf32>
    %7 = vector.shape_cast %6 : vector<1x128xf32> to vector<1x1x128xf32>
    %8 = vector.broadcast %7 : vector<1x1x128xf32> to vector<16x16x128xf32>
    %9 = arith.addf %5, %8 : vector<16x16x128xf32>
    %cst = arith.constant 0.000000e+00 : f32
    %10 = vector.broadcast %cst : f32 to vector<16x16x128xf32>
    %11 = arith.subf %10, %9 : vector<16x16x128xf32>
    %12 = math.exp %11 : vector<16x16x128xf32>
    %cst_7 = arith.constant 1.000000e+00 : f32
    %13 = vector.broadcast %cst_7 : f32 to vector<16x16x128xf32>
    %14 = arith.addf %13, %12 : vector<16x16x128xf32>
    %cst_8 = arith.constant 1.000000e+00 : f32
    %15 = vector.broadcast %cst_8 : f32 to vector<16x16x128xf32>
    %16 = arith.divf %15, %14 : vector<16x16x128xf32>
    %17 = arith.mulf %9, %16 : vector<16x16x128xf32>
    %c0_9 = arith.constant 0 : index
    %c0_10 = arith.constant 0 : index
    %c0_11 = arith.constant 0 : index
    %c0_12 = arith.constant 0 : index
    %18 = vector.load %arg5[%c0_9, %c0_10, %c0_11, %c0_12] : memref<1x16x16x128xf32, #tpu.memory_space<vmem>>, vector<1x16x16x128xf32>
    %19 = vector.shape_cast %18 : vector<1x16x16x128xf32> to vector<16x16x128xf32>
    %20 = arith.addf %17, %19 : vector<16x16x128xf32>
    %c0_13 = arith.constant 0 : index
    %c0_14 = arith.constant 0 : index
    %c0_15 = arith.constant 0 : index
    %c0_16 = arith.constant 0 : index
    %21 = vector.load %arg6[%c0_13, %c0_14, %c0_15, %c0_16] : memref<1x16x16x128xf32, #tpu.memory_space<vmem>>, vector<1x16x16x128xf32>
    %22 = vector.shape_cast %21 : vector<1x16x16x128xf32> to vector<16x16x128xf32>
    %23 = vector.shape_cast %20 : vector<16x16x128xf32> to vector<1x16x16x128xf32>
    tpu.vector_store %arg6[%c0_13, %c0_14, %c0_15, %c0_16], %23 {strides = array<i32>} : memref<1x16x16x128xf32, #tpu.memory_space<vmem>>, vector<1x16x16x128xf32>,
    return
  }
  func.func @transform_0(%arg0: i32, %arg1: i32) -> (i32, i32, i32, i32) {
    %c0_i32 = arith.constant 0 : i32
    %c0_i32_0 = arith.constant 0 : i32
    %c0_i32_1 = arith.constant 0 : i32
    return %arg0, %arg1, %c0_i32, %c0_i32_0 : i32, i32, i32, i32
  }
  func.func @transform_1(%arg0: i32, %arg1: i32) -> (i32, i32) {
    %c0_i32 = arith.constant 0 : i32
    %c0_i32_0 = arith.constant 0 : i32
    %c0_i32_1 = arith.constant 0 : i32
    return %c0_i32, %c0_i32_0 : i32, i32
  }
  func.func @transform_2(%arg0: i32, %arg1: i32) -> (i32, i32) {
    %c0_i32 = arith.constant 0 : i32
    %c0_i32_0 = arith.constant 0 : i32
    %c0_i32_1 = arith.constant 0 : i32
    return %c0_i32, %c0_i32_0 : i32, i32
  }
  func.func @transform_3(%arg0: i32, %arg1: i32) -> (i32, i32, i32, i32) {
    %c0_i32 = arith.constant 0 : i32
    %c0_i32_0 = arith.constant 0 : i32
    %c0_i32_1 = arith.constant 0 : i32
    return %arg0, %arg1, %c0_i32, %c0_i32_0 : i32, i32, i32, i32
  }
  func.func @transform_4(%arg0: i32, %arg1: i32) -> (i32, i32, i32, i32) {
    %c0_i32 = arith.constant 0 : i32
    %c0_i32_0 = arith.constant 0 : i32
    %c0_i32_1 = arith.constant 0 : i32
    return %arg0, %arg1, %c0_i32, %c0_i32_0 : i32, i32, i32, i32
  }
}

module attributes {stable_mosaic.version = 11 : i64} {
  func.func @_bn_silu_kernel(%arg0: i32, %arg1: i32, %arg2: memref<1x16x16x128xf32, #tpu.memory_space<vmem>>, %arg3: memref<1x128xf32, #tpu.memory_space<vmem>>, %arg4: memref<1x128xf32, #tpu.memory_space<vmem>>, %arg5: memref<1x16x16x128xf32, #tpu.memory_space<vmem>>) attributes {dimension_semantics = [#tpu.dimension_semantics<parallel>, #tpu.dimension_semantics<parallel>], iteration_bounds = array<i64: 2, 1>, scalar_prefetch = 0 : i64, scratch_operands = 0 : i64, tpu.core_type = #tpu.core_type<tc>, window_params = [{transform_indices = @transform_0, window_bounds = array<i64: 1, 16, 16, 128>}, {pipeline_mode = #tpu.pipeline_mode<synchronous>, transform_indices = @transform_1, window_bounds = array<i64: 1, 128>}, {pipeline_mode = #tpu.pipeline_mode<synchronous>, transform_indices = @transform_2, window_bounds = array<i64: 1, 128>}, {transform_indices = @transform_3, window_bounds = array<i64: 1, 16, 16, 128>}]} {
    %c0 = arith.constant 0 : index
    %c0_0 = arith.constant 0 : index
    %c0_1 = arith.constant 0 : index
    %c0_2 = arith.constant 0 : index
    %0 = vector.load %arg2[%c0, %c0_0, %c0_1, %c0_2] : memref<1x16x16x128xf32, #tpu.memory_space<vmem>>, vector<1x16x16x128xf32>
    %1 = vector.shape_cast %0 : vector<1x16x16x128xf32> to vector<16x16x128xf32>
    %c0_3 = arith.constant 0 : index
    %c0_4 = arith.constant 0 : index
    %2 = vector.load %arg3[%c0_3, %c0_4] : memref<1x128xf32, #tpu.memory_space<vmem>>, vector<1x128xf32>
    %3 = vector.shape_cast %2 : vector<1x128xf32> to vector<1x1x128xf32>
    %4 = vector.broadcast %3 : vector<1x1x128xf32> to vector<16x16x128xf32>
    %5 = arith.mulf %1, %4 : vector<16x16x128xf32>
    %c0_5 = arith.constant 0 : index
    %c0_6 = arith.constant 0 : index
    %6 = vector.load %arg4[%c0_5, %c0_6] : memref<1x128xf32, #tpu.memory_space<vmem>>, vector<1x128xf32>
    %7 = vector.shape_cast %6 : vector<1x128xf32> to vector<1x1x128xf32>
    %8 = vector.broadcast %7 : vector<1x1x128xf32> to vector<16x16x128xf32>
    %9 = arith.addf %5, %8 : vector<16x16x128xf32>
    %cst = arith.constant 0.000000e+00 : f32
    %10 = vector.broadcast %cst : f32 to vector<16x16x128xf32>
    %11 = arith.subf %10, %9 : vector<16x16x128xf32>
    %12 = math.exp %11 : vector<16x16x128xf32>
    %cst_7 = arith.constant 1.000000e+00 : f32
    %13 = vector.broadcast %cst_7 : f32 to vector<16x16x128xf32>
    %14 = arith.addf %13, %12 : vector<16x16x128xf32>
    %cst_8 = arith.constant 1.000000e+00 : f32
    %15 = vector.broadcast %cst_8 : f32 to vector<16x16x128xf32>
    %16 = arith.divf %15, %14 : vector<16x16x128xf32>
    %17 = arith.mulf %9, %16 : vector<16x16x128xf32>
    %c0_9 = arith.constant 0 : index
    %c0_10 = arith.constant 0 : index
    %c0_11 = arith.constant 0 : index
    %c0_12 = arith.constant 0 : index
    %18 = vector.load %arg5[%c0_9, %c0_10, %c0_11, %c0_12] : memref<1x16x16x128xf32, #tpu.memory_space<vmem>>, vector<1x16x16x128xf32>
    %19 = vector.shape_cast %18 : vector<1x16x16x128xf32> to vector<16x16x128xf32>
    %20 = vector.shape_cast %17 : vector<16x16x128xf32> to vector<1x16x16x128xf32>
    tpu.vector_store %arg5[%c0_9, %c0_10, %c0_11, %c0_12], %20 {strides = array<i32>} : memref<1x16x16x128xf32, #tpu.memory_space<vmem>>, vector<1x16x16x128xf32>,
    return
  }
  func.func @transform_0(%arg0: i32, %arg1: i32) -> (i32, i32, i32, i32) {
    %c0_i32 = arith.constant 0 : i32
    %c0_i32_0 = arith.constant 0 : i32
    %c0_i32_1 = arith.constant 0 : i32
    return %arg0, %arg1, %c0_i32, %c0_i32_0 : i32, i32, i32, i32
  }
  func.func @transform_1(%arg0: i32, %arg1: i32) -> (i32, i32) {
    %c0_i32 = arith.constant 0 : i32
    %c0_i32_0 = arith.constant 0 : i32
    %c0_i32_1 = arith.constant 0 : i32
    return %c0_i32, %c0_i32_0 : i32, i32
  }
  func.func @transform_2(%arg0: i32, %arg1: i32) -> (i32, i32) {
    %c0_i32 = arith.constant 0 : i32
    %c0_i32_0 = arith.constant 0 : i32
    %c0_i32_1 = arith.constant 0 : i32
    return %c0_i32, %c0_i32_0 : i32, i32
  }
  func.func @transform_3(%arg0: i32, %arg1: i32) -> (i32, i32, i32, i32) {
    %c0_i32 = arith.constant 0 : i32
    %c0_i32_0 = arith.constant 0 : i32
    %c0_i32_1 = arith.constant 0 : i32
    return %arg0, %arg1, %c0_i32, %c0_i32_0 : i32, i32, i32, i32
  }
}

</mosaic_0001>

<bundles_post_ra>
// kernel: bottleneck_forward.7
= control target key start
LH: loop header
LB: loop body
LE: loop exit
PB: predicated region body
PF: predicated region fallthrough
CT: control target
= control target key end

     0   :  { %s1047_s15 = smov 0   ;;  %s1049_s16 = smov 0   ;;  %s1407_s0 = inlined_call_operand.vmem [shape: f32[2,16,16,128], index: 0, kind: input, shape index: {}]   ;;  %s1408_s1 = inlined_call_operand.vmem [shape: f32[1,128], index: 1, kind: input, shape index: {}]   ;;  %s1409_s2 = inlined_call_operand.vmem [shape: f32[1,128], index: 2, kind: input, shape index: {}]   ;;  %s1410_s3 = inlined_call_operand.vmem [shape: f32[2,16,16,128], index: 3, kind: input, shape index: {}]   ;;  %s1411_s4 = inlined_call_operand.vmem [shape: f32[2,16,16,128], index: 4, kind: output, shape index: {}]  }
   0x1   :  { %s1051_s17 = smov 0  }
   0x2 LB: > { %s26_s18 = sadd.s32 1, %s1016_s16  ;;  %p832_p0 = scmp.ge.s32.totalorder %s1020_s17, 1  ;;  %s1020_s17 = sphi %s1051_s17, %s14_s17   ;;  %s1016_s16 = sphi %s1049_s16, %s1413_s16   ;;  %s1012_s15 = sphi %s1047_s15, %s1412_s15  }
   0x3   : > { %p28_p1 = scmp.ge.s32.totalorder %s26_s18, 2  ;;  %p202_p2 = scmp.lt.s32.totalorder %s1020_s17, 3 }
   0x5   : > { %s1415_s18 = smov (%p28_p1, %s26_s18), 0  ;;  %p203_p3 = pnand %p832_p0, %p202_p2 }
   0x6   : > { %p249_p4 = scmp.lt.s32.totalorder (!%p203_p3), %s1012_s15, 1  ;;  %v1070_v0 = vld [vmem:[%s1408_s1] ss:$0 sm:$0xff] (!%p203_p3) }
   0x7   : > { %206 = sbr.rel (%p203_p3) target bundleno = 112 (0x70), region = 36  ;;  %v1082_v2 = vld [vmem:[%s1409_s2] ss:$0 sm:$0xff] (!%p203_p3) }
   0xe   : > { %s1417_s15 = smov (!%p249_p4, %s1012_s15), 1 }
   0xf   : > { %s1065_s19 = sshll.u32 %s1417_s15, 8 }
  0x10   : > { %s1076_s24 = scalar_lea.vmem %s1407_s0, %s1065_s19  ;;  %s1217_s29 = scalar_lea.vmem %s1410_s3, %s1065_s19 }
  0x11   : > { %v281_v1 = vld [vmem:[%s1076_s24] sm:$0xff]  ;;  %v282_v3 = vld [vmem:[%s1076_s24 + $0x8] sm:$0xff]  ;;  %v283_v6 = vld [vmem:[%s1076_s24 + $0x10] sm:$0xff]  ;;  %s1244_s6 = scalar_lea.vmem %s1411_s4, %s1065_s19 }
  0x12   : > { %v320_v4 = vmul.f32 %v1070_v0, %v281_v1  ;;  %v321_v5 = vmul.f32 %v1070_v0, %v282_v3  ;;  %v322_v7 = vmul.f32 %v1070_v0, %v283_v6  ;;  %v284_v8 = vld [vmem:[%s1076_s24 + $0x18] sm:$0xff]  ;;  %v285_v9 = vld [vmem:[%s1076_s24 + $0x20] sm:$0xff]  ;;  %v286_v14 = vld [vmem:[%s1076_s24 + $0x28] sm:$0xff] }
  0x13   : > { %v323_v12 = vmul.f32 %v1070_v0, %v284_v8  ;;  %v324_v13 = vmul.f32 %v1070_v0, %v285_v9  ;;  %v325_v16 = vmul.f32 %v1070_v0, %v286_v14  ;;  %v287_v17 = vld [vmem:[%s1076_s24 + $0x30] sm:$0xff]  ;;  %v288_v18 = vld [vmem:[%s1076_s24 + $0x38] sm:$0xff]  ;;  %v289_v27 = vld [vmem:[%s1076_s24 + $0x40] sm:$0xff] }
  0x14   : > { %v1092_v10 = vadd.f32 %v1082_v2, %v320_v4  ;;  %v1095_v11 = vadd.f32 %v1082_v2, %v321_v5  ;;  %v1101_v15 = vadd.f32 %v1082_v2, %v322_v7  ;;  %v326_v25 = vmul.f32 %v1070_v0, %v287_v17  ;;  %v290_v36 = vld [vmem:[%s1076_s24 + $0x48] sm:$0xff]  ;;  %v291_v37 = vld [vmem:[%s1076_s24 + $0x50] sm:$0xff]  ;;  %v292_v41 = vld [vmem:[%s1076_s24 + $0x58] sm:$0xff] }
  0x15   : > { %v1109_v21 = vadd.f32 %v1082_v2, %v323_v12  ;;  %v1112_v22 = vadd.f32 %v1082_v2, %v324_v13  ;;  %v1116_v24 = vadd.f32 %v1082_v2, %v325_v16  ;;  %v327_v26 = vmul.f32 %v1070_v0, %v288_v18  ;;  %v293_v48 = vld [vmem:[%s1076_s24 + $0x60] sm:$0xff]  ;;  %v294_v49 = vld [vmem:[%s1076_s24 + $0x68] sm:$0xff]  ;;  %v295_v59 = vld [vmem:[%s1076_s24 + $0x70] sm:$0xff] }
  0x16   : > { %v391_v19 = vsub.f32 0.0, %v1092_v10  ;;  %v392_v20 = vsub.f32 0.0, %v1095_v11  ;;  %v393_v23 = vsub.f32 0.0, %v1101_v15  ;;  %v1125_v34 = vadd.f32 %v1082_v2, %v326_v25  ;;  %v296_v63 = vld [vmem:[%s1076_s24 + $0x78] sm:$0xff]  ;;  %v297_v5 = vld [vmem:[%s1076_s24 + $0x80] sm:$0xff]  ;;  %v298_v6 = vld [vmem:[%s1076_s24 + $0x88] sm:$0xff] }
  0x17   : > { %v394_v30 = vsub.f32 0.0, %v1109_v21  ;;  %v395_v31 = vsub.f32 0.0, %v1112_v22  ;;  %v396_v33 = vsub.f32 0.0, %v1116_v24  ;;  %v1128_v35 = vadd.f32 %v1082_v2, %v327_v26 }
  0x18   : > { %v423_v28 = vmul.f32 1.442695, %v391_v19  ;;  %v425_v29 = vmul.f32 1.442695, %v392_v20  ;;  %v427_v32 = vmul.f32 1.442695, %v393_v23  ;;  %v328_v40 = vmul.f32 %v1070_v0, %v289_v27 }
  0x19   : > { %v429_v38 = vmul.f32 1.442695, %v394_v30  ;;  %v431_v39 = vmul.f32 1.442695, %v395_v31  ;;  %v433_v42 = vmul.f32 1.442695, %v396_v33  ;;  %v329_v46 = vmul.f32 %v1070_v0, %v290_v36 }
  0x1a   : > { %870 = vpow2.f32 %v423_v28  ;;  %v397_v43 = vsub.f32 0.0, %v1125_v34  ;;  %v398_v44 = vsub.f32 0.0, %v1128_v35  ;;  %v1137_v45 = vadd.f32 %v1082_v2, %v328_v40 }
  0x1b   : > { %872 = vpow2.f32 %v425_v29  ;;  %v330_v47 = vmul.f32 %v1070_v0, %v291_v37  ;;  %v331_v52 = vmul.f32 %v1070_v0, %v292_v41  ;;  %v1146_v54 = vadd.f32 %v1082_v2, %v329_v46 }
  0x1c   : > { %874 = vpow2.f32 %v427_v32  ;;  %v435_v50 = vmul.f32 1.442695, %v397_v43  ;;  %v437_v51 = vmul.f32 1.442695, %v398_v44  ;;  %v399_v53 = vsub.f32 0.0, %v1137_v45 }
  0x1d   : > { %876 = vpow2.f32 %v429_v38  ;;  %v1149_v55 = vadd.f32 %v1082_v2, %v330_v47  ;;  %v1152_v56 = vadd.f32 %v1082_v2, %v331_v52  ;;  %v332_v57 = vmul.f32 %v1070_v0, %v293_v48  ;;  %v299_v38 = vld [vmem:[%s1076_s24 + $0x90] sm:$0xff]  ;;  %v300_v48 = vld [vmem:[%s1076_s24 + $0x98] sm:$0xff] }
  0x1e   : > { %878 = vpow2.f32 %v431_v39  ;;  %v333_v58 = vmul.f32 %v1070_v0, %v294_v49  ;;  %v439_v60 = vmul.f32 1.442695, %v399_v53  ;;  %v400_v61 = vsub.f32 0.0, %v1146_v54  ;;  %v301_v53 = vld [vmem:[%s1076_s24 + $0xa0] sm:$0xff] }
  0x1f   : > { %880 = vpow2.f32 %v433_v42  ;;  %v401_v62 = vsub.f32 0.0, %v1149_v55  ;;  %v402_v1 = vsub.f32 0.0, %v1152_v56  ;;  %v1162_v3 = vadd.f32 %v1082_v2, %v332_v57  ;;  %v302_v57 = vld [vmem:[%s1076_s24 + $0xa8] sm:$0xff] }
  0x20   : > { %882 = vpow2.f32 %v435_v50  ;;  %v1165_v4 = vadd.f32 %v1082_v2, %v333_v58  ;;  %v441_v7 = vmul.f32 1.442695, %v400_v61  ;;  %v334_v9 = vmul.f32 %v1070_v0, %v295_v59 }
  0x21   : > { %884 = vpow2.f32 %v437_v51  ;;  %v443_v8 = vmul.f32 1.442695, %v401_v62  ;;  %v445_v12 = vmul.f32 1.442695, %v402_v1  ;;  %v403_v13 = vsub.f32 0.0, %v1162_v3  ;;  %v303_v62 = vld [vmem:[%s1076_s24 + $0xb0] sm:$0xff] }
  0x22   : > { %886 = vpow2.f32 %v439_v60  ;;  %v404_v14 = vsub.f32 0.0, %v1165_v4  ;;  %v335_v16 = vmul.f32 %v1070_v0, %v296_v63  ;;  %v1174_v18 = vadd.f32 %v1082_v2, %v334_v9 }
  0x23   : > { %888 = vpow2.f32 %v441_v7  ;;  %v336_v19 = vmul.f32 %v1070_v0, %v297_v5  ;;  %v337_v20 = vmul.f32 %v1070_v0, %v298_v6  ;;  %v447_v26 = vmul.f32 1.442695, %v403_v13 }
  0x24   : > { %v871_v17 = vpop.eup %870  ;;  %890 = vpow2.f32 %v443_v8  ;;  %v1178_v27 = vmul.f32 1.442695, %v404_v14  ;;  %v405_v30 = vsub.f32 0.0, %v1174_v18  ;;  %v1182_v31 = vadd.f32 %v1082_v2, %v335_v16 }
  0x25   : > { %v873_v23 = vpop.eup %872  ;;  %v487_v25 = vadd.f32 1.0, %v871_v17  ;;  %892 = vpow2.f32 %v445_v12  ;;  %v1185_v36 = vadd.f32 %v1082_v2, %v336_v19  ;;  %v1188_v37 = vadd.f32 %v1082_v2, %v337_v20 }
  0x26   : > { %v875_v28 = vpop.eup %874  ;;  %v488_v29 = vadd.f32 1.0, %v873_v23  ;;  %v1191_v41 = vmul.f32 1.442695, %v405_v30  ;;  %v406_v42 = vsub.f32 0.0, %v1182_v31  ;;  %v338_v52 = vmul.f32 %v1070_v0, %v299_v38 }
  0x27   : > { %v877_v32 = vpop.eup %876  ;;  %894 = vrcp.f32 %v487_v25  ;;  %v489_v33 = vadd.f32 1.0, %v875_v28  ;;  %v407_v46 = vsub.f32 0.0, %v1185_v36  ;;  %v408_v47 = vsub.f32 0.0, %v1188_v37 }
  0x28   : > { %v879_v39 = vpop.eup %878  ;;  %896 = vrcp.f32 %v488_v29  ;;  %v490_v40 = vadd.f32 1.0, %v877_v32  ;;  %v1197_v51 = vmul.f32 1.442695, %v406_v42  ;;  %v1208_v5 = vadd.f32 %v1082_v2, %v338_v52 }
  0x29   : > { %v881_v43 = vpop.eup %880  ;;  %898 = vrcp.f32 %v489_v33  ;;  %v491_v44 = vadd.f32 1.0, %v879_v39  ;;  %v1202_v60 = vmul.f32 1.442695, %v407_v46  ;;  %v1204_v61 = vmul.f32 1.442695, %v408_v47  ;;  %v615_v33 = vld [vmem:[%s1217_s29] sm:$0xff] }
  0x2a   : > { %v883_v49 = vpop.eup %882  ;;  %900 = vrcp.f32 %v490_v40  ;;  %v492_v50 = vadd.f32 1.0, %v881_v43  ;;  %v339_v6 = vmul.f32 %v1070_v0, %v300_v48  ;;  %v340_v8 = vmul.f32 %v1070_v0, %v301_v53  ;;  %v304_v47 = vld [vmem:[%s1076_s24 + $0xb8] sm:$0xff] }
  0x2b   : > { %v885_v58 = vpop.eup %884  ;;  %902 = vrcp.f32 %v491_v44  ;;  %v493_v59 = vadd.f32 1.0, %v883_v49  ;;  %v341_v9 = vmul.f32 %v1070_v0, %v302_v57  ;;  %v409_v13 = vsub.f32 0.0, %v1208_v5  ;;  %v616_v44 = vld [vmem:[%s1217_s29 + $0x8] sm:$0xff] }
  0x2c   : > { %v887_v63 = vpop.eup %886  ;;  %904 = vrcp.f32 %v492_v50  ;;  %v494_v1 = vadd.f32 1.0, %v885_v58  ;;  %v1221_v14 = vadd.f32 %v1082_v2, %v339_v6  ;;  %v342_v16 = vmul.f32 %v1070_v0, %v303_v62  ;;  %v617_v50 = vld [vmem:[%s1217_s29 + $0x10] sm:$0xff]  ;;  %v619_v6 = vld [vmem:[%s1217_s29 + $0x20] sm:$0xff] }
  0x2d   : > { %906 = vrcp.f32 %v493_v59  ;;  %v495_v7 = vadd.f32 1.0, %v887_v63  ;;  %v889_v12 = vpop.eup %888  ;;  %v1225_v20 = vadd.f32 %v1082_v2, %v340_v8  ;;  %v1228_v23 = vadd.f32 %v1082_v2, %v341_v9  ;;  %v618_v59 = vld [vmem:[%s1217_s29 + $0x18] sm:$0xff]  ;;  %v305_v8 = vld [vmem:[%s1076_s24 + $0xc0] sm:$0xff] }
  0x2e   : > { %908 = vrcp.f32 %v494_v1  ;;  %v891_v17 = vpop.eup %890  ;;  %v496_v19 = vadd.f32 1.0, %v889_v12  ;;  %v459_v29 = vmul.f32 1.442695, %v409_v13  ;;  %v410_v30 = vsub.f32 0.0, %v1221_v14  ;;  %v620_v12 = vld [vmem:[%s1217_s29 + $0x28] sm:$0xff] }
  0x2f   : > { %910 = vrcp.f32 %v495_v7  ;;  %v893_v25 = vpop.eup %892  ;;  %v497_v28 = vadd.f32 1.0, %v891_v17  ;;  %v411_v39 = vsub.f32 0.0, %v1225_v20  ;;  %v412_v40 = vsub.f32 0.0, %v1228_v23  ;;  %v621_v17 = vld [vmem:[%s1217_s29 + $0x30] sm:$0xff] }
  0x30   : > { %912 = vpow2.f32 %v447_v26  ;;  %v498_v38 = vadd.f32 1.0, %v893_v25  ;;  %v461_v26 = vmul.f32 1.442695, %v410_v30  ;;  %v1237_v46 = vadd.f32 %v1082_v2, %v342_v16 }
  0x31   : > { %v895_v32 = vpop.eup %894  ;;  %914 = vrcp.f32 %v496_v19  ;;  %v465_v52 = vmul.f32 1.442695, %v412_v40  ;;  %v343_v7 = vmul.f32 %v1070_v0, %v304_v47  ;;  %v344_v30 = vmul.f32 %v1070_v0, %v305_v8 }
  0x32   : > { %v897_v42 = vpop.eup %896  ;;  %v583_v43 = vmul.f32 %v895_v32, %v1092_v10  ;;  %916 = vrcp.f32 %v497_v28  ;;  %v463_v10 = vmul.f32 1.442695, %v411_v39  ;;  %v413_v62 = vsub.f32 0.0, %v1237_v46  ;;  %v622_v28 = vld [vmem:[%s1217_s29 + $0x38] sm:$0xff] }
  0x33   : > { %v899_v48 = vpop.eup %898  ;;  %v584_v49 = vmul.f32 %v897_v42, %v1095_v11  ;;  %918 = vrcp.f32 %v498_v38  ;;  %v1266_v19 = vadd.f32 %v1082_v2, %v343_v7  ;;  %v1280_v40 = vadd.f32 %v1082_v2, %v344_v30  ;;  %v306_v42 = vld [vmem:[%s1076_s24 + $0xc8] sm:$0xff] }
  0x34   : > { %v901_v53 = vpop.eup %900  ;;  %v647_v57 = vadd.f32 %v615_v33, %v583_v43  ;;  %v585_v58 = vmul.f32 %v899_v48, %v1101_v15  ;;  %920 = vpow2.f32 %v1178_v27  ;;  %v467_v13 = vmul.f32 1.442695, %v413_v62  ;;  %v623_v33 = vld [vmem:[%s1217_s29 + $0x40] sm:$0xff]  ;;  %v307_v43 = vld [vmem:[%s1076_s24 + $0xd0] sm:$0xff] }
  0x35   : > { %v903_v63 = vpop.eup %902  ;;  %v648_v1 = vadd.f32 %v616_v44, %v584_v49  ;;  %v586_v11 = vmul.f32 %v901_v53, %v1109_v21  ;;  %922 = vpow2.f32 %v1191_v41  ;;  %v414_v38 = vsub.f32 0.0, %v1266_v19 }
  0x36   : > { %v905_v9 = vpop.eup %904  ;;  %679 = vst [vmem:[%s1244_s6] sm:$0xff] %v647_v57  ;;  %v649_v15 = vadd.f32 %v617_v50, %v585_v58  ;;  %v587_v27 = vmul.f32 %v903_v63, %v1112_v22  ;;  %924 = vpow2.f32 %v1197_v51  ;;  %v625_v50 = vld [vmem:[%s1217_s29 + $0x50] sm:$0xff]  ;;  %v415_v53 = vsub.f32 0.0, %v1280_v40 }
  0x37   : > { %v907_v21 = vpop.eup %906  ;;  %680 = vst [vmem:[%s1244_s6 + $0x8] sm:$0xff] %v648_v1  ;;  %v650_v16 = vadd.f32 %v618_v59, %v586_v11  ;;  %v588_v41 = vmul.f32 %v905_v9, %v1116_v24  ;;  %926 = vpow2.f32 %v1202_v60  ;;  %v469_v48 = vmul.f32 1.442695, %v414_v38  ;;  %v626_v59 = vld [vmem:[%s1217_s29 + $0x58] sm:$0xff]  ;;  %v309_v9 = vld [vmem:[%s1076_s24 + $0xe0] sm:$0xff] }
  0x38   : > { %v909_v25 = vpop.eup %908  ;;  %681 = vst [vmem:[%s1244_s6 + $0x10] sm:$0xff] %v649_v15  ;;  %v651_v22 = vadd.f32 %v619_v6, %v587_v27  ;;  %v589_v51 = vmul.f32 %v907_v21, %v1125_v34  ;;  %928 = vpow2.f32 %v1204_v61  ;;  %v346_v62 = vmul.f32 %v1070_v0, %v307_v43  ;;  %v308_v11 = vld [vmem:[%s1076_s24 + $0xd8] sm:$0xff] }
  0x39   : > { %v911_v24 = vpop.eup %910  ;;  %682 = vst [vmem:[%s1244_s6 + $0x18] sm:$0xff] %v650_v16  ;;  %v652_v60 = vadd.f32 %v620_v12, %v588_v41  ;;  %v590_v32 = vmul.f32 %v909_v25, %v1128_v35  ;;  %930 = vpow2.f32 %v459_v29  ;;  %v624_v29 = vld [vmem:[%s1217_s29 + $0x48] sm:$0xff]  ;;  %v347_v41 = vmul.f32 %v1070_v0, %v308_v11 }
  0x3a   : > { %v913_v39 = vpop.eup %912  ;;  %683 = vst [vmem:[%s1244_s6 + $0x20] sm:$0xff] %v651_v22  ;;  %v653_v34 = vadd.f32 %v621_v17, %v589_v51  ;;  %v591_v61 = vmul.f32 %v911_v24, %v1137_v45  ;;  %932 = vpow2.f32 %v461_v26  ;;  %v348_v51 = vmul.f32 %v1070_v0, %v309_v9 }
  0x3b   : > { %v915_v44 = vpop.eup %914  ;;  %684 = vst [vmem:[%s1244_s6 + $0x28] sm:$0xff] %v652_v60  ;;  %v654_v35 = vadd.f32 %v622_v28, %v590_v32  ;;  %v499_v47 = vadd.f32 1.0, %v913_v39  ;;  %934 = vpow2.f32 %v463_v10  ;;  %v345_v10 = vmul.f32 %v1070_v0, %v306_v42  ;;  %v310_v28 = vld [vmem:[%s1076_s24 + $0xe8] sm:$0xff]  ;;  %v311_v32 = vld [vmem:[%s1076_s24 + $0xf0] sm:$0xff] }
  0x3c   : > { %v917_v49 = vpop.eup %916  ;;  %685 = vst [vmem:[%s1244_s6 + $0x30] sm:$0xff] %v653_v34  ;;  %v655_v45 = vadd.f32 %v623_v33, %v591_v61  ;;  %v592_v26 = vmul.f32 %v915_v44, %v1146_v54  ;;  %936 = vpow2.f32 %v465_v52  ;;  %v471_v52 = vmul.f32 1.442695, %v415_v53 }
  0x3d   : > { %v919_v57 = vpop.eup %918  ;;  %686 = vst [vmem:[%s1244_s6 + $0x38] sm:$0xff] %v654_v35  ;;  %v593_v58 = vmul.f32 %v917_v49, %v1149_v55  ;;  %938 = vrcp.f32 %v499_v47  ;;  %v1299_v8 = vadd.f32 %v1082_v2, %v345_v10  ;;  %v1314_v60 = vadd.f32 %v1082_v2, %v347_v41 }
  0x3e   : > { %v921_v63 = vpop.eup %920  ;;  %687 = vst [vmem:[%s1244_s6 + $0x40] sm:$0xff] %v655_v45  ;;  %v656_v54 = vadd.f32 %v624_v29, %v592_v26  ;;  %v594_v1 = vmul.f32 %v919_v57, %v1152_v56  ;;  %940 = vpow2.f32 %v467_v13  ;;  %v1304_v56 = vadd.f32 %v1082_v2, %v346_v62  ;;  %v627_v45 = vld [vmem:[%s1217_s29 + $0x60] sm:$0xff] }
  0x3f   : > { %v923_v6 = vpop.eup %922  ;;  %v657_v7 = vadd.f32 %v625_v50, %v593_v58  ;;  %v500_v55 = vadd.f32 1.0, %v921_v63  ;;  %942 = vpow2.f32 %v469_v48  ;;  %v416_v16 = vsub.f32 0.0, %v1299_v8  ;;  %v312_v48 = vld [vmem:[%s1076_s24 + $0xf8] sm:$0xff] }
  0x40   : > { %v925_v15 = vpop.eup %924  ;;  %688 = vst [vmem:[%s1244_s6 + $0x48] sm:$0xff] %v656_v54  ;;  %v658_v27 = vadd.f32 %v626_v59, %v594_v1  ;;  %v501_v12 = vadd.f32 1.0, %v923_v6  ;;  %944 = vpow2.f32 %v471_v52  ;;  %v417_v22 = vsub.f32 0.0, %v1304_v56 }
  0x41   : > { %v927_v13 = vpop.eup %926  ;;  %689 = vst [vmem:[%s1244_s6 + $0x50] sm:$0xff] %v657_v7  ;;  %946 = vrcp.f32 %v500_v55  ;;  %v502_v21 = vadd.f32 1.0, %v925_v15  ;;  %v1318_v39 = vadd.f32 %v1082_v2, %v348_v51  ;;  %v473_v42 = vmul.f32 1.442695, %v416_v16  ;;  %v628_v55 = vld [vmem:[%s1217_s29 + $0x68] sm:$0xff] }
  0x42   : > { %v929_v17 = vpop.eup %928  ;;  %690 = vst [vmem:[%s1244_s6 + $0x58] sm:$0xff] %v658_v27  ;;  %948 = vrcp.f32 %v501_v12  ;;  %v503_v25 = vadd.f32 1.0, %v927_v13  ;;  %v349_v43 = vmul.f32 %v1070_v0, %v310_v28  ;;  %v475_v29 = vmul.f32 1.442695, %v417_v22  ;;  %v629_v13 = vld [vmem:[%s1217_s29 + $0x70] sm:$0xff] }
  0x43   : > { %v931_v30 = vpop.eup %930  ;;  %950 = vrcp.f32 %v502_v21  ;;  %v504_v24 = vadd.f32 1.0, %v929_v17  ;;  %v350_v47 = vmul.f32 %v1070_v0, %v311_v32  ;;  %v418_v50 = vsub.f32 0.0, %v1314_v60  ;;  %v630_v17 = vld [vmem:[%s1217_s29 + $0x78] sm:$0xff] }
  0x44   : > { %v933_v33 = vpop.eup %932  ;;  %952 = vrcp.f32 %v503_v25  ;;  %v505_v38 = vadd.f32 1.0, %v931_v30  ;;  %v1326_v53 = vadd.f32 %v1082_v2, %v349_v43  ;;  %v419_v59 = vsub.f32 0.0, %v1318_v39  ;;  %v631_v30 = vld [vmem:[%s1217_s29 + $0x80] sm:$0xff] }
  0x45   : > { %v935_v34 = vpop.eup %934  ;;  %954 = vrcp.f32 %v504_v24  ;;  %v506_v61 = vadd.f32 1.0, %v933_v33  ;;  %v1331_v10 = vadd.f32 %v1082_v2, %v350_v47  ;;  %v351_v1 = vmul.f32 %v1070_v0, %v312_v48  ;;  %v632_v33 = vld [vmem:[%s1217_s29 + $0x88] sm:$0xff] }
  0x46   : > { %v937_v44 = vpop.eup %936  ;;  %956 = vrcp.f32 %v505_v38  ;;  %v507_v35 = vadd.f32 1.0, %v935_v34  ;;  %v420_v54 = vsub.f32 0.0, %v1326_v53  ;;  %v477_v15 = vmul.f32 1.442695, %v418_v50 }
  0x47   : > { %v939_v49 = vpop.eup %938  ;;  %958 = vrcp.f32 %v506_v61  ;;  %v508_v26 = vadd.f32 1.0, %v937_v44  ;;  %v1338_v27 = vadd.f32 %v1082_v2, %v351_v1  ;;  %v479_v21 = vmul.f32 1.442695, %v419_v59 }
  0x48   : > { %v941_v57 = vpop.eup %940  ;;  %v595_v58 = vmul.f32 %v939_v49, %v1162_v3  ;;  %960 = vrcp.f32 %v507_v35  ;;  %v421_v3 = vsub.f32 0.0, %v1331_v10  ;;  %v481_v25 = vmul.f32 1.442695, %v420_v54 }
  0x49   : > { %v943_v62 = vpop.eup %942  ;;  %962 = vrcp.f32 %v508_v26  ;;  %v509_v63 = vadd.f32 1.0, %v941_v57  ;;  %v422_v22 = vsub.f32 0.0, %v1338_v27 }
  0x4a   : > { %v945_v52 = vpop.eup %944  ;;  %v659_v11 = vadd.f32 %v627_v45, %v595_v58  ;;  %v510_v6 = vadd.f32 1.0, %v943_v62  ;;  %964 = vpow2.f32 %v473_v42  ;;  %v637_v62 = vld [vmem:[%s1217_s29 + $0xb0] sm:$0xff] }
  0x4b   : > { %v947_v7 = vpop.eup %946  ;;  %966 = vrcp.f32 %v509_v63  ;;  %v511_v9 = vadd.f32 1.0, %v945_v52  ;;  %v485_v38 = vmul.f32 1.442695, %v422_v22  ;;  %v638_v52 = vld [vmem:[%s1217_s29 + $0xb8] sm:$0xff] }
  0x4c   : > { %v949_v12 = vpop.eup %948  ;;  %691 = vst [vmem:[%s1244_s6 + $0x60] sm:$0xff] %v659_v11  ;;  %v596_v0 = vmul.f32 %v947_v7, %v1165_v4  ;;  %968 = vrcp.f32 %v510_v6  ;;  %v483_v4 = vmul.f32 1.442695, %v421_v3  ;;  %v639_v3 = vld [vmem:[%s1217_s29 + $0xc0] sm:$0xff] }
  0x4d   : > { %v951_v16 = vpop.eup %950  ;;  %v597_v41 = vmul.f32 %v949_v12, %v1174_v18  ;;  %970 = vrcp.f32 %v511_v9 }
  0x4e   : > { %v953_v2 = vpop.eup %952  ;;  %v660_v51 = vadd.f32 %v628_v55, %v596_v0  ;;  %v598_v28 = vmul.f32 %v951_v16, %v1182_v31  ;;  %972 = vpow2.f32 %v475_v29  ;;  %v633_v31 = vld [vmem:[%s1217_s29 + $0x90] sm:$0xff] }
  0x4f   : > { %v955_v24 = vpop.eup %954  ;;  %v661_v32 = vadd.f32 %v629_v13, %v597_v41  ;;  %v599_v18 = vmul.f32 %v953_v2, %v1185_v36  ;;  %974 = vpow2.f32 %v477_v15  ;;  %v634_v36 = vld [vmem:[%s1217_s29 + $0x98] sm:$0xff]  ;;  %v640_v2 = vld [vmem:[%s1217_s29 + $0xc8] sm:$0xff] }
  0x50   : > { %v957_v34 = vpop.eup %956  ;;  %692 = vst [vmem:[%s1244_s6 + $0x68] sm:$0xff] %v660_v51  ;;  %v662_v61 = vadd.f32 %v630_v17, %v598_v28  ;;  %v600_v42 = vmul.f32 %v955_v24, %v1188_v37  ;;  %976 = vpow2.f32 %v479_v21  ;;  %v635_v37 = vld [vmem:[%s1217_s29 + $0xa0] sm:$0xff] }
  0x51   : > { %v959_v43 = vpop.eup %958  ;;  %693 = vst [vmem:[%s1244_s6 + $0x70] sm:$0xff] %v661_v32  ;;  %v663_v44 = vadd.f32 %v631_v30, %v599_v18  ;;  %v601_v35 = vmul.f32 %v957_v34, %v1208_v5  ;;  %978 = vpow2.f32 %v481_v25  ;;  %v636_v5 = vld [vmem:[%s1217_s29 + $0xa8] sm:$0xff]  ;;  %v642_v18 = vld [vmem:[%s1217_s29 + $0xd8] sm:$0xff]  ;;  %v643_v34 = vld [vmem:[%s1217_s29 + $0xe0] sm:$0xff] }
  0x52   : > { %v961_v29 = vpop.eup %960  ;;  %694 = vst [vmem:[%s1244_s6 + $0x78] sm:$0xff] %v662_v61  ;;  %v664_v47 = vadd.f32 %v632_v33, %v600_v42  ;;  %v602_v48 = vmul.f32 %v959_v43, %v1221_v14  ;;  %980 = vpow2.f32 %v483_v4  ;;  %v641_v4 = vld [vmem:[%s1217_s29 + $0xd0] sm:$0xff] }
  0x53   : > { %v963_v49 = vpop.eup %962  ;;  %695 = vst [vmem:[%s1244_s6 + $0x80] sm:$0xff] %v663_v44  ;;  %v665_v45 = vadd.f32 %v633_v31, %v601_v35  ;;  %v603_v26 = vmul.f32 %v961_v29, %v1225_v20  ;;  %982 = vpow2.f32 %v485_v38  ;;  %v644_v31 = vld [vmem:[%s1217_s29 + $0xe8] sm:$0xff]  ;;  %v645_v35 = vld [vmem:[%s1217_s29 + $0xf0] sm:$0xff] }
  0x54   : > { %v965_v50 = vpop.eup %964  ;;  %696 = vst [vmem:[%s1244_s6 + $0x88] sm:$0xff] %v664_v47  ;;  %v666_v57 = vadd.f32 %v634_v36, %v602_v48  ;;  %v604_v58 = vmul.f32 %v963_v49, %v1228_v23  ;;  %v646_v47 = vld [vmem:[%s1217_s29 + $0xf8] sm:$0xff] }
  0x55   : > { %v967_v14 = vpop.eup %966  ;;  %697 = vst [vmem:[%s1244_s6 + $0x90] sm:$0xff] %v665_v45  ;;  %v667_v59 = vadd.f32 %v635_v37, %v603_v26  ;;  %v512_v63 = vadd.f32 1.0, %v965_v50 }
  0x56   : > { %v969_v54 = vpop.eup %968  ;;  %698 = vst [vmem:[%s1244_s6 + $0x98] sm:$0xff] %v666_v57  ;;  %v668_v1 = vadd.f32 %v636_v5, %v604_v58  ;;  %v605_v20 = vmul.f32 %v967_v14, %v1237_v46 }
  0x57   : > { %v971_v11 = vpop.eup %970  ;;  %699 = vst [vmem:[%s1244_s6 + $0xa0] sm:$0xff] %v667_v59  ;;  %v606_v6 = vmul.f32 %v969_v54, %v1266_v19  ;;  %984 = vrcp.f32 %v512_v63 }
  0x58   : > { %v973_v23 = vpop.eup %972  ;;  %700 = vst [vmem:[%s1244_s6 + $0xa8] sm:$0xff] %v668_v1  ;;  %v669_v7 = vadd.f32 %v637_v62, %v605_v20  ;;  %v607_v55 = vmul.f32 %v971_v11, %v1280_v40 }
  0x59   : > { %v975_v9 = vpop.eup %974  ;;  %v670_v15 = vadd.f32 %v638_v52, %v606_v6  ;;  %v513_v12 = vadd.f32 1.0, %v973_v23 }
  0x5a   : > { %v977_v0 = vpop.eup %976  ;;  %701 = vst [vmem:[%s1244_s6 + $0xb0] sm:$0xff] %v669_v7  ;;  %v671_v46 = vadd.f32 %v639_v3, %v607_v55  ;;  %v514_v13 = vadd.f32 1.0, %v975_v9 }
  0x5b   : > { %v979_v21 = vpop.eup %978  ;;  %702 = vst [vmem:[%s1244_s6 + $0xb8] sm:$0xff] %v670_v15  ;;  %986 = vrcp.f32 %v513_v12  ;;  %v515_v19 = vadd.f32 1.0, %v977_v0 }
  0x5c   : > { %v981_v16 = vpop.eup %980  ;;  %703 = vst [vmem:[%s1244_s6 + $0xc0] sm:$0xff] %v671_v46  ;;  %988 = vrcp.f32 %v514_v13  ;;  %v516_v41 = vadd.f32 1.0, %v979_v21 }
  0x5d   : > { %v983_v17 = vpop.eup %982  ;;  %990 = vrcp.f32 %v515_v19  ;;  %v517_v40 = vadd.f32 1.0, %v981_v16 }
  0x5e   : > { %992 = vrcp.f32 %v516_v41  ;;  %v518_v25 = vadd.f32 1.0, %v983_v17 }
  0x5f   : > { %994 = vrcp.f32 %v517_v40 }
  0x60   : > { %996 = vrcp.f32 %v518_v25 }
  0x61   : > { %v985_v22 = vpop.eup %984 }
  0x62   : > { %v608_v51 = vmul.f32 %v985_v22, %v1299_v8 }
  0x64   : > { %v672_v28 = vadd.f32 %v640_v2, %v608_v51 }
  0x65   : > { %v987_v30 = vpop.eup %986 }
  0x66   : > { %v989_v24 = vpop.eup %988  ;;  %704 = vst [vmem:[%s1244_s6 + $0xc8] sm:$0xff] %v672_v28  ;;  %v609_v32 = vmul.f32 %v987_v30, %v1304_v56 }
  0x67   : > { %v991_v33 = vpop.eup %990  ;;  %v610_v38 = vmul.f32 %v989_v24, %v1314_v60 }
  0x68   : > { %v993_v61 = vpop.eup %992  ;;  %v673_v42 = vadd.f32 %v641_v4, %v609_v32  ;;  %v611_v8 = vmul.f32 %v991_v33, %v1318_v39 }
  0x69   : > { %v995_v43 = vpop.eup %994  ;;  %v674_v44 = vadd.f32 %v642_v18, %v610_v38  ;;  %v612_v56 = vmul.f32 %v993_v61, %v1326_v53 }
  0x6a   : > { %v997_v36 = vpop.eup %996  ;;  %705 = vst [vmem:[%s1244_s6 + $0xd0] sm:$0xff] %v673_v42  ;;  %v675_v29 = vadd.f32 %v643_v34, %v611_v8  ;;  %v613_v60 = vmul.f32 %v995_v43, %v1331_v10 }
  0x6b   : > { %706 = vst [vmem:[%s1244_s6 + $0xd8] sm:$0xff] %v674_v44  ;;  %v676_v48 = vadd.f32 %v644_v31, %v612_v56  ;;  %v614_v37 = vmul.f32 %v997_v36, %v1338_v27 }
  0x6c   : > { %707 = vst [vmem:[%s1244_s6 + $0xe0] sm:$0xff] %v675_v29  ;;  %v677_v39 = vadd.f32 %v645_v35, %v613_v60 }
  0x6d   : > { %708 = vst [vmem:[%s1244_s6 + $0xe8] sm:$0xff] %v676_v48  ;;  %v678_v49 = vadd.f32 %v646_v47, %v614_v37 }
  0x6e   : > { %709 = vst [vmem:[%s1244_s6 + $0xf0] sm:$0xff] %v677_v39 }
  0x6f   : > { %710 = vst [vmem:[%s1244_s6 + $0xf8] sm:$0xff] %v678_v49 }
  0x70 PF: > { %s14_s17 = sadd.s32 1, %s1020_s17   ;;  %s1412_s15 = smov %s1016_s16 }
  0x71   : > { %p11_p5 = scmp.ge.s32.totalorder %s14_s17, 4   ;;  %s1413_s16 = smov %s1415_s18 }
  0x73   :  { %13 = sbr.rel (!%p11_p5) target bundleno = 2 (0x2), region = 69 }

// kernel: bottleneck_forward.5
= control target key start
LH: loop header
LB: loop body
LE: loop exit
PB: predicated region body
PF: predicated region fallthrough
CT: control target
= control target key end

     0   :  { %s888_s12 = smov 0   ;;  %s890_s13 = smov 0   ;;  %s1204_s0 = inlined_call_operand.vmem [shape: f32[2,16,16,128], index: 0, kind: input, shape index: {}]   ;;  %s1205_s1 = inlined_call_operand.vmem [shape: f32[1,128], index: 1, kind: input, shape index: {}]   ;;  %s1206_s2 = inlined_call_operand.vmem [shape: f32[1,128], index: 2, kind: input, shape index: {}]   ;;  %s1207_s3 = inlined_call_operand.vmem [shape: f32[2,16,16,128], index: 3, kind: output, shape index: {}]  }
   0x1   :  { %s892_s14 = smov 0  }
   0x2 LB: > { %s25_s15 = sadd.s32 1, %s862_s13  ;;  %p681_p0 = scmp.ge.s32.totalorder %s866_s14, 1  ;;  %s866_s14 = sphi %s892_s14, %s13_s14   ;;  %s862_s13 = sphi %s890_s13, %s1209_s13   ;;  %s858_s12 = sphi %s888_s12, %s1208_s12  }
   0x3   : > { %p27_p1 = scmp.ge.s32.totalorder %s25_s15, 2  ;;  %p159_p2 = scmp.lt.s32.totalorder %s866_s14, 3 }
   0x5   : > { %s1211_s15 = smov (%p27_p1, %s25_s15), 0  ;;  %p160_p3 = pnand %p681_p0, %p159_p2 }
   0x6   : > { %p194_p4 = scmp.lt.s32.totalorder (!%p160_p3), %s858_s12, 1  ;;  %v912_v0 = vld [vmem:[%s1205_s1] ss:$0 sm:$0xff] (!%p160_p3) }
   0x7   : > { %163 = sbr.rel (%p160_p3) target bundleno = 110 (0x6e), region = 32  ;;  %v924_v1 = vld [vmem:[%s1206_s2] ss:$0 sm:$0xff] (!%p160_p3) }
   0xe   : > { %s1213_s12 = smov (!%p194_p4, %s858_s12), 1 }
   0xf   : > { %s690_s16 = sshll.u32 %s1213_s12, 8 }
  0x10   : > { %s919_s21 = scalar_lea.vmem %s1204_s0, %s690_s16  ;;  %s1069_s26 = scalar_lea.vmem %s1207_s3, %s690_s16 }
  0x11   : > { %v215_v2 = vld [vmem:[%s919_s21] sm:$0xff]  ;;  %v216_v3 = vld [vmem:[%s919_s21 + $0x8] sm:$0xff]  ;;  %v217_v4 = vld [vmem:[%s919_s21 + $0x10] sm:$0xff] }
  0x12   : > { %v254_v5 = vmul.f32 %v912_v0, %v215_v2  ;;  %v255_v6 = vmul.f32 %v912_v0, %v216_v3  ;;  %v256_v7 = vmul.f32 %v912_v0, %v217_v4  ;;  %v218_v8 = vld [vmem:[%s919_s21 + $0x18] sm:$0xff]  ;;  %v219_v9 = vld [vmem:[%s919_s21 + $0x20] sm:$0xff]  ;;  %v220_v10 = vld [vmem:[%s919_s21 + $0x28] sm:$0xff] }
  0x13   : > { %v257_v11 = vmul.f32 %v912_v0, %v218_v8  ;;  %v258_v12 = vmul.f32 %v912_v0, %v219_v9  ;;  %v259_v13 = vmul.f32 %v912_v0, %v220_v10  ;;  %v221_v14 = vld [vmem:[%s919_s21 + $0x30] sm:$0xff]  ;;  %v222_v15 = vld [vmem:[%s919_s21 + $0x38] sm:$0xff]  ;;  %v223_v24 = vld [vmem:[%s919_s21 + $0x40] sm:$0xff] }
  0x14   : > { %v941_v16 = vadd.f32 %v924_v1, %v254_v5  ;;  %v944_v17 = vadd.f32 %v924_v1, %v255_v6  ;;  %v947_v18 = vadd.f32 %v924_v1, %v256_v7  ;;  %v260_v19 = vmul.f32 %v912_v0, %v221_v14  ;;  %v224_v29 = vld [vmem:[%s919_s21 + $0x48] sm:$0xff]  ;;  %v225_v34 = vld [vmem:[%s919_s21 + $0x50] sm:$0xff]  ;;  %v226_v35 = vld [vmem:[%s919_s21 + $0x58] sm:$0xff] }
  0x15   : > { %v951_v20 = vadd.f32 %v924_v1, %v257_v11  ;;  %v954_v21 = vadd.f32 %v924_v1, %v258_v12  ;;  %v957_v22 = vadd.f32 %v924_v1, %v259_v13  ;;  %v261_v23 = vmul.f32 %v912_v0, %v222_v15  ;;  %v227_v50 = vld [vmem:[%s919_s21 + $0x60] sm:$0xff]  ;;  %v228_v51 = vld [vmem:[%s919_s21 + $0x68] sm:$0xff]  ;;  %v229_v58 = vld [vmem:[%s919_s21 + $0x70] sm:$0xff] }
  0x16   : > { %v325_v25 = vsub.f32 0.0, %v941_v16  ;;  %v326_v26 = vsub.f32 0.0, %v944_v17  ;;  %v327_v27 = vsub.f32 0.0, %v947_v18  ;;  %v965_v28 = vadd.f32 %v924_v1, %v260_v19  ;;  %v230_v62 = vld [vmem:[%s919_s21 + $0x78] sm:$0xff]  ;;  %v231_v7 = vld [vmem:[%s919_s21 + $0x80] sm:$0xff]  ;;  %v232_v8 = vld [vmem:[%s919_s21 + $0x88] sm:$0xff] }
  0x17   : > { %v328_v30 = vsub.f32 0.0, %v951_v20  ;;  %v329_v31 = vsub.f32 0.0, %v954_v21  ;;  %v330_v32 = vsub.f32 0.0, %v957_v22  ;;  %v972_v33 = vadd.f32 %v924_v1, %v261_v23 }
  0x18   : > { %v357_v36 = vmul.f32 1.442695, %v325_v25  ;;  %v359_v37 = vmul.f32 1.442695, %v326_v26  ;;  %v361_v38 = vmul.f32 1.442695, %v327_v27  ;;  %v262_v39 = vmul.f32 %v912_v0, %v223_v24 }
  0x19   : > { %v363_v40 = vmul.f32 1.442695, %v328_v30  ;;  %v365_v41 = vmul.f32 1.442695, %v329_v31  ;;  %v367_v42 = vmul.f32 1.442695, %v330_v32  ;;  %v263_v43 = vmul.f32 %v912_v0, %v224_v29 }
  0x1a   : > { %716 = vpow2.f32 %v357_v36  ;;  %v331_v44 = vsub.f32 0.0, %v965_v28  ;;  %v332_v45 = vsub.f32 0.0, %v972_v33  ;;  %v981_v46 = vadd.f32 %v924_v1, %v262_v39  ;;  %v233_v31 = vld [vmem:[%s919_s21 + $0x90] sm:$0xff]  ;;  %v234_v36 = vld [vmem:[%s919_s21 + $0x98] sm:$0xff] }
  0x1b   : > { %718 = vpow2.f32 %v359_v37  ;;  %v984_v47 = vadd.f32 %v924_v1, %v263_v43  ;;  %v264_v48 = vmul.f32 %v912_v0, %v225_v34  ;;  %v265_v49 = vmul.f32 %v912_v0, %v226_v35 }
  0x1c   : > { %720 = vpow2.f32 %v361_v38  ;;  %v369_v52 = vmul.f32 1.442695, %v331_v44  ;;  %v371_v53 = vmul.f32 1.442695, %v332_v45  ;;  %v333_v54 = vsub.f32 0.0, %v981_v46  ;;  %v235_v45 = vld [vmem:[%s919_s21 + $0xa0] sm:$0xff] }
  0x1d   : > { %722 = vpow2.f32 %v363_v40  ;;  %v334_v55 = vsub.f32 0.0, %v984_v47  ;;  %v993_v56 = vadd.f32 %v924_v1, %v264_v48  ;;  %v996_v57 = vadd.f32 %v924_v1, %v265_v49 }
  0x1e   : > { %724 = vpow2.f32 %v365_v41  ;;  %v373_v59 = vmul.f32 1.442695, %v333_v54  ;;  %v266_v60 = vmul.f32 %v912_v0, %v227_v50  ;;  %v267_v61 = vmul.f32 %v912_v0, %v228_v51 }
  0x1f   : > { %726 = vpow2.f32 %v367_v42  ;;  %v375_v63 = vmul.f32 1.442695, %v334_v55  ;;  %v335_v2 = vsub.f32 0.0, %v993_v56  ;;  %v336_v3 = vsub.f32 0.0, %v996_v57 }
  0x20   : > { %728 = vpow2.f32 %v369_v52  ;;  %v1005_v4 = vadd.f32 %v924_v1, %v266_v60  ;;  %v1008_v5 = vadd.f32 %v924_v1, %v267_v61  ;;  %v268_v6 = vmul.f32 %v912_v0, %v229_v58  ;;  %v236_v52 = vld [vmem:[%s919_s21 + $0xa8] sm:$0xff] }
  0x21   : > { %730 = vpow2.f32 %v371_v53  ;;  %v377_v9 = vmul.f32 1.442695, %v335_v2  ;;  %v379_v10 = vmul.f32 1.442695, %v336_v3  ;;  %v269_v11 = vmul.f32 %v912_v0, %v230_v62 }
  0x22   : > { %732 = vpow2.f32 %v373_v59  ;;  %v337_v12 = vsub.f32 0.0, %v1005_v4  ;;  %v338_v13 = vsub.f32 0.0, %v1008_v5  ;;  %v1017_v14 = vadd.f32 %v924_v1, %v268_v6 }
  0x23   : > { %734 = vpow2.f32 %v375_v63  ;;  %v1020_v15 = vadd.f32 %v924_v1, %v269_v11  ;;  %v270_v19 = vmul.f32 %v912_v0, %v231_v7  ;;  %v271_v23 = vmul.f32 %v912_v0, %v232_v8  ;;  %v237_v11 = vld [vmem:[%s919_s21 + $0xb0] sm:$0xff] }
  0x24   : > { %v717_v24 = vpop.eup %716  ;;  %736 = vpow2.f32 %v377_v9  ;;  %v381_v25 = vmul.f32 1.442695, %v337_v12  ;;  %v339_v26 = vsub.f32 0.0, %v1017_v14  ;;  %v1033_v39 = vmul.f32 1.442695, %v338_v13 }
  0x25   : > { %v719_v27 = vpop.eup %718  ;;  %v421_v29 = vadd.f32 1.0, %v717_v24  ;;  %738 = vpow2.f32 %v379_v10  ;;  %v1026_v30 = vadd.f32 %v924_v1, %v270_v19  ;;  %v1030_v35 = vadd.f32 %v924_v1, %v271_v23  ;;  %v238_v24 = vld [vmem:[%s919_s21 + $0xb8] sm:$0xff] }
  0x26   : > { %v721_v32 = vpop.eup %720  ;;  %v422_v34 = vadd.f32 1.0, %v719_v27  ;;  %740 = vpow2.f32 %v381_v25  ;;  %v340_v40 = vsub.f32 0.0, %v1020_v15  ;;  %v1036_v43 = vmul.f32 1.442695, %v339_v26 }
  0x27   : > { %v723_v37 = vpop.eup %722  ;;  %742 = vrcp.f32 %v421_v29  ;;  %v423_v38 = vadd.f32 1.0, %v721_v32  ;;  %v272_v44 = vmul.f32 %v912_v0, %v233_v31  ;;  %v341_v50 = vsub.f32 0.0, %v1026_v30 }
  0x28   : > { %v725_v41 = vpop.eup %724  ;;  %744 = vrcp.f32 %v422_v34  ;;  %v424_v42 = vadd.f32 1.0, %v723_v37  ;;  %v273_v51 = vmul.f32 %v912_v0, %v234_v36  ;;  %v342_v55 = vsub.f32 0.0, %v1030_v35  ;;  %v239_v37 = vld [vmem:[%s919_s21 + $0xc0] sm:$0xff] }
  0x29   : > { %v727_v48 = vpop.eup %726  ;;  %746 = vrcp.f32 %v423_v38  ;;  %v425_v49 = vadd.f32 1.0, %v725_v41  ;;  %v1045_v58 = vadd.f32 %v924_v1, %v272_v44  ;;  %v274_v62 = vmul.f32 %v912_v0, %v235_v45  ;;  %v240_v44 = vld [vmem:[%s919_s21 + $0xc8] sm:$0xff] }
  0x2a   : > { %v729_v53 = vpop.eup %728  ;;  %748 = vrcp.f32 %v424_v42  ;;  %v426_v54 = vadd.f32 1.0, %v727_v48  ;;  %v1048_v61 = vadd.f32 %v924_v1, %v273_v51  ;;  %v275_v6 = vmul.f32 %v912_v0, %v236_v52 }
  0x2b   : > { %v731_v59 = vpop.eup %730  ;;  %750 = vrcp.f32 %v425_v49  ;;  %v427_v60 = vadd.f32 1.0, %v729_v53  ;;  %v343_v3 = vsub.f32 0.0, %v1045_v58  ;;  %v387_v9 = vmul.f32 1.442695, %v340_v40 }
  0x2c   : > { %v733_v63 = vpop.eup %732  ;;  %752 = vrcp.f32 %v426_v54  ;;  %v428_v2 = vadd.f32 1.0, %v731_v59  ;;  %v344_v10 = vsub.f32 0.0, %v1048_v61  ;;  %v389_v19 = vmul.f32 1.442695, %v341_v50 }
  0x2d   : > { %v735_v7 = vpop.eup %734  ;;  %754 = vrcp.f32 %v427_v60  ;;  %v429_v8 = vadd.f32 1.0, %v733_v63  ;;  %v1056_v23 = vadd.f32 %v924_v1, %v274_v62  ;;  %v391_v27 = vmul.f32 1.442695, %v342_v55 }
  0x2e   : > { %v737_v12 = vpop.eup %736  ;;  %756 = vrcp.f32 %v428_v2  ;;  %v430_v13 = vadd.f32 1.0, %v735_v7  ;;  %v393_v29 = vmul.f32 1.442695, %v343_v3  ;;  %v1060_v34 = vadd.f32 %v924_v1, %v275_v6 }
  0x2f   : > { %v739_v25 = vpop.eup %738  ;;  %758 = vrcp.f32 %v429_v8  ;;  %v431_v26 = vadd.f32 1.0, %v737_v12  ;;  %v276_v36 = vmul.f32 %v912_v0, %v237_v11  ;;  %v395_v41 = vmul.f32 1.442695, %v344_v10 }
  0x30   : > { %v741_v31 = vpop.eup %740  ;;  %760 = vrcp.f32 %v430_v13  ;;  %v432_v32 = vadd.f32 1.0, %v739_v25  ;;  %v277_v42 = vmul.f32 %v912_v0, %v238_v24  ;;  %v345_v49 = vsub.f32 0.0, %v1056_v23 }
  0x31   : > { %v743_v38 = vpop.eup %742  ;;  %762 = vrcp.f32 %v431_v26  ;;  %v433_v40 = vadd.f32 1.0, %v741_v31  ;;  %v1076_v50 = vadd.f32 %v924_v1, %v276_v36  ;;  %v278_v54 = vmul.f32 %v912_v0, %v239_v37  ;;  %v241_v31 = vld [vmem:[%s919_s21 + $0xd0] sm:$0xff] }
  0x32   : > { %v745_v45 = vpop.eup %744  ;;  %v517_v48 = vmul.f32 %v743_v38, %v941_v16  ;;  %764 = vrcp.f32 %v432_v32  ;;  %v1080_v53 = vadd.f32 %v924_v1, %v277_v42  ;;  %v346_v59 = vsub.f32 0.0, %v1060_v34  ;;  %v242_v32 = vld [vmem:[%s919_s21 + $0xd8] sm:$0xff] }
  0x33   : > { %v747_v51 = vpop.eup %746  ;;  %v518_v52 = vmul.f32 %v745_v45, %v944_v17  ;;  %766 = vrcp.f32 %v433_v40  ;;  %v279_v60 = vmul.f32 %v912_v0, %v240_v44  ;;  %v347_v63 = vsub.f32 0.0, %v1076_v50 }
  0x34   : > { %v749_v55 = vpop.eup %748  ;;  %549 = vst [vmem:[%s1069_s26] sm:$0xff] %v517_v48  ;;  %v519_v16 = vmul.f32 %v747_v51, %v947_v18  ;;  %768 = vpow2.f32 %v1033_v39  ;;  %v1093_v2 = vadd.f32 %v924_v1, %v278_v54  ;;  %v348_v3 = vsub.f32 0.0, %v1080_v53  ;;  %v245_v48 = vld [vmem:[%s919_s21 + $0xf0] sm:$0xff] }
  0x35   : > { %v751_v62 = vpop.eup %750  ;;  %550 = vst [vmem:[%s1069_s26 + $0x8] sm:$0xff] %v518_v52  ;;  %v520_v17 = vmul.f32 %v749_v55, %v951_v20  ;;  %770 = vpow2.f32 %v1036_v43  ;;  %v1099_v6 = vadd.f32 %v924_v1, %v279_v60  ;;  %v397_v7 = vmul.f32 1.442695, %v345_v49  ;;  %v246_v52 = vld [vmem:[%s919_s21 + $0xf8] sm:$0xff] }
  0x36   : > { %v753_v18 = vpop.eup %752  ;;  %551 = vst [vmem:[%s1069_s26 + $0x10] sm:$0xff] %v519_v16  ;;  %v521_v39 = vmul.f32 %v751_v62, %v954_v21  ;;  %772 = vpow2.f32 %v387_v9  ;;  %v349_v8 = vsub.f32 0.0, %v1093_v2  ;;  %v399_v9 = vmul.f32 1.442695, %v346_v59 }
  0x37   : > { %v755_v20 = vpop.eup %754  ;;  %552 = vst [vmem:[%s1069_s26 + $0x18] sm:$0xff] %v520_v17  ;;  %v522_v43 = vmul.f32 %v753_v18, %v957_v22  ;;  %774 = vpow2.f32 %v389_v19  ;;  %v350_v11 = vsub.f32 0.0, %v1099_v6  ;;  %v401_v13 = vmul.f32 1.442695, %v347_v63 }
  0x38   : > { %v757_v10 = vpop.eup %756  ;;  %553 = vst [vmem:[%s1069_s26 + $0x20] sm:$0xff] %v521_v39  ;;  %v523_v21 = vmul.f32 %v755_v20, %v965_v28  ;;  %776 = vpow2.f32 %v391_v27  ;;  %v403_v28 = vmul.f32 1.442695, %v348_v3  ;;  %v405_v27 = vmul.f32 1.442695, %v349_v8 }
  0x39   : > { %v759_v12 = vpop.eup %758  ;;  %554 = vst [vmem:[%s1069_s26 + $0x28] sm:$0xff] %v522_v43  ;;  %v524_v22 = vmul.f32 %v757_v10, %v972_v33  ;;  %778 = vpow2.f32 %v393_v29  ;;  %v281_v45 = vmul.f32 %v912_v0, %v242_v32  ;;  %v284_v62 = vmul.f32 %v912_v0, %v245_v48 }
  0x3a   : > { %v761_v19 = vpop.eup %760  ;;  %555 = vst [vmem:[%s1069_s26 + $0x30] sm:$0xff] %v523_v21  ;;  %v525_v24 = vmul.f32 %v759_v12, %v981_v46  ;;  %780 = vpow2.f32 %v395_v41  ;;  %v407_v46 = vmul.f32 1.442695, %v350_v11  ;;  %v244_v41 = vld [vmem:[%s919_s21 + $0xe8] sm:$0xff]  ;;  %v285_v39 = vmul.f32 %v912_v0, %v246_v52 }
  0x3b   : > { %v763_v25 = vpop.eup %762  ;;  %556 = vst [vmem:[%s1069_s26 + $0x38] sm:$0xff] %v524_v22  ;;  %v526_v26 = vmul.f32 %v761_v19, %v984_v47  ;;  %782 = vpow2.f32 %v397_v7  ;;  %v243_v47 = vld [vmem:[%s919_s21 + $0xe0] sm:$0xff]  ;;  %v283_v55 = vmul.f32 %v912_v0, %v244_v41  ;;  %v1136_v18 = vadd.f32 %v924_v1, %v281_v45 }
  0x3c   : > { %v765_v33 = vpop.eup %764  ;;  %557 = vst [vmem:[%s1069_s26 + $0x40] sm:$0xff] %v525_v24  ;;  %v527_v29 = vmul.f32 %v763_v25, %v993_v56  ;;  %784 = vpow2.f32 %v399_v9  ;;  %v280_v56 = vmul.f32 %v912_v0, %v241_v31  ;;  %v282_v51 = vmul.f32 %v912_v0, %v243_v47 }
  0x3d   : > { %v767_v36 = vpop.eup %766  ;;  %558 = vst [vmem:[%s1069_s26 + $0x48] sm:$0xff] %v526_v26  ;;  %v528_v37 = vmul.f32 %v765_v33, %v996_v57  ;;  %786 = vpow2.f32 %v401_v13  ;;  %v1143_v10 = vadd.f32 %v924_v1, %v283_v55  ;;  %v1147_v12 = vadd.f32 %v924_v1, %v284_v62 }
  0x3e   : > { %v769_v38 = vpop.eup %768  ;;  %559 = vst [vmem:[%s1069_s26 + $0x50] sm:$0xff] %v527_v29  ;;  %v529_v40 = vmul.f32 %v767_v36, %v1005_v4  ;;  %788 = vpow2.f32 %v403_v28  ;;  %v1132_v60 = vadd.f32 %v924_v1, %v280_v56  ;;  %v1140_v43 = vadd.f32 %v924_v1, %v282_v51 }
  0x3f   : > { %v771_v42 = vpop.eup %770  ;;  %560 = vst [vmem:[%s1069_s26 + $0x58] sm:$0xff] %v528_v37  ;;  %v434_v44 = vadd.f32 1.0, %v769_v38  ;;  %790 = vpow2.f32 %v405_v27  ;;  %v352_v13 = vsub.f32 0.0, %v1136_v18  ;;  %v1151_v19 = vadd.f32 %v924_v1, %v285_v39 }
  0x40   : > { %v773_v57 = vpop.eup %772  ;;  %561 = vst [vmem:[%s1069_s26 + $0x60] sm:$0xff] %v529_v40  ;;  %v435_v49 = vadd.f32 1.0, %v771_v42  ;;  %792 = vpow2.f32 %v407_v46  ;;  %v351_v11 = vsub.f32 0.0, %v1132_v60  ;;  %v353_v25 = vsub.f32 0.0, %v1140_v43 }
  0x41   : > { %v775_v54 = vpop.eup %774  ;;  %794 = vrcp.f32 %v434_v44  ;;  %v436_v4 = vadd.f32 1.0, %v773_v57  ;;  %v354_v31 = vsub.f32 0.0, %v1143_v10  ;;  %v355_v32 = vsub.f32 0.0, %v1147_v12 }
  0x42   : > { %v777_v16 = vpop.eup %776  ;;  %796 = vrcp.f32 %v435_v49  ;;  %v437_v59 = vadd.f32 1.0, %v775_v54  ;;  %v409_v46 = vmul.f32 1.442695, %v351_v11  ;;  %v411_v37 = vmul.f32 1.442695, %v352_v13 }
  0x43   : > { %v779_v17 = vpop.eup %778  ;;  %798 = vrcp.f32 %v436_v4  ;;  %v438_v63 = vadd.f32 1.0, %v777_v16  ;;  %v356_v47 = vsub.f32 0.0, %v1151_v19  ;;  %v413_v56 = vmul.f32 1.442695, %v353_v25 }
  0x44   : > { %v781_v3 = vpop.eup %780  ;;  %800 = vrcp.f32 %v437_v59  ;;  %v439_v20 = vadd.f32 1.0, %v779_v17  ;;  %v415_v44 = vmul.f32 1.442695, %v354_v31  ;;  %v417_v57 = vmul.f32 1.442695, %v355_v32 }
  0x45   : > { %v783_v7 = vpop.eup %782  ;;  %802 = vrcp.f32 %v438_v63  ;;  %v440_v8 = vadd.f32 1.0, %v781_v3  ;;  %v419_v51 = vmul.f32 1.442695, %v356_v47 }
  0x46   : > { %v785_v21 = vpop.eup %784  ;;  %804 = vrcp.f32 %v439_v20  ;;  %v441_v9 = vadd.f32 1.0, %v783_v7 }
  0x47   : > { %v787_v0 = vpop.eup %786  ;;  %806 = vrcp.f32 %v440_v8  ;;  %v442_v22 = vadd.f32 1.0, %v785_v21 }
  0x48   : > { %v789_v24 = vpop.eup %788  ;;  %808 = vrcp.f32 %v441_v9  ;;  %v443_v28 = vadd.f32 1.0, %v787_v0 }
  0x49   : > { %v791_v26 = vpop.eup %790  ;;  %810 = vrcp.f32 %v442_v22  ;;  %v444_v27 = vadd.f32 1.0, %v789_v24 }
  0x4a   : > { %v793_v33 = vpop.eup %792  ;;  %812 = vrcp.f32 %v443_v28  ;;  %v445_v29 = vadd.f32 1.0, %v791_v26 }
  0x4b   : > { %v795_v36 = vpop.eup %794  ;;  %814 = vrcp.f32 %v444_v27  ;;  %v446_v1 = vadd.f32 1.0, %v793_v33 }
  0x4c   : > { %v797_v38 = vpop.eup %796  ;;  %v530_v40 = vmul.f32 %v795_v36, %v1008_v5  ;;  %816 = vrcp.f32 %v445_v29 }
  0x4d   : > { %v799_v41 = vpop.eup %798  ;;  %v531_v42 = vmul.f32 %v797_v38, %v1017_v14  ;;  %818 = vrcp.f32 %v446_v1 }
  0x4e   : > { %v801_v45 = vpop.eup %800  ;;  %562 = vst [vmem:[%s1069_s26 + $0x68] sm:$0xff] %v530_v40  ;;  %v532_v48 = vmul.f32 %v799_v41, %v1020_v15  ;;  %820 = vpow2.f32 %v409_v46 }
  0x4f   : > { %v803_v49 = vpop.eup %802  ;;  %563 = vst [vmem:[%s1069_s26 + $0x70] sm:$0xff] %v531_v42  ;;  %v533_v5 = vmul.f32 %v801_v45, %v1026_v30  ;;  %822 = vpow2.f32 %v411_v37 }
  0x50   : > { %v805_v52 = vpop.eup %804  ;;  %564 = vst [vmem:[%s1069_s26 + $0x78] sm:$0xff] %v532_v48  ;;  %v534_v14 = vmul.f32 %v803_v49, %v1030_v35  ;;  %824 = vpow2.f32 %v413_v56 }
  0x51   : > { %v807_v54 = vpop.eup %806  ;;  %565 = vst [vmem:[%s1069_s26 + $0x80] sm:$0xff] %v533_v5  ;;  %v535_v15 = vmul.f32 %v805_v52, %v1045_v58  ;;  %826 = vpow2.f32 %v415_v44 }
  0x52   : > { %v809_v4 = vpop.eup %808  ;;  %566 = vst [vmem:[%s1069_s26 + $0x88] sm:$0xff] %v534_v14  ;;  %v536_v30 = vmul.f32 %v807_v54, %v1048_v61  ;;  %828 = vpow2.f32 %v417_v57 }
  0x53   : > { %v811_v55 = vpop.eup %810  ;;  %567 = vst [vmem:[%s1069_s26 + $0x90] sm:$0xff] %v535_v15  ;;  %v537_v16 = vmul.f32 %v809_v4, %v1056_v23  ;;  %830 = vpow2.f32 %v419_v51 }
  0x54   : > { %v813_v35 = vpop.eup %812  ;;  %568 = vst [vmem:[%s1069_s26 + $0x98] sm:$0xff] %v536_v30  ;;  %v538_v59 = vmul.f32 %v811_v55, %v1060_v34 }
  0x55   : > { %v815_v58 = vpop.eup %814  ;;  %569 = vst [vmem:[%s1069_s26 + $0xa0] sm:$0xff] %v537_v16  ;;  %v539_v62 = vmul.f32 %v813_v35, %v1076_v50 }
  0x56   : > { %v817_v17 = vpop.eup %816  ;;  %570 = vst [vmem:[%s1069_s26 + $0xa8] sm:$0xff] %v538_v59  ;;  %v540_v61 = vmul.f32 %v815_v58, %v1080_v53 }
  0x57   : > { %v819_v63 = vpop.eup %818  ;;  %571 = vst [vmem:[%s1069_s26 + $0xb0] sm:$0xff] %v539_v62  ;;  %v541_v39 = vmul.f32 %v817_v17, %v1093_v2 }
  0x58   : > { %v821_v23 = vpop.eup %820  ;;  %572 = vst [vmem:[%s1069_s26 + $0xb8] sm:$0xff] %v540_v61  ;;  %v542_v3 = vmul.f32 %v819_v63, %v1099_v6 }
  0x59   : > { %v823_v20 = vpop.eup %822  ;;  %573 = vst [vmem:[%s1069_s26 + $0xc0] sm:$0xff] %v541_v39  ;;  %v447_v34 = vadd.f32 1.0, %v821_v23 }
  0x5a   : > { %v825_v7 = vpop.eup %824  ;;  %574 = vst [vmem:[%s1069_s26 + $0xc8] sm:$0xff] %v542_v3  ;;  %v448_v8 = vadd.f32 1.0, %v823_v20 }
  0x5b   : > { %v827_v21 = vpop.eup %826  ;;  %832 = vrcp.f32 %v447_v34  ;;  %v449_v50 = vadd.f32 1.0, %v825_v7 }
  0x5c   : > { %v829_v9 = vpop.eup %828  ;;  %834 = vrcp.f32 %v448_v8  ;;  %v450_v53 = vadd.f32 1.0, %v827_v21 }
  0x5d   : > { %v831_v11 = vpop.eup %830  ;;  %836 = vrcp.f32 %v449_v50  ;;  %v451_v2 = vadd.f32 1.0, %v829_v9 }
  0x5e   : > { %838 = vrcp.f32 %v450_v53  ;;  %v452_v6 = vadd.f32 1.0, %v831_v11 }
  0x5f   : > { %840 = vrcp.f32 %v451_v2 }
  0x60   : > { %842 = vrcp.f32 %v452_v6 }
  0x65   : > { %v833_v0 = vpop.eup %832 }
  0x66   : > { %v835_v22 = vpop.eup %834  ;;  %v543_v13 = vmul.f32 %v833_v0, %v1132_v60 }
  0x67   : > { %v837_v24 = vpop.eup %836  ;;  %v544_v28 = vmul.f32 %v835_v22, %v1136_v18 }
  0x68   : > { %v839_v25 = vpop.eup %838  ;;  %575 = vst [vmem:[%s1069_s26 + $0xd0] sm:$0xff] %v543_v13  ;;  %v545_v26 = vmul.f32 %v837_v24, %v1140_v43 }
  0x69   : > { %v841_v27 = vpop.eup %840  ;;  %576 = vst [vmem:[%s1069_s26 + $0xd8] sm:$0xff] %v544_v28  ;;  %v546_v31 = vmul.f32 %v839_v25, %v1143_v10 }
  0x6a   : > { %v843_v33 = vpop.eup %842  ;;  %577 = vst [vmem:[%s1069_s26 + $0xe0] sm:$0xff] %v545_v26  ;;  %v547_v29 = vmul.f32 %v841_v27, %v1147_v12 }
  0x6b   : > { %578 = vst [vmem:[%s1069_s26 + $0xe8] sm:$0xff] %v546_v31  ;;  %v548_v46 = vmul.f32 %v843_v33, %v1151_v19 }
  0x6c   : > { %579 = vst [vmem:[%s1069_s26 + $0xf0] sm:$0xff] %v547_v29 }
  0x6d   : > { %580 = vst [vmem:[%s1069_s26 + $0xf8] sm:$0xff] %v548_v46 }
  0x6e PF: > { %s13_s14 = sadd.s32 1, %s866_s14   ;;  %s1208_s12 = smov %s862_s13 }
  0x6f   : > { %p10_p5 = scmp.ge.s32.totalorder %s13_s14, 4   ;;  %s1209_s13 = smov %s1211_s15 }
  0x71   :  { %12 = sbr.rel (!%p10_p5) target bundleno = 2 (0x2), region = 62 }

// kernel: bottleneck_forward.4
= control target key start
LH: loop header
LB: loop body
LE: loop exit
PB: predicated region body
PF: predicated region fallthrough
CT: control target
= control target key end

     0   :  { %s3761_s15 = smov 0   ;;  %s3763_s16 = smov 0   ;;  %s5294_s0 = inlined_call_operand.vmem [shape: f32[2,16,16,128], index: 0, kind: input, shape index: {}]   ;;  %s5295_s1 = inlined_call_operand.vmem [shape: f32[1152,128], index: 1, kind: input, shape index: {}]   ;;  %s5296_s2 = inlined_call_operand.vmem [shape: f32[2,16,16,128], index: 2, kind: output, shape index: {0}]   ;;  %s5297_s3 = inlined_call_operand.vmem [shape: f32[2,1,128], index: 3, kind: output, shape index: {1}]   ;;  %s5298_s4 = inlined_call_operand.vmem [shape: f32[2,1,128], index: 4, kind: output, shape index: {2}]  }
   0x1   :  { %s3765_s17 = smov 0  }
   0x2 LB: > { %s27_s18 = sadd.s32 1, %s3728_s16  ;;  %p2930_p0 = scmp.ge.s32.totalorder %s3732_s17, 1  ;;  %s3732_s17 = sphi %s3765_s17, %s15_s17   ;;  %s3728_s16 = sphi %s3763_s16, %s5412_s16   ;;  %s3724_s15 = sphi %s3761_s15, %s5411_s15  }
   0x3   : > { %p29_p1 = scmp.ge.s32.totalorder %s27_s18, 2  ;;  %p181_p2 = scmp.lt.s32.totalorder %s3732_s17, 3 }
   0x5   : > { %s5414_s18 = smov (%p29_p1, %s27_s18), 0  ;;  %p182_p3 = pnand %p2930_p0, %p181_p2 }
   0x7   : > { %185 = sbr.rel (%p182_p3) target bundleno = 648 (0x288), region = 28 }
   0xe   : > { %v3784_v0 = vld [vmem:[%s5295_s1] sm:$0xff]  ;;  %v3789_v1 = vld [vmem:[%s5295_s1 + $0x8] sm:$0xff]  ;;  %v5300_v3 = vmov 0.0|0.0   ;;  %v3808_v6 = vld [vmem:[%s5295_s1 + $0x10] sm:$0xff]  ;;  %v3735_v8 = vmov 0.0   ;;  %p218_p4 = scmp.lt.s32.totalorder %s3724_s15, 1 }
   0xf   : > { %v3794_v2 = vld [vmem:[%s5295_s1 + $0x100] sm:$0xff]  ;;  %3259 = vmatprep.subr.bf16.mxu1 %v5300_v3  ;;  %3307 = vmatprep.subr.bf16.mxu0 %v5300_v3  ;;  %v3260_v4 = vpack.c.bf16 %v3789_v1, %v3784_v0  ;;  %v3803_v5 = vld [vmem:[%s5295_s1 + $0x108] sm:$0xff]  ;;  %v3813_v7 = vld [vmem:[%s5295_s1 + $0x18] sm:$0xff]  ;;  %244 = vst [vmem:[#allocation2] sm:$0xff] %v3735_v8 }
  0x10   : > { %245 = vst [vmem:[#allocation2 + $0x8] sm:$0xff] %v3735_v8  ;;  %246 = vst [vmem:[#allocation2 + $0x10] sm:$0x3] %v3735_v8  ;;  %v3308_v9 = vpack.c.bf16 %v3803_v5, %v3794_v2  ;;  %v1272_v10 = vld [vmem:[%s5295_s1 + $0x110] sm:$0xff]  ;;  %v1273_v11 = vld [vmem:[%s5295_s1 + $0x118] sm:$0xff]  ;;  %v3263_v12 = vpack.c.bf16 %v3813_v7, %v3808_v6  ;;  %s5416_s15 = smov (!%p218_p4, %s3724_s15), 1 }
  0x11   : > { %247 = vst [vmem:[#allocation2 + $0x18] sm:$0xff] %v3735_v8  ;;  %248 = vst [vmem:[#allocation2 + $0x20] sm:$0xff] %v3735_v8  ;;  %3261 = vmatpush1.bf16.msra.mxu1 %v3260_v4  ;;  %v3311_v13 = vpack.c.bf16 %v1273_v11, %v1272_v10  ;;  %v1242_v14 = vld [vmem:[%s5295_s1 + $0x20] sm:$0xff]  ;;  %v1243_v15 = vld [vmem:[%s5295_s1 + $0x28] sm:$0xff]  ;;  %s3129_s11 = sshll.u32 %s5416_s15, 8  ;;  %s4967_s21 = scalar_lea.vmem %s5297_s3, %s5416_s15 }
  0x12   : > { %249 = vst [vmem:[#allocation2 + $0x28] sm:$0x3] %v3735_v8  ;;  %250 = vst [vmem:[#allocation2 + $0x30] sm:$0xff] %v3735_v8  ;;  %3309 = vmatpush1.bf16.msra.mxu0 %v3308_v9  ;;  %3262 = vmatprep.subr.bf16.mxu1 %v5300_v3  ;;  %v1274_v16 = vld [vmem:[%s5295_s1 + $0x120] sm:$0xff]  ;;  %v1275_v17 = vld [vmem:[%s5295_s1 + $0x128] sm:$0xff]  ;;  %v3266_v18 = vpack.c.bf16 %v1243_v15, %v1242_v14  ;;  %s3945_s26 = scalar_lea.vmem %s5294_s0, %s3129_s11  ;;  %s4973_s24 = scalar_lea.vmem %s5298_s4, %s5416_s15 }
  0x13   : > { %251 = vst [vmem:[#allocation2 + $0x38] sm:$0xff] %v3735_v8  ;;  %252 = vst [vmem:[#allocation2 + $0x40] sm:$0x3] %v3735_v8  ;;  %3310 = vmatprep.subr.bf16.mxu0 %v5300_v3  ;;  %v3314_v19 = vpack.c.bf16 %v1275_v17, %v1274_v16  ;;  %v1244_v20 = vld [vmem:[%s5295_s1 + $0x30] sm:$0xff]  ;;  %v1245_v21 = vld [vmem:[%s5295_s1 + $0x38] sm:$0xff]  ;;  %s5046_s28 = scalar_lea.vmem %s5296_s2, %s3129_s11 }
  0x14   : > { %253 = vst [vmem:[#allocation2 + $0x48] sm:$0xff] %v3735_v8  ;;  %254 = vst [vmem:[#allocation2 + $0x50] sm:$0xff] %v3735_v8  ;;  %v1276_v22 = vld [vmem:[%s5295_s1 + $0x130] sm:$0xff]  ;;  %v1277_v23 = vld [vmem:[%s5295_s1 + $0x138] sm:$0xff]  ;;  %v3269_v24 = vpack.c.bf16 %v1245_v21, %v1244_v20 }
  0x15   : > { %255 = vst [vmem:[#allocation2 + $0x58] sm:$0x3] %v3735_v8  ;;  %256 = vst [vmem:[#allocation2 + $0x60] sm:$0xff] %v3735_v8  ;;  %3264 = vmatpush1.bf16.msra.mxu1 %v3263_v12  ;;  %v3317_v25 = vpack.c.bf16 %v1277_v23, %v1276_v22  ;;  %v1246_v26 = vld [vmem:[%s5295_s1 + $0x40] sm:$0xff]  ;;  %v1247_v27 = vld [vmem:[%s5295_s1 + $0x48] sm:$0xff] }
  0x16   : > { %257 = vst [vmem:[#allocation2 + $0x68] sm:$0xff] %v3735_v8  ;;  %258 = vst [vmem:[#allocation2 + $0x70] sm:$0x3] %v3735_v8  ;;  %3312 = vmatpush1.bf16.msra.mxu0 %v3311_v13  ;;  %3265 = vmatprep.subr.bf16.mxu1 %v5300_v3  ;;  %v1278_v28 = vld [vmem:[%s5295_s1 + $0x140] sm:$0xff]  ;;  %v1279_v29 = vld [vmem:[%s5295_s1 + $0x148] sm:$0xff]  ;;  %v3272_v30 = vpack.c.bf16 %v1247_v27, %v1246_v26 }
  0x17   : > { %259 = vst [vmem:[#allocation2 + $0x78] sm:$0xff] %v3735_v8  ;;  %260 = vst [vmem:[#allocation2 + $0x80] sm:$0xff] %v3735_v8  ;;  %3313 = vmatprep.subr.bf16.mxu0 %v5300_v3  ;;  %v3320_v31 = vpack.c.bf16 %v1279_v29, %v1278_v28  ;;  %v1248_v32 = vld [vmem:[%s5295_s1 + $0x50] sm:$0xff]  ;;  %v1249_v33 = vld [vmem:[%s5295_s1 + $0x58] sm:$0xff] }
  0x18   : > { %261 = vst [vmem:[#allocation2 + $0x88] sm:$0x3] %v3735_v8  ;;  %262 = vst [vmem:[#allocation2 + $0x90] sm:$0xff] %v3735_v8  ;;  %v1280_v34 = vld [vmem:[%s5295_s1 + $0x150] sm:$0xff]  ;;  %v1281_v35 = vld [vmem:[%s5295_s1 + $0x158] sm:$0xff]  ;;  %v3275_v36 = vpack.c.bf16 %v1249_v33, %v1248_v32 }
  0x19   : > { %263 = vst [vmem:[#allocation2 + $0x98] sm:$0xff] %v3735_v8  ;;  %264 = vst [vmem:[#allocation2 + $0xa0] sm:$0x3] %v3735_v8  ;;  %3267 = vmatpush1.bf16.msra.mxu1 %v3266_v18  ;;  %v3323_v37 = vpack.c.bf16 %v1281_v35, %v1280_v34  ;;  %v1250_v38 = vld [vmem:[%s5295_s1 + $0x60] sm:$0xff]  ;;  %v1251_v39 = vld [vmem:[%s5295_s1 + $0x68] sm:$0xff] }
  0x1a   : > { %265 = vst [vmem:[#allocation2 + $0xa8] sm:$0xff] %v3735_v8  ;;  %266 = vst [vmem:[#allocation2 + $0xb0] sm:$0xff] %v3735_v8  ;;  %3315 = vmatpush1.bf16.msra.mxu0 %v3314_v19  ;;  %3268 = vmatprep.subr.bf16.mxu1 %v5300_v3  ;;  %v1282_v40 = vld [vmem:[%s5295_s1 + $0x160] sm:$0xff]  ;;  %v1283_v41 = vld [vmem:[%s5295_s1 + $0x168] sm:$0xff]  ;;  %v3278_v44 = vpack.c.bf16 %v1251_v39, %v1250_v38 }
  0x1b   : > { %267 = vst [vmem:[#allocation2 + $0xb8] sm:$0x3] %v3735_v8  ;;  %268 = vst [vmem:[#allocation2 + $0xc0] sm:$0xff] %v3735_v8  ;;  %3316 = vmatprep.subr.bf16.mxu0 %v5300_v3  ;;  %v432_v42 = vld [vmem:[#allocation2 + $0x1] sm:$0xff]  ;;  %v1252_v45 = vld [vmem:[%s5295_s1 + $0x70] sm:$0xff]  ;;  %v3326_v47 = vpack.c.bf16 %v1283_v41, %v1282_v40 }
  0x1c   : > { %269 = vst [vmem:[#allocation2 + $0xc8] sm:$0xff] %v3735_v8  ;;  %270 = vst [vmem:[#allocation2 + $0xd0] sm:$0x3] %v3735_v8  ;;  %v3962_v43 = vld [vmem:[%s3945_s26] sm:$0xff]  ;;  %1446 = vmatprep.mubr.f32.mxu1 %v432_v42  ;;  %v3969_v46 = vld [vmem:[%s3945_s26 + $0x8] sm:$0xff] }
  0x1d   : > { %271 = vst [vmem:[#allocation2 + $0xd8] sm:$0xff] %v3735_v8  ;;  %272 = vst [vmem:[#allocation2 + $0xe0] sm:$0xff] %v3735_v8  ;;  %3270 = vmatpush1.bf16.msra.mxu1 %v3269_v24  ;;  %v1253_v48 = vld [vmem:[%s5295_s1 + $0x78] sm:$0xff]  ;;  %v1284_v49 = vld [vmem:[%s5295_s1 + $0x170] sm:$0xff] }
  0x1e   : > { %273 = vst [vmem:[#allocation2 + $0xe8] sm:$0x3] %v3735_v8  ;;  %274 = vst [vmem:[#allocation2 + $0xf0] sm:$0xff] %v3735_v8  ;;  %3318 = vmatpush1.bf16.msra.mxu0 %v3317_v25  ;;  %3271 = vmatprep.subr.bf16.mxu1 %v5300_v3  ;;  %v3980_v50 = vld [vmem:[%s3945_s26 + $0x10] sm:$0xff]  ;;  %v1285_v51 = vld [vmem:[%s5295_s1 + $0x178] sm:$0xff]  ;;  %v3281_v56 = vpack.c.bf16 %v1253_v48, %v1252_v45 }
  0x1f   : > { %275 = vst [vmem:[#allocation2 + $0xf8] sm:$0xff] %v3735_v8  ;;  %276 = vst [vmem:[#allocation2 + $0x100] sm:$0x3] %v3735_v8  ;;  %3319 = vmatprep.subr.bf16.mxu0 %v5300_v3  ;;  %v3988_v52 = vld [vmem:[%s3945_s26 + $0x18] sm:$0xff]  ;;  %v3991_v53 = vld [vmem:[%s3945_s26 + $0x20] sm:$0xff]  ;;  %v3329_v60 = vpack.c.bf16 %v1285_v51, %v1284_v49 }
  0x20   : > { %277 = vst [vmem:[#allocation2 + $0x108] sm:$0xff] %v3735_v8  ;;  %278 = vst [vmem:[#allocation2 + $0x110] sm:$0xff] %v3735_v8  ;;  %v3996_v54 = vld [vmem:[%s3945_s26 + $0x28] sm:$0xff]  ;;  %v3999_v55 = vld [vmem:[%s3945_s26 + $0x30] sm:$0xff] }
  0x21   : > { %279 = vst [vmem:[#allocation2 + $0x118] sm:$0x3] %v3735_v8  ;;  %280 = vst [vmem:[#allocation2 + $0x120] sm:$0xff] %v3735_v8  ;;  %3273 = vmatpush1.bf16.msra.mxu1 %v3272_v30  ;;  %v1254_v57 = vld [vmem:[%s5295_s1 + $0x80] sm:$0xff]  ;;  %v1255_v58 = vld [vmem:[%s5295_s1 + $0x88] sm:$0xff] }
  0x22   : > { %281 = vst [vmem:[#allocation2 + $0x128] sm:$0xff] %v3735_v8  ;;  %282 = vst [vmem:[#allocation2 + $0x130] sm:$0x3] %v3735_v8  ;;  %3321 = vmatpush1.bf16.msra.mxu0 %v3320_v31  ;;  %3274 = vmatprep.subr.bf16.mxu1 %v5300_v3  ;;  %v4010_v59 = vld [vmem:[%s3945_s26 + $0x38] sm:$0xff]  ;;  %v1286_v61 = vld [vmem:[%s5295_s1 + $0x180] sm:$0xff]  ;;  %v3284_v5 = vpack.c.bf16 %v1255_v58, %v1254_v57 }
  0x23   : > { %283 = vst [vmem:[#allocation2 + $0x138] sm:$0xff] %v3735_v8  ;;  %284 = vst [vmem:[#allocation2 + $0x140] sm:$0xff] %v3735_v8  ;;  %3322 = vmatprep.subr.bf16.mxu0 %v5300_v3  ;;  %v1287_v62 = vld [vmem:[%s5295_s1 + $0x188] sm:$0xff]  ;;  %v4021_v63 = vld [vmem:[%s3945_s26 + $0x40] sm:$0xff] }
  0x24   : > { %285 = vst [vmem:[#allocation2 + $0x148] sm:$0x3] %v3735_v8  ;;  %286 = vst [vmem:[#allocation2 + $0x150] sm:$0xff] %v3735_v8  ;;  %v4028_v1 = vld [vmem:[%s3945_s26 + $0x48] sm:$0xff]  ;;  %v4031_v2 = vld [vmem:[%s3945_s26 + $0x50] sm:$0xff]  ;;  %v3332_v6 = vpack.c.bf16 %v1287_v62, %v1286_v61 }
  0x25   : > { %287 = vst [vmem:[#allocation2 + $0x158] sm:$0xff] %v3735_v8  ;;  %288 = vst [vmem:[#allocation2 + $0x160] sm:$0x3] %v3735_v8  ;;  %3276 = vmatpush1.bf16.msra.mxu1 %v3275_v36  ;;  %v4037_v4 = vld [vmem:[%s3945_s26 + $0x58] sm:$0xff]  ;;  %v1256_v7 = vld [vmem:[%s5295_s1 + $0x90] sm:$0xff] }
  0x26   : > { %289 = vst [vmem:[#allocation2 + $0x168] sm:$0xff] %v3735_v8  ;;  %290 = vst [vmem:[#allocation2 + $0x170] sm:$0xff] %v3735_v8  ;;  %3324 = vmatpush1.bf16.msra.mxu0 %v3323_v37  ;;  %3277 = vmatprep.subr.bf16.mxu1 %v5300_v3  ;;  %v1257_v9 = vld [vmem:[%s5295_s1 + $0x98] sm:$0xff]  ;;  %v4048_v10 = vld [vmem:[%s3945_s26 + $0x60] sm:$0xff] }
  0x27   : > { %291 = vst [vmem:[#allocation2 + $0x178] sm:$0x3] %v3735_v8  ;;  %292 = vst [vmem:[#allocation2 + $0x180] sm:$0xff] %v3735_v8  ;;  %3325 = vmatprep.subr.bf16.mxu0 %v5300_v3  ;;  %v1288_v11 = vld [vmem:[%s5295_s1 + $0x190] sm:$0xff]  ;;  %v1289_v12 = vld [vmem:[%s5295_s1 + $0x198] sm:$0xff]  ;;  %v3287_v13 = vpack.c.bf16 %v1257_v9, %v1256_v7 }
  0x28   : > { %293 = vst [vmem:[#allocation2 + $0x188] sm:$0xff] %v3735_v8  ;;  %294 = vst [vmem:[#allocation2 + $0x190] sm:$0x3] %v3735_v8  ;;  %v3335_v14 = vpack.c.bf16 %v1289_v12, %v1288_v11  ;;  %v1258_v15 = vld [vmem:[%s5295_s1 + $0xa0] sm:$0xff]  ;;  %v1259_v16 = vld [vmem:[%s5295_s1 + $0xa8] sm:$0xff] }
  0x29   : > { %295 = vst [vmem:[#allocation2 + $0x198] sm:$0xff] %v3735_v8  ;;  %296 = vst [vmem:[#allocation2 + $0x1a0] sm:$0xff] %v3735_v8  ;;  %3279 = vmatpush1.bf16.msra.mxu1 %v3278_v44  ;;  %v1290_v17 = vld [vmem:[%s5295_s1 + $0x1a0] sm:$0xff]  ;;  %v1291_v18 = vld [vmem:[%s5295_s1 + $0x1a8] sm:$0xff]  ;;  %v3290_v19 = vpack.c.bf16 %v1259_v16, %v1258_v15 }
  0x2a   : > { %297 = vst [vmem:[#allocation2 + $0x1a8] sm:$0x3] %v3735_v8  ;;  %331 = vst [vmem:[#allocation2 + $0x19] sm:$0xff] %v3962_v43  ;;  %3327 = vmatpush1.bf16.msra.mxu0 %v3326_v47  ;;  %3280 = vmatprep.subr.bf16.mxu1 %v5300_v3  ;;  %v3338_v20 = vpack.c.bf16 %v1291_v18, %v1290_v17  ;;  %v1260_v21 = vld [vmem:[%s5295_s1 + $0xb0] sm:$0xff]  ;;  %v1261_v22 = vld [vmem:[%s5295_s1 + $0xb8] sm:$0xff] }
  0x2b   : > { %332 = vst [vmem:[#allocation2 + $0x21] sm:$0xff] %v3969_v46  ;;  %333 = vst [vmem:[#allocation2 + $0x31] sm:$0xff] %v3980_v50  ;;  %3328 = vmatprep.subr.bf16.mxu0 %v5300_v3  ;;  %v4080_v23 = vld [vmem:[%s3945_s26 + $0x68] sm:$0xff]  ;;  %v1292_v24 = vld [vmem:[%s5295_s1 + $0x1b0] sm:$0xff]  ;;  %v3293_v28 = vpack.c.bf16 %v1261_v22, %v1260_v21 }
  0x2c   : > { %334 = vst [vmem:[#allocation2 + $0x39] sm:$0xff] %v3988_v52  ;;  %335 = vst [vmem:[#allocation2 + $0x49] sm:$0xff] %v3991_v53  ;;  %v1293_v25 = vld [vmem:[%s5295_s1 + $0x1b8] sm:$0xff]  ;;  %v4091_v26 = vld [vmem:[%s3945_s26 + $0x70] sm:$0xff] }
  0x2d   : > { %336 = vst [vmem:[#allocation2 + $0x51] sm:$0xff] %v3996_v54  ;;  %337 = vst [vmem:[#allocation2 + $0x61] sm:$0xff] %v3999_v55  ;;  %3282 = vmatpush1.bf16.msra.mxu1 %v3281_v56  ;;  %v4095_v27 = vld [vmem:[%s3945_s26 + $0x78] sm:$0xff]  ;;  %v4099_v29 = vld [vmem:[%s3945_s26 + $0x80] sm:$0xff]  ;;  %v3341_v30 = vpack.c.bf16 %v1293_v25, %v1292_v24 }
  0x2e   : > { %338 = vst [vmem:[#allocation2 + $0x69] sm:$0xff] %v4010_v59  ;;  %339 = vst [vmem:[#allocation2 + $0x79] sm:$0xff] %v4021_v63  ;;  %3330 = vmatpush1.bf16.msra.mxu0 %v3329_v60  ;;  %3283 = vmatprep.subr.bf16.mxu1 %v5300_v3  ;;  %v1262_v31 = vld [vmem:[%s5295_s1 + $0xc0] sm:$0xff]  ;;  %v1263_v32 = vld [vmem:[%s5295_s1 + $0xc8] sm:$0xff] }
  0x2f   : > { %340 = vst [vmem:[#allocation2 + $0x81] sm:$0xff] %v4028_v1  ;;  %341 = vst [vmem:[#allocation2 + $0x91] sm:$0xff] %v4031_v2  ;;  %3331 = vmatprep.subr.bf16.mxu0 %v5300_v3  ;;  %v4110_v33 = vld [vmem:[%s3945_s26 + $0x88] sm:$0xff]  ;;  %v1294_v34 = vld [vmem:[%s5295_s1 + $0x1c0] sm:$0xff]  ;;  %v3296_v38 = vpack.c.bf16 %v1263_v32, %v1262_v31 }
  0x30   : > { %342 = vst [vmem:[#allocation2 + $0x99] sm:$0xff] %v4037_v4  ;;  %343 = vst [vmem:[#allocation2 + $0xa9] sm:$0xff] %v4048_v10  ;;  %v1295_v35 = vld [vmem:[%s5295_s1 + $0x1c8] sm:$0xff]  ;;  %v4121_v36 = vld [vmem:[%s3945_s26 + $0x90] sm:$0xff] }
  0x31   : > { %v4024_v0 = vld [vmem:[#allocation2 + $0x18] sm:$0xff]  ;;  %3285 = vmatpush1.bf16.msra.mxu1 %v3284_v5  ;;  %344 = vst [vmem:[#allocation2 + $0xb1] sm:$0xff] %v4080_v23  ;;  %345 = vst [vmem:[#allocation2 + $0xc1] sm:$0xff] %v4091_v26  ;;  %v4129_v39 = vld [vmem:[%s3945_s26 + $0xa0] sm:$0xff]  ;;  %v3344_v40 = vpack.c.bf16 %v1295_v35, %v1294_v34 }
  0x32   : > { %1671 = vmatprep.mubr.f32.mxu0 %v4024_v0  ;;  %3333 = vmatpush1.bf16.msra.mxu0 %v3332_v6  ;;  %346 = vst [vmem:[#allocation2 + $0xc9] sm:$0xff] %v4095_v27  ;;  %347 = vst [vmem:[#allocation2 + $0xd9] sm:$0xff] %v4099_v29  ;;  %v4125_v37 = vld [vmem:[%s3945_s26 + $0x98] sm:$0xff]  ;;  %v1264_v41 = vld [vmem:[%s5295_s1 + $0xd0] sm:$0xff] }
  0x33   : > { %3286 = vmatprep.subr.bf16.mxu1 %v5300_v3  ;;  %3334 = vmatprep.subr.bf16.mxu0 %v5300_v3  ;;  %348 = vst [vmem:[#allocation2 + $0xe1] sm:$0xff] %v4110_v33  ;;  %349 = vst [vmem:[#allocation2 + $0xf1] sm:$0xff] %v4121_v36  ;;  %v1265_v42 = vld [vmem:[%s5295_s1 + $0xd8] sm:$0xff]  ;;  %v1296_v44 = vld [vmem:[%s5295_s1 + $0x1d0] sm:$0xff] }
  0x34   : > { %350 = vst [vmem:[#allocation2 + $0xf9] sm:$0xff] %v4125_v37  ;;  %351 = vst [vmem:[#allocation2 + $0x109] sm:$0xff] %v4129_v39  ;;  %v1297_v45 = vld [vmem:[%s5295_s1 + $0x1d8] sm:$0xff]  ;;  %v3299_v47 = vpack.c.bf16 %v1265_v42, %v1264_v41  ;;  %v4147_v48 = vld [vmem:[%s3945_s26 + $0xa8] sm:$0xff] }
  0x35   : > { %3288 = vmatpush1.bf16.msra.mxu1 %v3287_v13  ;;  %v3347_v49 = vpack.c.bf16 %v1297_v45, %v1296_v44  ;;  %v1266_v51 = vld [vmem:[%s5295_s1 + $0xe0] sm:$0xff]  ;;  %v1267_v56 = vld [vmem:[%s5295_s1 + $0xe8] sm:$0xff]  ;;  %352 = vst [vmem:[#allocation2 + $0x111] sm:$0xff] %v4147_v48  ;;  %v4165_v60 = vld [vmem:[%s3945_s26 + $0xb0] sm:$0xff] }
  0x36   : > { %3336 = vmatpush1.bf16.msra.mxu0 %v3335_v14  ;;  %3289 = vmatprep.subr.bf16.mxu1 %v5300_v3  ;;  %v1298_v57 = vld [vmem:[%s5295_s1 + $0x1e0] sm:$0xff]  ;;  %v1299_v58 = vld [vmem:[%s5295_s1 + $0x1e8] sm:$0xff]  ;;  %353 = vst [vmem:[#allocation2 + $0x121] sm:$0xff] %v4165_v60  ;;  %v3302_v61 = vpack.c.bf16 %v1267_v56, %v1266_v51  ;;  %v1268_v5 = vld [vmem:[%s5295_s1 + $0xf0] sm:$0xff] }
  0x37   : > { %3337 = vmatprep.subr.bf16.mxu0 %v5300_v3  ;;  %v3350_v62 = vpack.c.bf16 %v1299_v58, %v1298_v57  ;;  %v1269_v6 = vld [vmem:[%s5295_s1 + $0xf8] sm:$0xff]  ;;  %v1300_v9 = vld [vmem:[%s5295_s1 + $0x1f0] sm:$0xff]  ;;  %v4187_v12 = vld [vmem:[%s3945_s26 + $0xc0] sm:$0xff] }
  0x38   : > { %v4176_v7 = vld [vmem:[%s3945_s26 + $0xb8] sm:$0xff]  ;;  %355 = vst [vmem:[#allocation2 + $0x139] sm:$0xff] %v4187_v12  ;;  %v3305_v13 = vpack.c.bf16 %v1269_v6, %v1268_v5  ;;  %v4192_v15 = vld [vmem:[%s3945_s26 + $0xc8] sm:$0xff]  ;;  %v1302_v16 = vld [vmem:[%s5295_s1 + $0x200] sm:$0xff] }
  0x39   : > { %3291 = vmatpush1.bf16.msra.mxu1 %v3290_v19  ;;  %v1301_v11 = vld [vmem:[%s5295_s1 + $0x1f8] sm:$0xff]  ;;  %354 = vst [vmem:[#allocation2 + $0x129] sm:$0xff] %v4176_v7  ;;  %v1303_v17 = vld [vmem:[%s5295_s1 + $0x208] sm:$0xff]  ;;  %356 = vst [vmem:[#allocation2 + $0x141] sm:$0xff] %v4192_v15 }
  0x3a   : > { %3339 = vmatpush1.bf16.msra.mxu0 %v3338_v20  ;;  %3292 = vmatprep.subr.bf16.mxu1 %v5300_v3  ;;  %v3353_v14 = vpack.c.bf16 %v1301_v11, %v1300_v9  ;;  %v4203_v18 = vld [vmem:[%s3945_s26 + $0xd0] sm:$0xff]  ;;  %v1334_v19 = vld [vmem:[%s5295_s1 + $0x300] sm:$0xff]  ;;  %v1335_v20 = vld [vmem:[%s5295_s1 + $0x308] sm:$0xff]  ;;  %v3356_v24 = vpack.c.bf16 %v1303_v17, %v1302_v16 }
  0x3b   : > { %3340 = vmatprep.subr.bf16.mxu0 %v5300_v3  ;;  %357 = vst [vmem:[#allocation2 + $0x151] sm:$0xff] %v4203_v18  ;;  %v4213_v21 = vld [vmem:[%s3945_s26 + $0xd8] sm:$0xff]  ;;  %v496_v22 = vld [vmem:[#allocation2 + $0x2] sm:$0xff]  ;;  %v4224_v32 = vpack.c.bf16 %v1335_v20, %v1334_v19  ;;  %v1336_v35 = vld [vmem:[%s5295_s1 + $0x310] sm:$0xff] }
  0x3c   : > { %v433_v25 = vld [vmem:[#allocation2 + $0x9] sm:$0xff]  ;;  %358 = vst [vmem:[#allocation2 + $0x159] sm:$0xff] %v4213_v21  ;;  %v1305_v31 = vld [vmem:[%s5295_s1 + $0x218] sm:$0xff]  ;;  %v4227_v34 = vld [vmem:[%s3945_s26 + $0xe0] sm:$0xff] }
  0x3d   : > { %3294 = vmatpush1.bf16.msra.mxu1 %v3293_v28  ;;  %v1304_v28 = vld [vmem:[%s5295_s1 + $0x210] sm:$0xff]  ;;  %359 = vst [vmem:[#allocation2 + $0x169] sm:$0xff] %v4227_v34  ;;  %v1306_v44 = vld [vmem:[%s5295_s1 + $0x220] sm:$0xff]  ;;  %v1339_v57 = vld [vmem:[%s5295_s1 + $0x328] sm:$0xff] }
  0x3e   : > { %3342 = vmatpush1.bf16.msra.mxu0 %v3341_v30  ;;  %3295 = vmatprep.subr.bf16.mxu1 %v5300_v3  ;;  %v2936_v30 = vld [vmem:[#allocation2 + $0x20] sm:$0xff]  ;;  %v497_v41 = vld [vmem:[#allocation2 + $0xa] sm:$0xff]  ;;  %v3359_v42 = vpack.c.bf16 %v1305_v31, %v1304_v28  ;;  %v1309_v6 = vld [vmem:[%s5295_s1 + $0x238] sm:$0xff] }
  0x3f   : > { %3343 = vmatprep.subr.bf16.mxu0 %v5300_v3  ;;  %v2937_v45 = vld [vmem:[#allocation2 + $0x30] sm:$0xff]  ;;  %v1338_v56 = vld [vmem:[%s5295_s1 + $0x320] sm:$0xff]  ;;  %v1341_v11 = vld [vmem:[%s5295_s1 + $0x338] sm:$0xff] }
  0x40   : > { %v4252_v51 = vld [vmem:[%s3945_s26 + $0xf0] sm:$0xff]  ;;  %v4264_v58 = vld [vmem:[#allocation2 + $0x1a] sm:$0xff]  ;;  %v1311_v17 = vld [vmem:[%s5295_s1 + $0x248] sm:$0xff] }
  0x41   : > { %3297 = vmatpush1.bf16.msra.mxu1 %v3296_v38  ;;  %v1337_v38 = vld [vmem:[%s5295_s1 + $0x318] sm:$0xff]  ;;  %5344 = vst [vmem:[#allocation5_spill] sm:$0xff] %v4252_v51  ;;  %361 = vst [vmem:[#allocation2 + $0x181] sm:$0xff] %v4252_v51  ;;  %v1308_v5 = vld [vmem:[%s5295_s1 + $0x230] sm:$0xff] }
  0x42   : > { %3345 = vmatpush1.bf16.msra.mxu0 %v3344_v40  ;;  %3298 = vmatprep.subr.bf16.mxu1 %v5300_v3  ;;  %v4238_v40 = vld [vmem:[%s3945_s26 + $0xe8] sm:$0xff]  ;;  %v1340_v9 = vld [vmem:[%s5295_s1 + $0x330] sm:$0xff]  ;;  %v1310_v16 = vld [vmem:[%s5295_s1 + $0x240] sm:$0xff] }
  0x43   : > { %3346 = vmatprep.subr.bf16.mxu0 %v5300_v3  ;;  %360 = vst [vmem:[#allocation2 + $0x171] sm:$0xff] %v4238_v40  ;;  %v4300_v19 = vpack.c.bf16 %v1341_v11, %v1340_v9  ;;  %v1343_v20 = vld [vmem:[%s5295_s1 + $0x348] sm:$0xff]  ;;  %v1312_v28 = vld [vmem:[%s5295_s1 + $0x250] sm:$0xff]  ;;  %v1349_v11 = vld [vmem:[%s5295_s1 + $0x378] sm:$0xff] }
  0x44   : > { %v4571_v51 = vld [vmem:[#allocation2 + $0xd8] sm:$0xff] }
  0x45   : > { %3300 = vmatpush1.bf16.msra.mxu1 %v3299_v47  ;;  %v1307_v47 = vld [vmem:[%s5295_s1 + $0x228] sm:$0xff] }
  0x46   : > { %3348 = vmatpush1.bf16.msra.mxu0 %v3347_v49  ;;  %3301 = vmatprep.subr.bf16.mxu1 %v5300_v3  ;;  %v4249_v49 = vpack.c.bf16 %v1337_v38, %v1336_v35  ;;  %v1345_v35 = vld [vmem:[%s5295_s1 + $0x358] sm:$0xff] }
  0x47   : > { %3349 = vmatprep.subr.bf16.mxu0 %v5300_v3  ;;  %v4332_v38 = vld [vmem:[#allocation2 + $0x3a] sm:$0xff] }
  0x49   : > { %3303 = vmatpush1.bf16.msra.mxu1 %v3302_v61  ;;  %v4267_v61 = vld [vmem:[%s3945_s26 + $0xf8] sm:$0xff] }
  0x4a   : > { %3351 = vmatpush1.bf16.msra.mxu0 %v3350_v62  ;;  %3304 = vmatprep.subr.bf16.mxu1 %v5300_v3  ;;  %5345 = vst [vmem:[#allocation6_spill] sm:$0xff] %v4267_v61  ;;  %v2938_v62 = vld [vmem:[#allocation2 + $0x38] sm:$0xff]  ;;  %362 = vst [vmem:[#allocation2 + $0x189] sm:$0xff] %v4267_v61 }
  0x4b   : > { %3352 = vmatprep.subr.bf16.mxu0 %v5300_v3 }
  0x4d   : > { %3306 = vmatpush1.bf16.msra.mxu1 %v3305_v13  ;;  %v4290_v13 = vld [vmem:[#allocation2 + $0x22] sm:$0xff] }
  0x4e   : > { %3354 = vmatpush1.bf16.msra.mxu0 %v3353_v14  ;;  %3483 = vmatprep.subr.bf16.mxu1 %v5300_v3  ;;  %v3365_v14 = vpack.c.bf16 %v1309_v6, %v1308_v5  ;;  %v1316_v5 = vld [vmem:[%s5295_s1 + $0x270] sm:$0xff]  ;;  %v1317_v6 = vld [vmem:[%s5295_s1 + $0x278] sm:$0xff] }
  0x4f   : > { %3355 = vmatprep.subr.bf16.mxu0 %v5300_v3 }
  0x50   : > { %1447 = vmatmul.mubr.f32.vlgmr.msra.gmra.mrb[0].mxu1 %v3735_v8 }
  0x51   : > { %1672 = vmatmul.mubr.f32.vlgmr.msra.gmra.mrb[0].mxu0 %v496_v22  ;;  %1451 = vmatprep.mubr.f32.mxu1 %v433_v25  ;;  %v4311_v22 = vld [vmem:[#allocation2 + $0x32] sm:$0xff] }
  0x52   : > { %3357 = vmatpush1.bf16.msra.mxu0 %v3356_v24  ;;  %1676 = vmatprep.mubr.f32.mxu0 %v2936_v30  ;;  %v3368_v24 = vpack.c.bf16 %v1311_v17, %v1310_v16  ;;  %v2940_v25 = vld [vmem:[#allocation2 + $0x50] sm:$0xff]  ;;  %v3377_v16 = vpack.c.bf16 %v1317_v6, %v1316_v5  ;;  %v1318_v17 = vld [vmem:[%s5295_s1 + $0x280] sm:$0xff]  ;;  %v1355_v6 = vld [vmem:[%s5295_s1 + $0x3a8] sm:$0xff] }
  0x53   : > { %3358 = vmatprep.subr.bf16.mxu0 %v5300_v3  ;;  %3499 = vmatpush1.bf16.msra.mxu1 %v4224_v32  ;;  %v1354_v5 = vld [vmem:[%s5295_s1 + $0x3a0] sm:$0xff] }
  0x54   : > { %1452 = vmatmul.mubr.f32.gmra.mrb[2].mxu1 %v3735_v8  ;;  %3484 = vmatprep.subr.bf16.mxu1 %v5300_v3  ;;  %v3362_v8 = vpack.c.bf16 %v1307_v47, %v1306_v44  ;;  %v1314_v44 = vld [vmem:[%s5295_s1 + $0x260] sm:$0xff] }
  0x55   : > { %1677 = vmatmul.mubr.f32.gmra.mrb[2].mxu0 %v497_v41  ;;  %1456 = vmatprep.mubr.f32.mxu1 %v3962_v43  ;;  %v4277_v43 = vpack.c.bf16 %v1339_v57, %v1338_v56  ;;  %v1347_v56 = vld [vmem:[%s5295_s1 + $0x368] sm:$0xff] }
  0x56   : > { %1681 = vmatprep.mubr.f32.mxu0 %v2937_v45  ;;  %3360 = vmatpush1.bf16.msra.mxu0 %v3359_v42  ;;  %v2941_v42 = vld [vmem:[#allocation2 + $0x60] sm:$0xff]  ;;  %v4353_v57 = vld [vmem:[#allocation2 + $0x4a] sm:$0xff] }
  0x57   : > { %3361 = vmatprep.subr.bf16.mxu0 %v5300_v3  ;;  %3500 = vmatpush1.bf16.msra.mxu1 %v4249_v49 }
  0x58   : > { %1457 = vmatmul.mubr.f32.gmra.mrb[4].mxu1 %v4024_v0  ;;  %3485 = vmatprep.subr.bf16.mxu1 %v5300_v3  ;;  %v2939_v0 = vld [vmem:[#allocation2 + $0x48] sm:$0xff] }
  0x59   : > { %1682 = vmatmul.mubr.f32.gmra.mrb[4].mxu0 %v4264_v58  ;;  %1461 = vmatprep.mubr.f32.mxu1 %v3969_v46  ;;  %v1342_v46 = vld [vmem:[%s5295_s1 + $0x340] sm:$0xff] }
  0x5a   : > { %1686 = vmatprep.mubr.f32.mxu0 %v2938_v62  ;;  %3363 = vmatpush1.bf16.msra.mxu0 %v3362_v8  ;;  %v4321_v31 = vpack.c.bf16 %v1343_v20, %v1342_v46  ;;  %v1319_v46 = vld [vmem:[%s5295_s1 + $0x288] sm:$0xff] }
  0x5b   : > { %3364 = vmatprep.subr.bf16.mxu0 %v5300_v3  ;;  %3501 = vmatpush1.bf16.msra.mxu1 %v4277_v43 }
  0x5c   : > { %1462 = vmatmul.mubr.f32.gmra.mrb[6].mxu1 %v2936_v30  ;;  %3486 = vmatprep.subr.bf16.mxu1 %v5300_v3  ;;  %v1313_v30 = vld [vmem:[%s5295_s1 + $0x258] sm:$0xff] }
  0x5d   : > { %1687 = vmatmul.mubr.f32.gmra.mrb[6].mxu0 %v4290_v13  ;;  %1466 = vmatprep.mubr.f32.mxu1 %v3980_v50  ;;  %v1344_v50 = vld [vmem:[%s5295_s1 + $0x350] sm:$0xff]  ;;  %v3371_v41 = vpack.c.bf16 %v1313_v30, %v1312_v28  ;;  %v4395_v28 = vld [vmem:[#allocation2 + $0x62] sm:$0xff]  ;;  %v3380_v30 = vpack.c.bf16 %v1319_v46, %v1318_v17  ;;  %v1325_v17 = vld [vmem:[%s5295_s1 + $0x2b8] sm:$0xff] }
  0x5e   : > { %1691 = vmatprep.mubr.f32.mxu0 %v2939_v0  ;;  %3366 = vmatpush1.bf16.msra.mxu0 %v3365_v14  ;;  %v4342_v47 = vpack.c.bf16 %v1345_v35, %v1344_v50  ;;  %v4374_v14 = vld [vmem:[#allocation2 + $0x52] sm:$0xff] }
  0x5f   : > { %3367 = vmatprep.subr.bf16.mxu0 %v5300_v3  ;;  %3502 = vmatpush1.bf16.msra.mxu1 %v4300_v19  ;;  %v1320_v50 = vld [vmem:[%s5295_s1 + $0x290] sm:$0xff]  ;;  %v1321_v35 = vld [vmem:[%s5295_s1 + $0x298] sm:$0xff] }
  0x60   : > { %1467 = vmatmul.mubr.f32.gmra.mrb[8].mxu1 %v2937_v45  ;;  %3487 = vmatprep.subr.bf16.mxu1 %v5300_v3  ;;  %v1315_v45 = vld [vmem:[%s5295_s1 + $0x268] sm:$0xff]  ;;  %v1356_v46 = vld [vmem:[%s5295_s1 + $0x3b0] sm:$0xff] }
  0x61   : > { %1692 = vmatmul.mubr.f32.gmra.mrb[8].mxu0 %v4311_v22  ;;  %1471 = vmatprep.mubr.f32.mxu1 %v3988_v52  ;;  %v1346_v52 = vld [vmem:[%s5295_s1 + $0x360] sm:$0xff]  ;;  %v3374_v8 = vpack.c.bf16 %v1315_v45, %v1314_v44  ;;  %v1353_v44 = vld [vmem:[%s5295_s1 + $0x398] sm:$0xff]  ;;  %v4416_v45 = vld [vmem:[#allocation2 + $0x6a] sm:$0xff] }
  0x62   : > { %1696 = vmatprep.mubr.f32.mxu0 %v2940_v25  ;;  %3369 = vmatpush1.bf16.msra.mxu0 %v3368_v24  ;;  %v4363_v9 = vpack.c.bf16 %v1347_v56, %v1346_v52  ;;  %v1351_v24 = vld [vmem:[%s5295_s1 + $0x388] sm:$0xff]  ;;  %v3383_v52 = vpack.c.bf16 %v1321_v35, %v1320_v50  ;;  %v1322_v56 = vld [vmem:[%s5295_s1 + $0x2a0] sm:$0xff] }
  0x63   : > { %3370 = vmatprep.subr.bf16.mxu0 %v5300_v3  ;;  %3503 = vmatpush1.bf16.msra.mxu1 %v4321_v31  ;;  %v1326_v50 = vld [vmem:[%s5295_s1 + $0x2c0] sm:$0xff]  ;;  %v1327_v35 = vld [vmem:[%s5295_s1 + $0x2c8] sm:$0xff] }
  0x64   : > { %1472 = vmatmul.mubr.f32.gmra.mrb[10].mxu1 %v2938_v62  ;;  %3488 = vmatprep.subr.bf16.mxu1 %v5300_v3  ;;  %v2942_v62 = vld [vmem:[#allocation2 + $0x68] sm:$0xff] }
  0x65   : > { %1697 = vmatmul.mubr.f32.gmra.mrb[10].mxu0 %v4332_v38  ;;  %1476 = vmatprep.mubr.f32.mxu1 %v3991_v53  ;;  %v1348_v53 = vld [vmem:[%s5295_s1 + $0x370] sm:$0xff] }
  0x66   : > { %1701 = vmatprep.mubr.f32.mxu0 %v2941_v42  ;;  %3372 = vmatpush1.bf16.msra.mxu0 %v3371_v41  ;;  %v4384_v20 = vpack.c.bf16 %v1349_v11, %v1348_v53  ;;  %v4440_v53 = vld [vmem:[#allocation2 + $0x7a] sm:$0xff] }
  0x67   : > { %3373 = vmatprep.subr.bf16.mxu0 %v5300_v3  ;;  %3504 = vmatpush1.bf16.msra.mxu1 %v4342_v47  ;;  %v4442_v11 = vld [vmem:[#allocation2 + $0x98] sm:$0xff] }
  0x68   : > { %1477 = vmatmul.mubr.f32.gmra.mrb[12].mxu1 %v2939_v0  ;;  %3489 = vmatprep.subr.bf16.mxu1 %v5300_v3  ;;  %v2943_v0 = vld [vmem:[#allocation2 + $0x78] sm:$0xff] }
  0x69   : > { %1702 = vmatmul.mubr.f32.gmra.mrb[12].mxu0 %v4353_v57  ;;  %1481 = vmatprep.mubr.f32.mxu1 %v3996_v54  ;;  %v1350_v54 = vld [vmem:[%s5295_s1 + $0x380] sm:$0xff] }
  0x6a   : > { %1706 = vmatprep.mubr.f32.mxu0 %v2942_v62  ;;  %3375 = vmatpush1.bf16.msra.mxu0 %v3374_v8  ;;  %v4405_v41 = vpack.c.bf16 %v1351_v24, %v1350_v54  ;;  %v1323_v8 = vld [vmem:[%s5295_s1 + $0x2a8] sm:$0xff]  ;;  %v1357_v54 = vld [vmem:[%s5295_s1 + $0x3b8] sm:$0xff] }
  0x6b   : > { %3376 = vmatprep.subr.bf16.mxu0 %v5300_v3  ;;  %3505 = vmatpush1.bf16.msra.mxu1 %v4363_v9  ;;  %v4464_v24 = vld [vmem:[#allocation2 + $0x82] sm:$0xff] }
  0x6c   : > { %1482 = vmatmul.mubr.f32.gmra.mrb[14].mxu1 %v2940_v25  ;;  %3490 = vmatprep.subr.bf16.mxu1 %v5300_v3  ;;  %v2944_v25 = vld [vmem:[#allocation2 + $0x80] sm:$0xff] }
  0x6d   : > { %1707 = vmatmul.mubr.f32.gmra.mrb[14].mxu0 %v4374_v14  ;;  %1486 = vmatprep.mubr.f32.mxu1 %v3999_v55  ;;  %v1352_v55 = vld [vmem:[%s5295_s1 + $0x390] sm:$0xff] }
  0x6e   : > { %1711 = vmatprep.mubr.f32.mxu0 %v2943_v0  ;;  %3378 = vmatpush1.bf16.msra.mxu0 %v3377_v16  ;;  %v1324_v16 = vld [vmem:[%s5295_s1 + $0x2b0] sm:$0xff] }
  0x6f   : > { %3379 = vmatprep.subr.bf16.mxu0 %v5300_v3  ;;  %3506 = vmatpush1.bf16.msra.mxu1 %v4384_v20 }
  0x70   : > { %1487 = vmatmul.mubr.f32.gmra.mrb[16].mxu1 %v2941_v42  ;;  %3491 = vmatprep.subr.bf16.mxu1 %v5300_v3  ;;  %v4418_v42 = vld [vmem:[#allocation2 + $0x90] sm:$0xff] }
  0x71   : > { %1712 = vmatmul.mubr.f32.gmra.mrb[16].mxu0 %v4395_v28  ;;  %1491 = vmatprep.mubr.f32.mxu1 %v4010_v59  ;;  %v4428_v59 = vpack.c.bf16 %v1353_v44, %v1352_v55  ;;  %v1358_v55 = vld [vmem:[%s5295_s1 + $0x3c0] sm:$0xff]  ;;  %v1359_v44 = vld [vmem:[%s5295_s1 + $0x3c8] sm:$0xff] }
  0x72   : > { %1716 = vmatprep.mubr.f32.mxu0 %v2944_v25  ;;  %3381 = vmatpush1.bf16.msra.mxu0 %v3380_v30  ;;  %v4466_v30 = vld [vmem:[#allocation2 + $0xa8] sm:$0xff] }
  0x73   : > { %3382 = vmatprep.subr.bf16.mxu0 %v5300_v3  ;;  %3507 = vmatpush1.bf16.msra.mxu1 %v4405_v41 }
  0x74   : > { %1492 = vmatmul.mubr.f32.gmra.mrb[18].mxu1 %v2942_v62  ;;  %3492 = vmatprep.subr.bf16.mxu1 %v5300_v3  ;;  %v3386_v62 = vpack.c.bf16 %v1323_v8, %v1322_v56  ;;  %v4490_v56 = vld [vmem:[#allocation2 + $0xb0] sm:$0xff] }
  0x75   : > { %1717 = vmatmul.mubr.f32.gmra.mrb[18].mxu0 %v4416_v45  ;;  %1496 = vmatprep.mubr.f32.mxu1 %v4021_v63  ;;  %v4452_v63 = vpack.c.bf16 %v1355_v6, %v1354_v5  ;;  %v1328_v8 = vld [vmem:[%s5295_s1 + $0x2d0] sm:$0xff]  ;;  %v1329_v5 = vld [vmem:[%s5295_s1 + $0x2d8] sm:$0xff]  ;;  %v4500_v6 = vpack.c.bf16 %v1359_v44, %v1358_v55  ;;  %v1362_v55 = vld [vmem:[%s5295_s1 + $0x3e0] sm:$0xff] }
  0x76   : > { %1721 = vmatprep.mubr.f32.mxu0 %v4418_v42  ;;  %3384 = vmatpush1.bf16.msra.mxu0 %v3383_v52  ;;  %v4488_v52 = vld [vmem:[#allocation2 + $0x92] sm:$0xff]  ;;  %v1363_v44 = vld [vmem:[%s5295_s1 + $0x3e8] sm:$0xff] }
  0x77   : > { %3385 = vmatprep.subr.bf16.mxu0 %v5300_v3  ;;  %3508 = vmatpush1.bf16.msra.mxu1 %v4428_v59  ;;  %5347 = vst [vmem:[#allocation8_spill] sm:$0xff] %v4500_v6  ;;  %v4550_v61 = vpack.c.bf16 %v1363_v44, %v1362_v55  ;;  %v1367_v55 = vld [vmem:[%s5295_s1 + $0x408] sm:$0xff]  ;;  %v4569_v44 = vld [vmem:[#allocation2 + $0xb2] sm:$0xff] }
  0x78   : > { %1497 = vmatmul.mubr.f32.gmra.mrb[20].mxu1 %v2943_v0  ;;  %3493 = vmatprep.subr.bf16.mxu1 %v5300_v3  ;;  %v3389_v0 = vpack.c.bf16 %v1325_v17, %v1324_v16  ;;  %v1361_v16 = vld [vmem:[%s5295_s1 + $0x3d8] sm:$0xff]  ;;  %5351 = vst [vmem:[#allocation12_spill] sm:$0xff] %v4569_v44 }
  0x79   : > { %1722 = vmatmul.mubr.f32.gmra.mrb[20].mxu0 %v4440_v53  ;;  %1501 = vmatprep.mubr.f32.mxu1 %v4028_v1  ;;  %v4476_v1 = vpack.c.bf16 %v1357_v54, %v1356_v46  ;;  %v4513_v17 = vld [vmem:[#allocation2 + $0x9a] sm:$0xff]  ;;  %v3395_v46 = vpack.c.bf16 %v1329_v5, %v1328_v8  ;;  %v4540_v5 = vld [vmem:[#allocation2 + $0xc8] sm:$0xff]  ;;  %5350 = vst [vmem:[#allocation11_spill] sm:$0xff] %v4550_v61 }
  0x7a   : > { %1726 = vmatprep.mubr.f32.mxu0 %v4442_v11  ;;  %3387 = vmatpush1.bf16.msra.mxu0 %v3386_v62  ;;  %v1360_v62 = vld [vmem:[%s5295_s1 + $0x3d0] sm:$0xff]  ;;  %v4515_v54 = vld [vmem:[#allocation2 + $0xc0] sm:$0xff] }
  0x7b   : > { %3388 = vmatprep.subr.bf16.mxu0 %v5300_v3  ;;  %3509 = vmatpush1.bf16.msra.mxu1 %v4452_v63  ;;  %5346 = vst [vmem:[#allocation7_spill] sm:$0xff] %v4476_v1 }
  0x7c   : > { %1502 = vmatmul.mubr.f32.gmra.mrb[22].mxu1 %v2944_v25  ;;  %3494 = vmatprep.subr.bf16.mxu1 %v5300_v3  ;;  %v3392_v25 = vpack.c.bf16 %v1327_v35, %v1326_v50  ;;  %v1331_v50 = vld [vmem:[%s5295_s1 + $0x2e8] sm:$0xff]  ;;  %v4525_v35 = vpack.c.bf16 %v1361_v16, %v1360_v62  ;;  %v1332_v62 = vld [vmem:[%s5295_s1 + $0x2f0] sm:$0xff]  ;;  %v1333_v16 = vld [vmem:[%s5295_s1 + $0x2f8] sm:$0xff] }
  0x7d   : > { %1727 = vmatmul.mubr.f32.gmra.mrb[22].mxu0 %v4464_v24  ;;  %1506 = vmatprep.mubr.f32.mxu1 %v4031_v2 }
  0x7e   : > { %1731 = vmatprep.mubr.f32.mxu0 %v4466_v30  ;;  %3390 = vmatpush1.bf16.msra.mxu0 %v3389_v0  ;;  %v1330_v0 = vld [vmem:[%s5295_s1 + $0x2e0] sm:$0xff]  ;;  %5348 = vst [vmem:[#allocation9_spill] sm:$0xff] %v4525_v35 }
  0x7f   : > { %3391 = vmatprep.subr.bf16.mxu0 %v5300_v3  ;;  %3510 = vmatpush1.bf16.msra.mxu1 %v4476_v1  ;;  %v3398_v8 = vpack.c.bf16 %v1331_v50, %v1330_v0  ;;  %v1365_v0 = vld [vmem:[%s5295_s1 + $0x3f8] sm:$0xff]  ;;  %v1366_v50 = vld [vmem:[%s5295_s1 + $0x400] sm:$0xff] }
  0x80   : > { %1507 = vmatmul.mubr.f32.gmra.mrb[24].mxu1 %v4418_v42  ;;  %3495 = vmatprep.subr.bf16.mxu1 %v5300_v3  ;;  %v4579_v1 = vpack.c.bf16 %v1367_v55, %v1366_v50  ;;  %v4611_v50 = vld [vmem:[#allocation2 + $0xe2] sm:$0xff] }
  0x81   : > { %1732 = vmatmul.mubr.f32.gmra.mrb[24].mxu0 %v4488_v52  ;;  %1511 = vmatprep.mubr.f32.mxu1 %v4037_v4  ;;  %5357 = vst [vmem:[#allocation17_spill] sm:$0xff] %v4611_v50  ;;  %v4613_v55 = vld [vmem:[#allocation2 + $0x108] sm:$0xff] }
  0x82   : > { %1736 = vmatprep.mubr.f32.mxu0 %v4490_v56  ;;  %3393 = vmatpush1.bf16.msra.mxu0 %v3392_v25  ;;  %v4538_v25 = vld [vmem:[#allocation2 + $0xaa] sm:$0xff] }
  0x83   : > { %3394 = vmatprep.subr.bf16.mxu0 %v5300_v3  ;;  %3511 = vmatpush1.bf16.msra.mxu1 %v4500_v6  ;;  %5349 = vst [vmem:[#allocation10_spill] sm:$0xff] %v4538_v25 }
  0x84   : > { %1512 = vmatmul.mubr.f32.gmra.mrb[26].mxu1 %v4442_v11  ;;  %3496 = vmatprep.subr.bf16.mxu1 %v5300_v3 }
  0x85   : > { %1737 = vmatmul.mubr.f32.gmra.mrb[26].mxu0 %v4513_v17  ;;  %1516 = vmatprep.mubr.f32.mxu1 %v4048_v10 }
  0x86   : > { %1741 = vmatprep.mubr.f32.mxu0 %v4515_v54  ;;  %3396 = vmatpush1.bf16.msra.mxu0 %v3395_v46  ;;  %v1364_v46 = vld [vmem:[%s5295_s1 + $0x3f0] sm:$0xff] }
  0x87   : > { %3397 = vmatprep.subr.bf16.mxu0 %v5300_v3  ;;  %3512 = vmatpush1.bf16.msra.mxu1 %v4525_v35  ;;  %v5352_v35 = vmov 0.0|0.0   ;;  %v4575_v6 = vpack.c.bf16 %v1365_v0, %v1364_v46  ;;  %v4597_v46 = vld [vmem:[#allocation2 + $0xf0] sm:$0xff]  ;;  %v4605_v0 = vld [vmem:[#allocation2 + $0xf8] sm:$0xff] }
  0x88   : > { %1517 = vmatmul.mubr.f32.gmra.mrb[28].mxu1 %v4466_v30  ;;  %3497 = vmatprep.subr.bf16.mxu1 %v5300_v3  ;;  %v3401_v3 = vpack.c.bf16 %v1333_v16, %v1332_v62  ;;  %v4586_v62 = vld [vmem:[#allocation2 + $0xe0] sm:$0xff]  ;;  %v4595_v16 = vld [vmem:[#allocation2 + $0xca] sm:$0xff] }
  0x89   : > { %1742 = vmatmul.mubr.f32.gmra.mrb[28].mxu0 %v4538_v25  ;;  %1521 = vmatprep.mubr.f32.mxu1 %v4080_v23  ;;  %5353 = vst [vmem:[#allocation13_spill] sm:$0xff] %v4575_v6  ;;  %5355 = vst [vmem:[#allocation15_spill] sm:$0xff] %v4595_v16  ;;  %v4653_v25 = vld [vmem:[#allocation2 + $0x140] sm:$0xff] }
  0x8a   : > { %1746 = vmatprep.mubr.f32.mxu0 %v4540_v5  ;;  %3399 = vmatpush1.bf16.msra.mxu0 %v3398_v8  ;;  %v4584_v8 = vld [vmem:[#allocation2 + $0xc2] sm:$0xff]  ;;  %5367 = vst [vmem:[#allocation27_spill] sm:$0xff] %v4653_v25 }
  0x8b   : > { %3400 = vmatprep.subr.bf16.mxu0 %v5352_v35  ;;  %3513 = vmatpush1.bf16.msra.mxu1 %v4550_v61  ;;  %5354 = vst [vmem:[#allocation14_spill] sm:$0xff] %v4584_v8  ;;  %v4621_v61 = vld [vmem:[#allocation2 + $0x110] sm:$0xff] }
  0x8c   : > { %1522 = vmatmul.mubr.f32.gmra.mrb[30].mxu1 %v4490_v56  ;;  %3498 = vmatprep.subr.bf16.mxu1 %v5352_v35  ;;  %5359 = vst [vmem:[#allocation19_spill] sm:$0xff] %v4621_v61 }
  0x8d   : > { %1747 = vmatmul.mubr.f32.gmra.mrb[30].mxu0 %v4569_v44  ;;  %1526 = vmatprep.mubr.f32.mxu1 %v4091_v26  ;;  %v4645_v44 = vld [vmem:[#allocation2 + $0x138] sm:$0xff] }
  0x8e   : > { %1751 = vmatprep.mubr.f32.mxu0 %v4571_v51  ;;  %3402 = vmatpush1.bf16.msra.mxu0 %v3401_v3  ;;  %v4603_v3 = vld [vmem:[#allocation2 + $0xda] sm:$0xff]  ;;  %5365 = vst [vmem:[#allocation25_spill] sm:$0xff] %v4645_v44 }
  0x8f   : > { %3514 = vmatpush1.bf16.msra.mxu1 %v4575_v6  ;;  %3403 = vmatprep.subr.bf16.mxu0 %v5352_v35  ;;  %5356 = vst [vmem:[#allocation16_spill] sm:$0xff] %v4603_v3  ;;  %v4619_v6 = vld [vmem:[#allocation2 + $0xf2] sm:$0xff] }
  0x90   : > { %1527 = vmatmul.mubr.f32.gmra.mrb[32].mxu1 %v4515_v54  ;;  %3452 = vmatprep.subr.bf16.mxu1 %v4579_v1  ;;  %5358 = vst [vmem:[#allocation18_spill] sm:$0xff] %v4619_v6 }
  0x91   : > { %1752 = vmatmul.mubr.f32.gmra.mrb[32].mxu0 %v4584_v8  ;;  %1531 = vmatprep.mubr.f32.mxu1 %v4095_v27  ;;  %v4637_v8 = vld [vmem:[#allocation2 + $0x128] sm:$0xff] }
  0x92   : > { %1756 = vmatprep.mubr.f32.mxu0 %v4586_v62  ;;  %5363 = vst [vmem:[#allocation23_spill] sm:$0xff] %v4637_v8 }
  0x94   : > { %1532 = vmatmul.mubr.f32.gmra.mrb[34].mxu1 %v4540_v5 }
  0x95   : > { %1757 = vmatmul.mubr.f32.gmra.mrb[34].mxu0 %v4595_v16  ;;  %1536 = vmatprep.mubr.f32.mxu1 %v4099_v29  ;;  %v4629_v16 = vld [vmem:[#allocation2 + $0x120] sm:$0xff] }
  0x96   : > { %1761 = vmatprep.mubr.f32.mxu0 %v4597_v46  ;;  %5361 = vst [vmem:[#allocation21_spill] sm:$0xff] %v4629_v16 }
  0x98   : > { %1537 = vmatmul.mubr.f32.gmra.mrb[36].mxu1 %v4571_v51 }
  0x99   : > { %1762 = vmatmul.mubr.f32.gmra.mrb[36].mxu0 %v4603_v3  ;;  %1541 = vmatprep.mubr.f32.mxu1 %v4110_v33  ;;  %v4627_v3 = vld [vmem:[#allocation2 + $0xfa] sm:$0xff] }
  0x9a   : > { %1766 = vmatprep.mubr.f32.mxu0 %v4605_v0  ;;  %5360 = vst [vmem:[#allocation20_spill] sm:$0xff] %v4627_v3 }
  0x9c   : > { %1542 = vmatmul.mubr.f32.gmra.mrb[38].mxu1 %v4586_v62 }
  0x9d   : > { %1767 = vmatmul.mubr.f32.gmra.mrb[38].mxu0 %v4611_v50  ;;  %1546 = vmatprep.mubr.f32.mxu1 %v4121_v36  ;;  %v4635_v50 = vld [vmem:[#allocation2 + $0x10a] sm:$0xff] }
  0x9e   : > { %1771 = vmatprep.mubr.f32.mxu0 %v4613_v55  ;;  %5362 = vst [vmem:[#allocation22_spill] sm:$0xff] %v4635_v50 }
  0xa0   : > { %1547 = vmatmul.mubr.f32.gmra.mrb[40].mxu1 %v4597_v46 }
  0xa1   : > { %1772 = vmatmul.mubr.f32.gmra.mrb[40].mxu0 %v4619_v6  ;;  %1551 = vmatprep.mubr.f32.mxu1 %v4125_v37  ;;  %v4643_v6 = vld [vmem:[#allocation2 + $0x112] sm:$0xff] }
  0xa2   : > { %1776 = vmatprep.mubr.f32.mxu0 %v4621_v61  ;;  %5364 = vst [vmem:[#allocation24_spill] sm:$0xff] %v4643_v6 }
  0xa4   : > { %1552 = vmatmul.mubr.f32.gmra.mrb[42].mxu1 %v4605_v0 }
  0xa5   : > { %1777 = vmatmul.mubr.f32.gmra.mrb[42].mxu0 %v4627_v3  ;;  %1556 = vmatprep.mubr.f32.mxu1 %v4129_v39  ;;  %v4651_v3 = vld [vmem:[#allocation2 + $0x122] sm:$0xff] }
  0xa6   : > { %1781 = vmatprep.mubr.f32.mxu0 %v4629_v16  ;;  %5366 = vst [vmem:[#allocation26_spill] sm:$0xff] %v4651_v3 }
  0xa8   : > { %1557 = vmatmul.mubr.f32.gmra.mrb[44].mxu1 %v4613_v55 }
  0xa9   : > { %1782 = vmatmul.mubr.f32.gmra.mrb[44].mxu0 %v4635_v50  ;;  %1561 = vmatprep.mubr.f32.mxu1 %v4147_v48  ;;  %v4659_v50 = vld [vmem:[#allocation2 + $0x12a] sm:$0xff] }
  0xaa   : > { %1786 = vmatprep.mubr.f32.mxu0 %v4637_v8  ;;  %5368 = vst [vmem:[#allocation28_spill] sm:$0xff] %v4659_v50 }
  0xac   : > { %1562 = vmatmul.mubr.f32.gmra.mrb[46].mxu1 %v4621_v61  ;;  %v4661_v61 = vld [vmem:[#allocation2 + $0x150] sm:$0xff] }
  0xad   : > { %1787 = vmatmul.mubr.f32.gmra.mrb[46].mxu0 %v4643_v6  ;;  %1566 = vmatprep.mubr.f32.mxu1 %v4165_v60  ;;  %5369 = vst [vmem:[#allocation29_spill] sm:$0xff] %v4661_v61  ;;  %v4667_v6 = vld [vmem:[#allocation2 + $0x13a] sm:$0xff] }
  0xae   : > { %1791 = vmatprep.mubr.f32.mxu0 %v4645_v44  ;;  %5370 = vst [vmem:[#allocation30_spill] sm:$0xff] %v4667_v6 }
  0xb0   : > { %1567 = vmatmul.mubr.f32.gmra.mrb[48].mxu1 %v4629_v16  ;;  %v4669_v16 = vld [vmem:[#allocation2 + $0x158] sm:$0xff] }
  0xb1   : > { %1792 = vmatmul.mubr.f32.gmra.mrb[48].mxu0 %v4651_v3  ;;  %1571 = vmatprep.mubr.f32.mxu1 %v4176_v7  ;;  %v4675_v3 = vld [vmem:[#allocation2 + $0x142] sm:$0xff] }
  0xb2   : > { %1796 = vmatprep.mubr.f32.mxu0 %v4653_v25  ;;  %5371 = vst [vmem:[#allocation31_spill] sm:$0xff] %v4675_v3 }
  0xb4   : > { %1572 = vmatmul.mubr.f32.gmra.mrb[50].mxu1 %v4637_v8  ;;  %v4677_v8 = vld [vmem:[#allocation2 + $0x168] sm:$0xff] }
  0xb5   : > { %1797 = vmatmul.mubr.f32.gmra.mrb[50].mxu0 %v4659_v50  ;;  %1576 = vmatprep.mubr.f32.mxu1 %v4187_v12  ;;  %v4683_v50 = vld [vmem:[#allocation2 + $0x152] sm:$0xff] }
  0xb6   : > { %1801 = vmatprep.mubr.f32.mxu0 %v4661_v61  ;;  %5372 = vst [vmem:[#allocation32_spill] sm:$0xff] %v4683_v50 }
  0xb8   : > { %1577 = vmatmul.mubr.f32.gmra.mrb[52].mxu1 %v4645_v44  ;;  %v4685_v44 = vld [vmem:[#allocation2 + $0x170] sm:$0xff] }
  0xb9   : > { %1802 = vmatmul.mubr.f32.gmra.mrb[52].mxu0 %v4667_v6  ;;  %1581 = vmatprep.mubr.f32.mxu1 %v4192_v15  ;;  %v4691_v6 = vld [vmem:[#allocation2 + $0x15a] sm:$0xff] }
  0xba   : > { %1806 = vmatprep.mubr.f32.mxu0 %v4669_v16  ;;  %5373 = vst [vmem:[#allocation33_spill] sm:$0xff] %v4691_v6 }
  0xbc   : > { %1582 = vmatmul.mubr.f32.gmra.mrb[54].mxu1 %v4653_v25  ;;  %v4693_v25 = vld [vmem:[#allocation2 + $0x180] sm:$0xff] }
  0xbd   : > { %1807 = vmatmul.mubr.f32.gmra.mrb[54].mxu0 %v4675_v3  ;;  %1586 = vmatprep.mubr.f32.mxu1 %v4203_v18  ;;  %5374 = vst [vmem:[#allocation34_spill] sm:$0xff] %v4693_v25  ;;  %v4699_v3 = vld [vmem:[#allocation2 + $0x16a] sm:$0xff] }
  0xbe   : > { %1811 = vmatprep.mubr.f32.mxu0 %v4677_v8  ;;  %5375 = vst [vmem:[#allocation35_spill] sm:$0xff] %v4699_v3 }
  0xc0   : > { %1587 = vmatmul.mubr.f32.gmra.mrb[56].mxu1 %v4661_v61  ;;  %v4701_v61 = vld [vmem:[#allocation2 + $0x188] sm:$0xff] }
  0xc1   : > { %1812 = vmatmul.mubr.f32.gmra.mrb[56].mxu0 %v4683_v50  ;;  %1591 = vmatprep.mubr.f32.mxu1 %v4213_v21  ;;  %5376 = vst [vmem:[#allocation36_spill] sm:$0xff] %v4701_v61  ;;  %v4707_v50 = vld [vmem:[#allocation2 + $0x172] sm:$0xff] }
  0xc2   : > { %1816 = vmatprep.mubr.f32.mxu0 %v4685_v44  ;;  %5377 = vst [vmem:[#allocation37_spill] sm:$0xff] %v4707_v50 }
  0xc4   : > { %1592 = vmatmul.mubr.f32.gmra.mrb[58].mxu1 %v4669_v16 }
  0xc5   : > { %1817 = vmatmul.mubr.f32.gmra.mrb[58].mxu0 %v4691_v6  ;;  %1596 = vmatprep.mubr.f32.mxu1 %v4227_v34  ;;  %v1368_v6 = vld [vmem:[%s5295_s1 + $0x410] sm:$0xff] }
  0xc6   : > { %1821 = vmatprep.mubr.f32.mxu0 %v4693_v25  ;;  %v3677_v25 = vld [vmem:[#allocation2 + $0x19] sm:$0xff] }
  0xc8   : > { %1597 = vmatmul.mubr.f32.gmra.mrb[60].mxu1 %v4677_v8 }
  0xc9   : > { %1822 = vmatmul.mubr.f32.gmra.mrb[60].mxu0 %v4699_v3  ;;  %1601 = vmatprep.mubr.f32.mxu1 %v4238_v40  ;;  %v1369_v3 = vld [vmem:[%s5295_s1 + $0x418] sm:$0xff] }
  0xca   : > { %1826 = vmatprep.mubr.f32.mxu0 %v4701_v61  ;;  %v3455_v61 = vpack.c.bf16 %v1369_v3, %v1368_v6  ;;  %v5390_v6 = vld [vmem:[#allocation27_spill] sm:$0xff]  ;;  %v5397_v3 = vld [vmem:[#allocation5_spill] sm:$0xff] }
  0xcc   : > { %1602 = vmatmul.mubr.f32.gmra.mrb[62].mxu1 %v4685_v44 }
  0xcd   : > { %1827 = vmatmul.mubr.f32.gmra.mrb[62].mxu0 %v4707_v50  ;;  %2161 = vmatprep.mubr.f32.mxu1 %v4031_v2  ;;  %v1370_v2 = vld [vmem:[%s5295_s1 + $0x420] sm:$0xff]  ;;  %v1371_v50 = vld [vmem:[%s5295_s1 + $0x428] sm:$0xff] }
  0xce   : > { %1896 = vmatprep.mubr.f32.mxu0 %v4264_v58  ;;  %v3678_v58 = vld [vmem:[#allocation2 + $0x21] sm:$0xff] }
  0xd0   : > { %2162 = vmatmul.mubr.f32.vlgmr.msra.gmra.mrb[64].mxu1 %v4418_v42  ;;  %v1372_v42 = vld [vmem:[%s5295_s1 + $0x430] sm:$0xff] }
  0xd1   : > { %1897 = vmatmul.mubr.f32.vlgmr.msra.gmra.mrb[0].mxu0 %v3677_v25  ;;  %2166 = vmatprep.mubr.f32.mxu1 %v4037_v4  ;;  %v3459_v4 = vpack.c.bf16 %v1371_v50, %v1370_v2  ;;  %v5393_v25 = vld [vmem:[#allocation29_spill] sm:$0xff]  ;;  %v5400_v50 = vld [vmem:[#allocation6_spill] sm:$0xff]  ;;  %v5402_v2 = vld [vmem:[#allocation36_spill] sm:$0xff] }
  0xd2   : > { %3405 = vmatpush1.bf16.msra.mxu0 %v4224_v32  ;;  %1901 = vmatprep.mubr.f32.mxu0 %v4290_v13  ;;  %v1373_v32 = vld [vmem:[%s5295_s1 + $0x438] sm:$0xff] }
  0xd3   : > { %3406 = vmatprep.subr.bf16.mxu0 %v5352_v35  ;;  %3454 = vmatpush3.bf16.msra.mxu1 %v4579_v1  ;;  %v3463_v13 = vpack.c.bf16 %v1373_v32, %v1372_v42  ;;  %v1380_v1 = vld [vmem:[%s5295_s1 + $0x470] sm:$0xff]  ;;  %v3094_v42 = vld [vmem:[#allocation2 + $0x1a1] sm:$0xff] }
  0xd4   : > { %2167 = vmatmul.mubr.f32.gmra.mrb[66].mxu1 %v4442_v11  ;;  %3456 = vmatprep.subr.bf16.mxu1 %v3455_v61  ;;  %v1374_v11 = vld [vmem:[%s5295_s1 + $0x440] sm:$0xff] }
  0xd5   : > { %1902 = vmatmul.mubr.f32.gmra.mrb[2].mxu0 %v3678_v58  ;;  %2171 = vmatprep.mubr.f32.mxu1 %v4048_v10  ;;  %v3679_v10 = vld [vmem:[#allocation2 + $0x31] sm:$0xff] }
  0xd6   : > { %1906 = vmatprep.mubr.f32.mxu0 %v4311_v22  ;;  %3408 = vmatpush1.bf16.msra.mxu0 %v4249_v49  ;;  %v1375_v22 = vld [vmem:[%s5295_s1 + $0x448] sm:$0xff]  ;;  %v5403_v58 = vld [vmem:[#allocation26_spill] sm:$0xff] }
  0xd7   : > { %3409 = vmatprep.subr.bf16.mxu0 %v5352_v35  ;;  %3458 = vmatpush3.bf16.msra.mxu1 %v3455_v61  ;;  %v3467_v49 = vpack.c.bf16 %v1375_v22, %v1374_v11  ;;  %v1376_v61 = vld [vmem:[%s5295_s1 + $0x450] sm:$0xff]  ;;  %v3700_v11 = vld [vmem:[#allocation2 + $0x121] sm:$0xff] }
  0xd8   : > { %2172 = vmatmul.mubr.f32.gmra.mrb[68].mxu1 %v4466_v30  ;;  %3460 = vmatprep.subr.bf16.mxu1 %v3459_v4  ;;  %v1378_v30 = vld [vmem:[%s5295_s1 + $0x460] sm:$0xff]  ;;  %v5404_v22 = vld [vmem:[#allocation28_spill] sm:$0xff] }
  0xd9   : > { %1907 = vmatmul.mubr.f32.gmra.mrb[4].mxu0 %v3679_v10  ;;  %2176 = vmatprep.mubr.f32.mxu1 %v4080_v23  ;;  %v3680_v23 = vld [vmem:[#allocation2 + $0x39] sm:$0xff] }
  0xda   : > { %1911 = vmatprep.mubr.f32.mxu0 %v4332_v38  ;;  %3411 = vmatpush1.bf16.msra.mxu0 %v4277_v43  ;;  %v1377_v38 = vld [vmem:[%s5295_s1 + $0x458] sm:$0xff] }
  0xdb   : > { %3412 = vmatprep.subr.bf16.mxu0 %v5352_v35  ;;  %3462 = vmatpush3.bf16.msra.mxu1 %v3459_v4  ;;  %v3471_v43 = vpack.c.bf16 %v1377_v38, %v1376_v61  ;;  %v3698_v4 = vld [vmem:[#allocation2 + $0x111] sm:$0xff]  ;;  %v3701_v38 = vld [vmem:[#allocation2 + $0x129] sm:$0xff] }
  0xdc   : > { %2177 = vmatmul.mubr.f32.gmra.mrb[70].mxu1 %v4490_v56  ;;  %3464 = vmatprep.subr.bf16.mxu1 %v3463_v13  ;;  %v5389_v56 = vld [vmem:[#allocation11_spill] sm:$0xff] }
  0xdd   : > { %1912 = vmatmul.mubr.f32.gmra.mrb[6].mxu0 %v3680_v23  ;;  %2181 = vmatprep.mubr.f32.mxu1 %v4091_v26  ;;  %v3681_v26 = vld [vmem:[#allocation2 + $0x49] sm:$0xff] }
  0xde   : > { %1916 = vmatprep.mubr.f32.mxu0 %v4353_v57  ;;  %3414 = vmatpush1.bf16.msra.mxu0 %v4300_v19  ;;  %v1379_v57 = vld [vmem:[%s5295_s1 + $0x468] sm:$0xff] }
  0xdf   : > { %3415 = vmatprep.subr.bf16.mxu0 %v5352_v35  ;;  %3466 = vmatpush3.bf16.msra.mxu1 %v3463_v13  ;;  %v3475_v19 = vpack.c.bf16 %v1379_v57, %v1378_v30  ;;  %v4856_v13 = vld [vmem:[#allocation2] sm:$0xff]  ;;  %v3097_v30 = vld [vmem:[#allocation2 + $0x4a] sm:$0xff] }
  0xe0   : > { %2182 = vmatmul.mubr.f32.gmra.mrb[72].mxu1 %v4515_v54  ;;  %3468 = vmatprep.subr.bf16.mxu1 %v3467_v49  ;;  %v5392_v54 = vld [vmem:[#allocation13_spill] sm:$0xff]  ;;  %363 = vst [vmem:[%s4967_s21] sm:$0x1] %v4856_v13  ;;  %364 = vst [vmem:[%s4973_s24] sm:$0x1] %v4856_v13 }
  0xe1   : > { %1917 = vmatmul.mubr.f32.gmra.mrb[8].mxu0 %v3681_v26  ;;  %2186 = vmatprep.mubr.f32.mxu1 %v4095_v27  ;;  %v3682_v27 = vld [vmem:[#allocation2 + $0x51] sm:$0xff] }
  0xe2   : > { %1921 = vmatprep.mubr.f32.mxu0 %v4374_v14  ;;  %3417 = vmatpush1.bf16.msra.mxu0 %v4321_v31  ;;  %v1381_v14 = vld [vmem:[%s5295_s1 + $0x478] sm:$0xff] }
  0xe3   : > { %3418 = vmatprep.subr.bf16.mxu0 %v5352_v35  ;;  %3470 = vmatpush3.bf16.msra.mxu1 %v3467_v49  ;;  %v3479_v31 = vpack.c.bf16 %v1381_v14, %v1380_v1  ;;  %v3095_v49 = vld [vmem:[#allocation2 + $0x32] sm:$0xff]  ;;  %v5406_v14 = vld [vmem:[#allocation31_spill] sm:$0xff] }
  0xe4   : > { %2187 = vmatmul.mubr.f32.gmra.mrb[74].mxu1 %v4540_v5  ;;  %3472 = vmatprep.subr.bf16.mxu1 %v3471_v43  ;;  %v3693_v5 = vld [vmem:[#allocation2 + $0xd9] sm:$0xff] }
  0xe5   : > { %1922 = vmatmul.mubr.f32.gmra.mrb[10].mxu0 %v3682_v27  ;;  %2191 = vmatprep.mubr.f32.mxu1 %v4099_v29  ;;  %v3683_v29 = vld [vmem:[#allocation2 + $0x61] sm:$0xff]  ;;  %v5405_v26 = vld [vmem:[#allocation30_spill] sm:$0xff] }
  0xe6   : > { %1926 = vmatprep.mubr.f32.mxu0 %v4395_v28  ;;  %3420 = vmatpush1.bf16.msra.mxu0 %v4342_v47  ;;  %v3684_v47 = vld [vmem:[#allocation2 + $0x69] sm:$0xff]  ;;  %v3702_v27 = vld [vmem:[#allocation2 + $0x139] sm:$0xff] }
  0xe7   : > { %3421 = vmatprep.subr.bf16.mxu0 %v5352_v35  ;;  %3474 = vmatpush3.bf16.msra.mxu1 %v3471_v43  ;;  %v5381_v28 = vld [vmem:[#allocation21_spill] sm:$0xff]  ;;  %v3096_v43 = vld [vmem:[#allocation2 + $0x3a] sm:$0xff] }
  0xe8   : > { %2192 = vmatmul.mubr.f32.gmra.mrb[76].mxu1 %v4571_v51  ;;  %3476 = vmatprep.subr.bf16.mxu1 %v3475_v19  ;;  %v5378_v51 = vld [vmem:[#allocation19_spill] sm:$0xff]  ;;  %v3098_v1 = vld [vmem:[#allocation2 + $0x52] sm:$0xff] }
  0xe9   : > { %1927 = vmatmul.mubr.f32.gmra.mrb[12].mxu0 %v3683_v29  ;;  %2196 = vmatprep.mubr.f32.mxu1 %v4110_v33  ;;  %v3685_v33 = vld [vmem:[#allocation2 + $0x79] sm:$0xff] }
  0xea   : > { %1931 = vmatprep.mubr.f32.mxu0 %v4416_v45  ;;  %3423 = vmatpush1.bf16.msra.mxu0 %v4363_v9  ;;  %v5379_v9 = vld [vmem:[#allocation10_spill] sm:$0xff]  ;;  %v5383_v45 = vld [vmem:[#allocation8_spill] sm:$0xff] }
  0xeb   : > { %3424 = vmatprep.subr.bf16.mxu0 %v5352_v35  ;;  %3478 = vmatpush3.bf16.msra.mxu1 %v3475_v19 }
  0xec   : > { %2197 = vmatmul.mubr.f32.gmra.mrb[78].mxu1 %v4586_v62  ;;  %3480 = vmatprep.subr.bf16.mxu1 %v3479_v31  ;;  %v5395_v62 = vld [vmem:[#allocation18_spill] sm:$0xff] }
  0xed   : > { %1932 = vmatmul.mubr.f32.gmra.mrb[14].mxu0 %v3684_v47  ;;  %2201 = vmatprep.mubr.f32.mxu1 %v4121_v36  ;;  %v3686_v36 = vld [vmem:[#allocation2 + $0x81] sm:$0xff] }
  0xee   : > { %1936 = vmatprep.mubr.f32.mxu0 %v4440_v53  ;;  %3426 = vmatpush1.bf16.msra.mxu0 %v4384_v20  ;;  %v5380_v20 = vld [vmem:[#allocation7_spill] sm:$0xff]  ;;  %v5385_v53 = vld [vmem:[#allocation14_spill] sm:$0xff] }
  0xef   : > { %3427 = vmatprep.subr.bf16.mxu0 %v5352_v35  ;;  %3482 = vmatpush3.bf16.msra.mxu1 %v3479_v31  ;;  %v3099_v31 = vld [vmem:[#allocation2 + $0x62] sm:$0xff] }
  0xf0   : > { %2202 = vmatmul.mubr.f32.gmra.mrb[80].mxu1 %v4597_v46  ;;  %v5396_v46 = vld [vmem:[#allocation20_spill] sm:$0xff] }
  0xf1   : > { %1937 = vmatmul.mubr.f32.gmra.mrb[16].mxu0 %v3685_v33  ;;  %2206 = vmatprep.mubr.f32.mxu1 %v4125_v37  ;;  %v3687_v37 = vld [vmem:[#allocation2 + $0x91] sm:$0xff]  ;;  %v3703_v33 = vld [vmem:[#allocation2 + $0x141] sm:$0xff] }
  0xf2   : > { %1941 = vmatprep.mubr.f32.mxu0 %v4464_v24  ;;  %3429 = vmatpush1.bf16.msra.mxu0 %v4405_v41  ;;  %v5382_v41 = vld [vmem:[#allocation12_spill] sm:$0xff]  ;;  %v5387_v24 = vld [vmem:[#allocation25_spill] sm:$0xff] }
  0xf3   : > { %3430 = vmatprep.subr.bf16.mxu0 %v5352_v35 }
  0xf4   : > { %2207 = vmatmul.mubr.f32.gmra.mrb[82].mxu1 %v4605_v0  ;;  %v5399_v0 = vld [vmem:[#allocation34_spill] sm:$0xff] }
  0xf5   : > { %1942 = vmatmul.mubr.f32.gmra.mrb[18].mxu0 %v3686_v36  ;;  %2211 = vmatprep.mubr.f32.mxu1 %v4129_v39  ;;  %v3688_v39 = vld [vmem:[#allocation2 + $0x99] sm:$0xff]  ;;  %v3100_v36 = vld [vmem:[#allocation2 + $0x6a] sm:$0xff] }
  0xf6   : > { %1946 = vmatprep.mubr.f32.mxu0 %v4488_v52  ;;  %3432 = vmatpush1.bf16.msra.mxu0 %v4428_v59  ;;  %v5384_v59 = vld [vmem:[#allocation23_spill] sm:$0xff] }
  0xf7   : > { %3433 = vmatprep.subr.bf16.mxu0 %v5352_v35  ;;  %v5388_v52 = vld [vmem:[#allocation15_spill] sm:$0xff] }
  0xf8   : > { %2212 = vmatmul.mubr.f32.gmra.mrb[84].mxu1 %v4613_v55  ;;  %v3093_v55 = vld [vmem:[#allocation2 + $0x199] sm:$0xff] }
  0xf9   : > { %1947 = vmatmul.mubr.f32.gmra.mrb[20].mxu0 %v3687_v37  ;;  %2216 = vmatprep.mubr.f32.mxu1 %v4147_v48  ;;  %v3689_v48 = vld [vmem:[#allocation2 + $0xa9] sm:$0xff] }
  0xfa   : > { %1951 = vmatprep.mubr.f32.mxu0 %v4513_v17  ;;  %3435 = vmatpush1.bf16.msra.mxu0 %v4452_v63  ;;  %v5386_v63 = vld [vmem:[#allocation9_spill] sm:$0xff]  ;;  %v5391_v17 = vld [vmem:[#allocation16_spill] sm:$0xff] }
  0xfb   : > { %3436 = vmatprep.subr.bf16.mxu0 %v5352_v35  ;;  %v5407_v37 = vld [vmem:[#allocation32_spill] sm:$0xff] }
  0xfc   : > { %2217 = vmatmul.mubr.f32.gmra.mrb[86].mxu1 %v5378_v51  ;;  %v3101_v51 = vld [vmem:[#allocation2 + $0x7a] sm:$0xff] }
  0xfd   : > { %1952 = vmatmul.mubr.f32.gmra.mrb[22].mxu0 %v3688_v39  ;;  %2221 = vmatprep.mubr.f32.mxu1 %v4165_v60  ;;  %v3690_v60 = vld [vmem:[#allocation2 + $0xb1] sm:$0xff] }
  0xfe   : > { %1956 = vmatprep.mubr.f32.mxu0 %v5379_v9  ;;  %3438 = vmatpush1.bf16.msra.mxu0 %v5380_v20  ;;  %v3704_v20 = vld [vmem:[#allocation2 + $0x151] sm:$0xff] }
  0xff   : > { %3439 = vmatprep.subr.bf16.mxu0 %v5352_v35 }
 0x100   : > { %2222 = vmatmul.mubr.f32.gmra.mrb[88].mxu1 %v5381_v28  ;;  %v3102_v28 = vld [vmem:[#allocation2 + $0x82] sm:$0xff] }
 0x101   : > { %1957 = vmatmul.mubr.f32.gmra.mrb[24].mxu0 %v3689_v48  ;;  %2226 = vmatprep.mubr.f32.mxu1 %v4176_v7  ;;  %v3691_v7 = vld [vmem:[#allocation2 + $0xc1] sm:$0xff]  ;;  %v5408_v48 = vld [vmem:[#allocation33_spill] sm:$0xff] }
 0x102   : > { %1961 = vmatprep.mubr.f32.mxu0 %v5382_v41  ;;  %3441 = vmatpush1.bf16.msra.mxu0 %v5383_v45  ;;  %v3103_v41 = vld [vmem:[#allocation2 + $0x92] sm:$0xff] }
 0x103   : > { %3442 = vmatprep.subr.bf16.mxu0 %v5352_v35 }
 0x104   : > { %2227 = vmatmul.mubr.f32.gmra.mrb[90].mxu1 %v5384_v59 }
 0x105   : > { %1962 = vmatmul.mubr.f32.gmra.mrb[26].mxu0 %v3690_v60  ;;  %2231 = vmatprep.mubr.f32.mxu1 %v4187_v12  ;;  %v3692_v12 = vld [vmem:[#allocation2 + $0xc9] sm:$0xff]  ;;  %v3705_v60 = vld [vmem:[#allocation2 + $0x159] sm:$0xff] }
 0x106   : > { %1966 = vmatprep.mubr.f32.mxu0 %v5385_v53  ;;  %3444 = vmatpush1.bf16.msra.mxu0 %v5386_v63  ;;  %v3104_v53 = vld [vmem:[#allocation2 + $0x9a] sm:$0xff] }
 0x107   : > { %3445 = vmatprep.subr.bf16.mxu0 %v5352_v35  ;;  %v5409_v63 = vld [vmem:[#allocation35_spill] sm:$0xff] }
 0x108   : > { %2232 = vmatmul.mubr.f32.gmra.mrb[92].mxu1 %v5387_v24  ;;  %v3105_v24 = vld [vmem:[#allocation2 + $0xaa] sm:$0xff] }
 0x109   : > { %1967 = vmatmul.mubr.f32.gmra.mrb[28].mxu0 %v3691_v7  ;;  %2236 = vmatprep.mubr.f32.mxu1 %v4192_v15  ;;  %v5394_v15 = vld [vmem:[#allocation17_spill] sm:$0xff] }
 0x10a   : > { %1971 = vmatprep.mubr.f32.mxu0 %v5388_v52  ;;  %3447 = vmatpush1.bf16.msra.mxu0 %v5389_v56  ;;  %v3706_v56 = vld [vmem:[#allocation2 + $0x169] sm:$0xff] }
 0x10b   : > { %3448 = vmatprep.subr.bf16.mxu0 %v5352_v35  ;;  %v3694_v35 = vld [vmem:[#allocation2 + $0xe1] sm:$0xff] }
 0x10c   : > { %2237 = vmatmul.mubr.f32.gmra.mrb[94].mxu1 %v5390_v6  ;;  %v3106_v6 = vld [vmem:[#allocation2 + $0xb2] sm:$0xff] }
 0x10d   : > { %1972 = vmatmul.mubr.f32.gmra.mrb[30].mxu0 %v3692_v12  ;;  %2241 = vmatprep.mubr.f32.mxu1 %v4203_v18  ;;  %v3695_v18 = vld [vmem:[#allocation2 + $0xf1] sm:$0xff] }
 0x10e   : > { %1976 = vmatprep.mubr.f32.mxu0 %v5391_v17  ;;  %3450 = vmatpush1.bf16.msra.mxu0 %v5392_v54  ;;  %v5410_v12 = vld [vmem:[#allocation37_spill] sm:$0xff]  ;;  %v3107_v17 = vld [vmem:[#allocation2 + $0xc2] sm:$0xff] }
 0x10f   : > { %v4879_v54 = vld [vmem:[#allocation2 + $0x182] sm:$0xff] }
 0x110   : > { %2242 = vmatmul.mubr.f32.gmra.mrb[96].mxu1 %v5393_v25 }
 0x111   : > { %1977 = vmatmul.mubr.f32.gmra.mrb[32].mxu0 %v3693_v5  ;;  %2246 = vmatprep.mubr.f32.mxu1 %v4213_v21  ;;  %v3696_v21 = vld [vmem:[#allocation2 + $0xf9] sm:$0xff] }
 0x112   : > { %1981 = vmatprep.mubr.f32.mxu0 %v5394_v15  ;;  %v3707_v15 = vld [vmem:[#allocation2 + $0x171] sm:$0xff] }
 0x114   : > { %2247 = vmatmul.mubr.f32.gmra.mrb[98].mxu1 %v4669_v16  ;;  %v5398_v16 = vld [vmem:[#allocation22_spill] sm:$0xff] }
 0x115   : > { %1982 = vmatmul.mubr.f32.gmra.mrb[34].mxu0 %v3694_v35  ;;  %2251 = vmatprep.mubr.f32.mxu1 %v4227_v34  ;;  %v3697_v34 = vld [vmem:[#allocation2 + $0x109] sm:$0xff] }
 0x116   : > { %1986 = vmatprep.mubr.f32.mxu0 %v5395_v62  ;;  %v3108_v35 = vld [vmem:[#allocation2 + $0xca] sm:$0xff]  ;;  %v3109_v62 = vld [vmem:[#allocation2 + $0xda] sm:$0xff] }
 0x118   : > { %2252 = vmatmul.mubr.f32.gmra.mrb[100].mxu1 %v4677_v8  ;;  %v5401_v8 = vld [vmem:[#allocation24_spill] sm:$0xff] }
 0x119   : > { %1987 = vmatmul.mubr.f32.gmra.mrb[36].mxu0 %v3695_v18  ;;  %2256 = vmatprep.mubr.f32.mxu1 %v4238_v40  ;;  %v4884_v18 = vld [vmem:[#allocation2 + $0x18a] sm:$0xff] }
 0x11a   : > { %1991 = vmatprep.mubr.f32.mxu0 %v5396_v46 }
 0x11c   : > { %2257 = vmatmul.mubr.f32.gmra.mrb[102].mxu1 %v4685_v44 }
 0x11d   : > { %1992 = vmatmul.mubr.f32.gmra.mrb[38].mxu0 %v3696_v21  ;;  %2261 = vmatprep.mubr.f32.mxu1 %v5397_v3  ;;  %v3708_v3 = vld [vmem:[#allocation2 + $0x181] sm:$0xff] }
 0x11e   : > { %1996 = vmatprep.mubr.f32.mxu0 %v5398_v16 }
 0x120   : > { %2262 = vmatmul.mubr.f32.gmra.mrb[104].mxu1 %v5399_v0  ;;  %v3110_v0 = vld [vmem:[#allocation2 + $0xe2] sm:$0xff] }
 0x121   : > { %1997 = vmatmul.mubr.f32.gmra.mrb[40].mxu0 %v3697_v34  ;;  %2266 = vmatprep.mubr.f32.mxu1 %v5400_v50  ;;  %v3111_v34 = vld [vmem:[#allocation2 + $0xf2] sm:$0xff] }
 0x122   : > { %2001 = vmatprep.mubr.f32.mxu0 %v5401_v8  ;;  %v3063_v50 = vld [vmem:[#allocation2 + $0x31] sm:$0xff] }
 0x123   : > { %v4850_v40 = vpop.f32.mrb[0].mxu1 }
 0x124   : > { %2267 = vmatmul.mubr.f32.gmra.mrb[106].mxu1 %v5402_v2  ;;  %v1450_v44 = vpop.f32.mrb[1].mxu1 }
 0x125   : > { %2002 = vmatmul.mubr.f32.gmra.mrb[42].mxu0 %v3698_v4  ;;  %2271 = vmatprep.mubr.f32.mxu1 %v3093_v55  ;;  %v3709_v44 = vld [vmem:[#allocation2 + $0x189] sm:$0xff]  ;;  %v3112_v4 = vld [vmem:[#allocation2 + $0xfa] sm:$0xff] }
 0x126   : > { %2006 = vmatprep.mubr.f32.mxu0 %v5403_v58 }
 0x127   : > { %v4854_v32 = vpop.f32.mrb[2].mxu1 }
 0x128   : > { %2272 = vmatmul.mubr.f32.gmra.mrb[108].mxu1 %v4856_v13  ;;  %v1455_v10 = vpop.f32.mrb[3].mxu1 }
 0x129   : > { %2007 = vmatmul.mubr.f32.gmra.mrb[44].mxu0 %v3700_v11  ;;  %2276 = vmatprep.mubr.f32.mxu1 %v3094_v42  ;;  %v3031_v42 = vld [vmem:[#allocation2 + $0x30] sm:$0xff]  ;;  %v3064_v10 = vld [vmem:[#allocation2 + $0x39] sm:$0xff] }
 0x12a   : > { %2011 = vmatprep.mubr.f32.mxu0 %v5404_v22 }
 0x12b   : > { %v4860_v23 = vpop.f32.mrb[4].mxu1 }
 0x12c   : > { %2277 = vmatmul.mubr.f32.gmra.mrb[110].mxu1 %v4856_v13  ;;  %v1460_v61 = vpop.f32.mrb[5].mxu1 }
 0x12d   : > { %2012 = vmatmul.mubr.f32.gmra.mrb[46].mxu0 %v3701_v38  ;;  %3211 = vmatprep.mubr.f32.mxu1 %v3095_v49  ;;  %v3032_v61 = vld [vmem:[#allocation2 + $0x38] sm:$0xff]  ;;  %v3065_v38 = vld [vmem:[#allocation2 + $0x49] sm:$0xff] }
 0x12e   : > { %2016 = vmatprep.mubr.f32.mxu0 %v5405_v26 }
 0x12f   : > { %v4864_v57 = vpop.f32.mrb[6].mxu1 }
 0x130   : > { %3212 = vmatmul.mubr.f32.vlgmr.msra.gmra.mrb[112].mxu1 %v3096_v43  ;;  %v1465_v19 = vpop.f32.mrb[7].mxu1 }
 0x131   : > { %2017 = vmatmul.mubr.f32.gmra.mrb[48].mxu0 %v3702_v27  ;;  %3214 = vmatprep.mubr.f32.mxu1 %v3097_v30  ;;  %v3033_v19 = vld [vmem:[#allocation2 + $0x48] sm:$0xff]  ;;  %v3066_v27 = vld [vmem:[#allocation2 + $0x51] sm:$0xff] }
 0x132   : > { %2021 = vmatprep.mubr.f32.mxu0 %v5406_v14 }
 0x133   : > { %v4867_v29 = vpop.f32.mrb[8].mxu1 }
 0x134   : > { %3215 = vmatmul.mubr.f32.gmra.mrb[114].mxu1 %v3098_v1  ;;  %v1470_v47 = vpop.f32.mrb[9].mxu1 }
 0x135   : > { %2022 = vmatmul.mubr.f32.gmra.mrb[50].mxu0 %v3703_v33  ;;  %3217 = vmatprep.mubr.f32.mxu1 %v3099_v31  ;;  %v3067_v47 = vld [vmem:[#allocation2 + $0x61] sm:$0xff] }
 0x136   : > { %2026 = vmatprep.mubr.f32.mxu0 %v5407_v37 }
 0x137   : > { %v4870_v39 = vpop.f32.mrb[10].mxu1 }
 0x138   : > { %3218 = vmatmul.mubr.f32.gmra.mrb[116].mxu1 %v3100_v36  ;;  %v1475_v9 = vpop.f32.mrb[11].mxu1  ;;  %v3068_v36 = vld [vmem:[#allocation2 + $0x69] sm:$0xff] }
 0x139   : > { %2027 = vmatmul.mubr.f32.gmra.mrb[52].mxu0 %v3704_v20  ;;  %3220 = vmatprep.mubr.f32.mxu1 %v3101_v51  ;;  %v3069_v9 = vld [vmem:[#allocation2 + $0x79] sm:$0xff] }
 0x13a   : > { %2031 = vmatprep.mubr.f32.mxu0 %v5408_v48 }
 0x13b   : > { %v4873_v45 = vpop.f32.mrb[12].mxu1 }
 0x13c   : > { %3221 = vmatmul.mubr.f32.gmra.mrb[118].mxu1 %v3102_v28  ;;  %v1480_v59 = vpop.f32.mrb[13].mxu1  ;;  %v3125_v28 = vld [vmem:[#allocation2 + $0x19a] sm:$0xff] }
 0x13d   : > { %2032 = vmatmul.mubr.f32.gmra.mrb[54].mxu0 %v3705_v60  ;;  %3223 = vmatprep.mubr.f32.mxu1 %v3103_v41  ;;  %v3070_v41 = vld [vmem:[#allocation2 + $0x81] sm:$0xff] }
 0x13e   : > { %2036 = vmatprep.mubr.f32.mxu0 %v5409_v63  ;;  %v3126_v60 = vld [vmem:[#allocation2 + $0x1a2] sm:$0xff] }
 0x13f   : > { %v4876_v7 = vpop.f32.mrb[14].mxu1 }
 0x140   : > { %3224 = vmatmul.mubr.f32.gmra.mrb[120].mxu1 %v3104_v53  ;;  %v1485_v52 = vpop.f32.mrb[15].mxu1  ;;  %v3038_v53 = vld [vmem:[#allocation2 + $0x80] sm:$0xff] }
 0x141   : > { %2037 = vmatmul.mubr.f32.gmra.mrb[56].mxu0 %v3706_v56  ;;  %3226 = vmatprep.mubr.f32.mxu1 %v3105_v24 }
 0x142   : > { %2041 = vmatprep.mubr.f32.mxu0 %v5410_v12 }
 0x143   : > { %v4881_v25 = vpop.f32.mrb[16].mxu1 }
 0x144   : > { %3227 = vmatmul.mubr.f32.gmra.mrb[122].mxu1 %v3106_v6  ;;  %v1490_v5 = vpop.f32.mrb[17].mxu1 }
 0x145   : > { %2042 = vmatmul.mubr.f32.gmra.mrb[58].mxu0 %v3707_v15  ;;  %3229 = vmatprep.mubr.f32.mxu1 %v3107_v17 }
 0x146   : > { %2046 = vmatprep.mubr.f32.mxu0 %v4879_v54 }
 0x147   : > { %v4886_v46 = vpop.f32.mrb[18].mxu1 }
 0x148   : > { %3230 = vmatmul.mubr.f32.gmra.mrb[124].mxu1 %v3108_v35  ;;  %v1495_v21 = vpop.f32.mrb[19].mxu1 }
 0x149   : > { %2047 = vmatmul.mubr.f32.gmra.mrb[60].mxu0 %v3708_v3  ;;  %3232 = vmatprep.mubr.f32.mxu1 %v3109_v62 }
 0x14a   : > { %2051 = vmatprep.mubr.f32.mxu0 %v4884_v18 }
 0x14b   : > { %v4889_v55 = vpop.f32.mrb[20].mxu1 }
 0x14c   : > { %3233 = vmatmul.mubr.f32.gmra.mrb[126].mxu1 %v3110_v0  ;;  %v1500_v2 = vpop.f32.mrb[21].mxu1 }
 0x14d   : > { %2052 = vmatmul.mubr.f32.gmra.mrb[62].mxu0 %v3709_v44  ;;  %3235 = vmatprep.mubr.f32.mxu1 %v3111_v34 }
 0x14e   : > { %2121 = vmatprep.mubr.f32.mxu0 %v3063_v50 }
 0x14f   : > { %v4891_v11 = vpop.f32.mrb[22].mxu1 }
 0x150   : > { %3236 = vmatmul.mubr.f32.gmra.mrb[128].mxu1 %v3112_v4  ;;  %v1505_v49 = vpop.f32.mrb[23].mxu1 }
 0x151   : > { %2122 = vmatmul.mubr.f32.vlgmr.msra.gmra.mrb[0].mxu0 %v3031_v42  ;;  %3238 = vmatprep.mubr.f32.mxu1 %v5398_v16  ;;  %v3034_v16 = vld [vmem:[#allocation2 + $0x50] sm:$0xff] }
 0x152   : > { %2126 = vmatprep.mubr.f32.mxu0 %v3064_v10 }
 0x153   : > { %v4894_v43 = vpop.f32.mrb[24].mxu1 }
 0x154   : > { %3239 = vmatmul.mubr.f32.gmra.mrb[130].mxu1 %v5401_v8  ;;  %v1510_v30 = vpop.f32.mrb[25].mxu1 }
 0x155   : > { %2127 = vmatmul.mubr.f32.gmra.mrb[2].mxu0 %v3032_v61  ;;  %3241 = vmatprep.mubr.f32.mxu1 %v5403_v58  ;;  %v3035_v58 = vld [vmem:[#allocation2 + $0x60] sm:$0xff] }
 0x156   : > { %2131 = vmatprep.mubr.f32.mxu0 %v3065_v38 }
 0x157   : > { %v4898_v1 = vpop.f32.mrb[26].mxu1 }
 0x158   : > { %3242 = vmatmul.mubr.f32.gmra.mrb[132].mxu1 %v5404_v22  ;;  %v1515_v31 = vpop.f32.mrb[27].mxu1 }
 0x159   : > { %2132 = vmatmul.mubr.f32.gmra.mrb[4].mxu0 %v3033_v19  ;;  %3244 = vmatprep.mubr.f32.mxu1 %v5405_v26  ;;  %v3036_v26 = vld [vmem:[#allocation2 + $0x68] sm:$0xff] }
 0x15a   : > { %2136 = vmatprep.mubr.f32.mxu0 %v3066_v27 }
 0x15b   : > { %v4902_v33 = vpop.f32.mrb[28].mxu1 }
 0x15c   : > { %3245 = vmatmul.mubr.f32.gmra.mrb[134].mxu1 %v5406_v14  ;;  %v1520_v8 = vpop.f32.mrb[29].mxu1 }
 0x15d   : > { %2137 = vmatmul.mubr.f32.gmra.mrb[6].mxu0 %v3034_v16  ;;  %3247 = vmatprep.mubr.f32.mxu1 %v5407_v37  ;;  %v3037_v37 = vld [vmem:[#allocation2 + $0x78] sm:$0xff] }
 0x15e   : > { %2141 = vmatprep.mubr.f32.mxu0 %v3067_v47 }
 0x15f   : > { %v4906_v51 = vpop.f32.mrb[30].mxu1 }
 0x160   : > { %3248 = vmatmul.mubr.f32.gmra.mrb[136].mxu1 %v5408_v48  ;;  %v1525_v22 = vpop.f32.mrb[31].mxu1 }
 0x161   : > { %2142 = vmatmul.mubr.f32.gmra.mrb[8].mxu0 %v3035_v58  ;;  %3250 = vmatprep.mubr.f32.mxu1 %v5409_v63 }
 0x162   : > { %2146 = vmatprep.mubr.f32.mxu0 %v3068_v36 }
 0x163   : > { %v4910_v20 = vpop.f32.mrb[32].mxu1 }
 0x164   : > { %3251 = vmatmul.mubr.f32.gmra.mrb[138].mxu1 %v5410_v12  ;;  %v1530_v14 = vpop.f32.mrb[33].mxu1 }
 0x165   : > { %2147 = vmatmul.mubr.f32.gmra.mrb[10].mxu0 %v3036_v26  ;;  %3253 = vmatprep.mubr.f32.mxu1 %v4879_v54 }
 0x166   : > { %2151 = vmatprep.mubr.f32.mxu0 %v3069_v9 }
 0x167   : > { %v4914_v48 = vpop.f32.mrb[34].mxu1 }
 0x168   : > { %3254 = vmatmul.mubr.f32.gmra.mrb[140].mxu1 %v4884_v18  ;;  %v1535_v59 = vpop.f32.mrb[35].mxu1 }
 0x169   : > { %2152 = vmatmul.mubr.f32.gmra.mrb[12].mxu0 %v3037_v37  ;;  %3256 = vmatprep.mubr.f32.mxu1 %v3125_v28 }
 0x16a   : > { %2156 = vmatprep.mubr.f32.mxu0 %v3070_v41 }
 0x16b   : > { %v4917_v63 = vpop.f32.mrb[36].mxu1 }
 0x16c   : > { %3257 = vmatmul.mubr.f32.gmra.mrb[142].mxu1 %v3126_v60  ;;  %v1540_v24 = vpop.f32.mrb[37].mxu1 }
 0x16d   : > { %2157 = vmatmul.mubr.f32.gmra.mrb[14].mxu0 %v3038_v53 }
 0x16f   : > { %v4919_v52 = vpop.f32.mrb[38].mxu1 }
 0x170   : > { %v1545_v56 = vpop.f32.mrb[39].mxu1 }
 0x173   : > { %v4921_v6 = vpop.f32.mrb[40].mxu1 }
 0x174   : > { %v1550_v12 = vpop.f32.mrb[41].mxu1 }
 0x177   : > { %v4923_v17 = vpop.f32.mrb[42].mxu1 }
 0x178   : > { %v1555_v54 = vpop.f32.mrb[43].mxu1 }
 0x17b   : > { %v4925_v5 = vpop.f32.mrb[44].mxu1 }
 0x17c   : > { %v1560_v15 = vpop.f32.mrb[45].mxu1 }
 0x17f   : > { %v4927_v35 = vpop.f32.mrb[46].mxu1 }
 0x180   : > { %v1565_v62 = vpop.f32.mrb[47].mxu1 }
 0x183   : > { %v4929_v18 = vpop.f32.mrb[48].mxu1 }
 0x184   : > { %v1570_v21 = vpop.f32.mrb[49].mxu1 }
 0x187   : > { %v4931_v3 = vpop.f32.mrb[50].mxu1 }
 0x188   : > { %v1575_v0 = vpop.f32.mrb[51].mxu1 }
 0x18b   : > { %v4933_v34 = vpop.f32.mrb[52].mxu1 }
 0x18c   : > { %v1580_v50 = vpop.f32.mrb[53].mxu1 }
 0x18f   : > { %v4935_v2 = vpop.f32.mrb[54].mxu1 }
 0x190   : > { %v1585_v44 = vpop.f32.mrb[55].mxu1 }
 0x193   : > { %v4937_v4 = vpop.f32.mrb[56].mxu1 }
 0x194   : > { %v1590_v42 = vpop.f32.mrb[57].mxu1 }
 0x197   : > { %v4939_v10 = vpop.f32.mrb[58].mxu1 }
 0x198   : > { %v1595_v49 = vpop.f32.mrb[59].mxu1 }
 0x19b   : > { %v4941_v61 = vpop.f32.mrb[60].mxu1 }
 0x19c   : > { %v1600_v38 = vpop.f32.mrb[61].mxu1 }
 0x19f   : > { %v4943_v30 = vpop.f32.mrb[62].mxu1 }
 0x1a0   : > { %v1605_v19 = vpop.f32.mrb[63].mxu1 }
 0x1a3   : > { %v2163_v27 = vpop.f32.mrb[64].mxu1 }
 0x1a4   : > { %v2165_v31 = vpop.f32.mrb[65].mxu1 }
 0x1a7   : > { %v2168_v16 = vpop.f32.mrb[66].mxu1 }
 0x1a8   : > { %v2170_v47 = vpop.f32.mrb[67].mxu1 }
 0x1ab   : > { %v2173_v8 = vpop.f32.mrb[68].mxu1 }
 0x1ac   : > { %v2175_v58 = vpop.f32.mrb[69].mxu1 }
 0x1af   : > { %v2178_v36 = vpop.f32.mrb[70].mxu1 }
 0x1b0   : > { %v2180_v22 = vpop.f32.mrb[71].mxu1 }
 0x1b3   : > { %v2183_v26 = vpop.f32.mrb[72].mxu1 }
 0x1b4   : > { %v2185_v9 = vpop.f32.mrb[73].mxu1 }
 0x1b7   : > { %v2188_v14 = vpop.f32.mrb[74].mxu1 }
 0x1b8   : > { %v2190_v37 = vpop.f32.mrb[75].mxu1 }
 0x1bb   : > { %v2193_v28 = vpop.f32.mrb[76].mxu1 }
 0x1bc   : > { %v2195_v41 = vpop.f32.mrb[77].mxu1 }
 0x1bf   : > { %v2198_v59 = vpop.f32.mrb[78].mxu1 }
 0x1c0   : > { %v2200_v60 = vpop.f32.mrb[79].mxu1 }
 0x1c3   : > { %v2203_v53 = vpop.f32.mrb[80].mxu1 }
 0x1c4   : > { %v1938_v24 = vpop.f32.mrb[16].mxu0  ;;  %v2205_v56 = vpop.f32.mrb[81].mxu1 }
 0x1c5   : > { %v3523_v12 = vadd.f32 %v1938_v24, %v4881_v25  ;;  %v1940_v54 = vpop.f32.mrb[17].mxu0 }
 0x1c7   : > { %v4946_v15 = vadd.f32 %v3523_v12, %v2163_v27  ;;  %v2208_v62 = vpop.f32.mrb[82].mxu1 }
 0x1c8   : > { %v1943_v21 = vpop.f32.mrb[18].mxu0  ;;  %v2210_v0 = vpop.f32.mrb[83].mxu1 }
 0x1c9   : > { %v3525_v50 = vadd.f32 %v1943_v21, %v4886_v46  ;;  %v1945_v44 = vpop.f32.mrb[19].mxu0 }
 0x1cb   : > { %v4949_v42 = vadd.f32 %v3525_v50, %v2168_v16  ;;  %v2213_v49 = vpop.f32.mrb[84].mxu1 }
 0x1cc   : > { %v1948_v38 = vpop.f32.mrb[20].mxu0  ;;  %v2215_v19 = vpop.f32.mrb[85].mxu1 }
 0x1cd   : > { %v3527_v31 = vadd.f32 %v1948_v38, %v4889_v55  ;;  %v1950_v47 = vpop.f32.mrb[21].mxu0 }
 0x1cf   : > { %v4952_v58 = vadd.f32 %v3527_v31, %v2173_v8  ;;  %v2218_v25 = vpop.f32.mrb[86].mxu1 }
 0x1d0   : > { %v1953_v22 = vpop.f32.mrb[22].mxu0  ;;  %v2220_v27 = vpop.f32.mrb[87].mxu1 }
 0x1d1   : > { %v3529_v9 = vadd.f32 %v1953_v22, %v4891_v11  ;;  %v1955_v37 = vpop.f32.mrb[23].mxu0 }
 0x1d3   : > { %v4955_v46 = vadd.f32 %v3529_v9, %v2178_v36  ;;  %v2223_v16 = vpop.f32.mrb[88].mxu1 }
 0x1d4   : > { %v1958_v41 = vpop.f32.mrb[24].mxu0  ;;  %v2225_v60 = vpop.f32.mrb[89].mxu1 }
 0x1d5   : > { %v3531_v24 = vadd.f32 %v1958_v41, %v4894_v43  ;;  %v1960_v56 = vpop.f32.mrb[25].mxu0 }
 0x1d7   : > { %v4958_v55 = vadd.f32 %v3531_v24, %v2183_v26  ;;  %v2228_v8 = vpop.f32.mrb[90].mxu1 }
 0x1d8   : > { %v1963_v12 = vpop.f32.mrb[26].mxu0  ;;  %v2230_v54 = vpop.f32.mrb[91].mxu1 }
 0x1d9   : > { %v3533_v21 = vadd.f32 %v1963_v12, %v4898_v1  ;;  %v1965_v0 = vpop.f32.mrb[27].mxu0 }
 0x1db   : > { %v4961_v11 = vadd.f32 %v3533_v21, %v2188_v14  ;;  %v2233_v50 = vpop.f32.mrb[92].mxu1 }
 0x1dc   : > { %v1968_v43 = vpop.f32.mrb[28].mxu0  ;;  %v2235_v36 = vpop.f32.mrb[93].mxu1 }
 0x1dd   : > { %v3535_v1 = vadd.f32 %v1968_v43, %v4902_v33  ;;  %v1970_v26 = vpop.f32.mrb[29].mxu0 }
 0x1df   : > { %v4980_v14 = vadd.f32 %v3535_v1, %v2193_v28  ;;  %v2238_v44 = vpop.f32.mrb[94].mxu1 }
 0x1e0   : > { %v1973_v38 = vpop.f32.mrb[30].mxu0  ;;  %v2240_v19 = vpop.f32.mrb[95].mxu1 }
 0x1e1   : > { %v3537_v31 = vadd.f32 %v1973_v38, %v4906_v51  ;;  %v1975_v47 = vpop.f32.mrb[31].mxu0 }
 0x1e3   : > { %v4983_v22 = vadd.f32 %v3537_v31, %v2198_v59  ;;  %v2243_v27 = vpop.f32.mrb[96].mxu1 }
 0x1e4   : > { %v1978_v9 = vpop.f32.mrb[32].mxu0  ;;  %v2245_v37 = vpop.f32.mrb[97].mxu1 }
 0x1e5   : > { %v3539_v41 = vadd.f32 %v1978_v9, %v4910_v20  ;;  %v1980_v60 = vpop.f32.mrb[33].mxu0 }
 0x1e7   : > { %v4986_v13 = vadd.f32 %v3539_v41, %v2203_v53  ;;  %v2248_v33 = vpop.f32.mrb[98].mxu1 }
 0x1e8   : > { %v1983_v24 = vpop.f32.mrb[34].mxu0  ;;  %v2250_v28 = vpop.f32.mrb[99].mxu1 }
 0x1e9   : > { %v3541_v56 = vadd.f32 %v1983_v24, %v4914_v48  ;;  %v1985_v12 = vpop.f32.mrb[35].mxu0 }
 0x1eb   : > { %v4989_v54 = vadd.f32 %v3541_v56, %v2208_v62  ;;  %v2253_v51 = vpop.f32.mrb[100].mxu1 }
 0x1ec   : > { %v1988_v21 = vpop.f32.mrb[36].mxu0  ;;  %v2255_v59 = vpop.f32.mrb[101].mxu1 }
 0x1ed   : > { %v3543_v0 = vadd.f32 %v1988_v21, %v4917_v63  ;;  %v1990_v43 = vpop.f32.mrb[37].mxu0 }
 0x1ef   : > { %v4992_v36 = vadd.f32 %v3543_v0, %v2213_v49  ;;  %v2258_v20 = vpop.f32.mrb[102].mxu1 }
 0x1f0   : > { %v1993_v1 = vpop.f32.mrb[38].mxu0  ;;  %v2260_v53 = vpop.f32.mrb[103].mxu1 }
 0x1f1   : > { %v3545_v26 = vadd.f32 %v1993_v1, %v4919_v52  ;;  %v1995_v38 = vpop.f32.mrb[39].mxu0 }
 0x1f3   : > { %v4995_v19 = vadd.f32 %v3545_v26, %v2218_v25  ;;  %v2263_v48 = vpop.f32.mrb[104].mxu1 }
 0x1f4   : > { %v1998_v31 = vpop.f32.mrb[40].mxu0  ;;  %v2265_v62 = vpop.f32.mrb[105].mxu1 }
 0x1f5   : > { %v3547_v47 = vadd.f32 %v1998_v31, %v4921_v6  ;;  %v2000_v9 = vpop.f32.mrb[41].mxu0 }
 0x1f7   : > { %v4998_v37 = vadd.f32 %v3547_v47, %v2223_v16  ;;  %v5000_v63 = vpop.f32.mrb[106].mxu1 }
 0x1f8   : > { %v2003_v49 = vpop.f32.mrb[42].mxu0  ;;  %v2270_v41 = vpop.f32.mrb[107].mxu1 }
 0x1f9   : > { %v3549_v60 = vadd.f32 %v2003_v49, %v4923_v17  ;;  %v2005_v24 = vpop.f32.mrb[43].mxu0 }
 0x1fb   : > { %v5003_v28 = vpop.f32.mrb[108].mxu1  ;;  %v5005_v52 = vadd.f32 %v3549_v60, %v2228_v8 }
 0x1fc   : > { %v2008_v25 = vpop.f32.mrb[44].mxu0  ;;  %v2275_v56 = vpop.f32.mrb[109].mxu1 }
 0x1fd   : > { %v3551_v12 = vadd.f32 %v2008_v25, %v4925_v5  ;;  %v2010_v21 = vpop.f32.mrb[45].mxu0 }
 0x1ff   : > { %v5008_v6 = vpop.f32.mrb[110].mxu1  ;;  %v5010_v16 = vadd.f32 %v3551_v12, %v2233_v50 }
 0x200   : > { %v2013_v59 = vpop.f32.mrb[46].mxu0  ;;  %v2280_v0 = vpop.f32.mrb[111].mxu1 }
 0x201   : > { %v3553_v43 = vadd.f32 %v2013_v59, %v4927_v35  ;;  %v2015_v1 = vpop.f32.mrb[47].mxu0 }
 0x203   : > { %v5013_v17 = vpop.f32.mrb[112].mxu1  ;;  %v5015_v53 = vadd.f32 %v3553_v43, %v2238_v44 }
 0x204   : > { %v2018_v8 = vpop.f32.mrb[48].mxu0  ;;  %v5017_v26 = vpop.f32.mrb[113].mxu1 }
 0x205   : > { %v3555_v38 = vadd.f32 %v2018_v8, %v4929_v18  ;;  %v2020_v5 = vpop.f32.mrb[49].mxu0 }
 0x207   : > { %v5020_v31 = vpop.f32.mrb[114].mxu1  ;;  %v5022_v62 = vadd.f32 %v3555_v38, %v2243_v27 }
 0x208   : > { %v2023_v50 = vpop.f32.mrb[50].mxu0  ;;  %v5024_v47 = vpop.f32.mrb[115].mxu1 }
 0x209   : > { %v3557_v35 = vadd.f32 %v2023_v50, %v4931_v3  ;;  %v2025_v9 = vpop.f32.mrb[51].mxu0 }
 0x20b   : > { %v5027_v49 = vpop.f32.mrb[116].mxu1  ;;  %v5029_v44 = vadd.f32 %v3557_v35, %v2248_v33 }
 0x20c   : > { %v2028_v41 = vpop.f32.mrb[52].mxu0  ;;  %v5031_v60 = vpop.f32.mrb[117].mxu1 }
 0x20d   : > { %v3559_v18 = vadd.f32 %v2028_v41, %v4933_v34  ;;  %v2030_v24 = vpop.f32.mrb[53].mxu0 }
 0x20f   : > { %v5034_v25 = vpop.f32.mrb[118].mxu1  ;;  %v5036_v27 = vadd.f32 %v3559_v18, %v2253_v51 }
 0x210   : > { %v2033_v56 = vpop.f32.mrb[54].mxu0  ;;  %v5038_v12 = vpop.f32.mrb[119].mxu1 }
 0x211   : > { %v3561_v3 = vadd.f32 %v2033_v56, %v4935_v2  ;;  %v2035_v21 = vpop.f32.mrb[55].mxu0 }
 0x213   : > { %v3225_v34 = vpop.f32.mrb[120].mxu1  ;;  %v5048_v33 = vadd.f32 %v3561_v3, %v2258_v20 }
 0x214   : > { %v2038_v59 = vpop.f32.mrb[56].mxu0  ;;  %v5051_v51 = vadd.f32 %v4949_v42, %v3225_v34  ;;  %v2388_v0 = vpop.f32.mrb[121].mxu1 }
 0x215   : > { %v3563_v2 = vadd.f32 %v2038_v59, %v4937_v4  ;;  %v2040_v43 = vpop.f32.mrb[57].mxu0  ;;  %v5055_v1 = vadd.f32 %v4946_v15, %v2388_v0 }
 0x216   : > { %2580 = vst [vmem:[%s5046_s28 + $0x48] sm:$0xff] %v5051_v51 }
 0x217   : > { %2579 = vst [vmem:[%s5046_s28 + $0x40] sm:$0xff] %v5055_v1  ;;  %v3228_v8 = vpop.f32.mrb[122].mxu1  ;;  %v5061_v20 = vadd.f32 %v3563_v2, %v2263_v48 }
 0x218   : > { %v2043_v38 = vpop.f32.mrb[58].mxu0  ;;  %v5064_v42 = vadd.f32 %v4955_v46, %v3228_v8  ;;  %v2398_v5 = vpop.f32.mrb[123].mxu1 }
 0x219   : > { %v3565_v4 = vadd.f32 %v2043_v38, %v4939_v10  ;;  %v2045_v50 = vpop.f32.mrb[59].mxu0  ;;  %v5068_v15 = vadd.f32 %v4952_v58, %v2398_v5 }
 0x21a   : > { %2582 = vst [vmem:[%s5046_s28 + $0x58] sm:$0xff] %v5064_v42 }
 0x21b   : > { %2581 = vst [vmem:[%s5046_s28 + $0x50] sm:$0xff] %v5068_v15  ;;  %v3231_v35 = vpop.f32.mrb[124].mxu1  ;;  %v5075_v48 = vadd.f32 %v3565_v4, %v5000_v63 }
 0x21c   : > { %v2048_v9 = vpop.f32.mrb[60].mxu0  ;;  %v5078_v46 = vadd.f32 %v4961_v11, %v3231_v35  ;;  %v2408_v41 = vpop.f32.mrb[125].mxu1 }
 0x21d   : > { %v3567_v10 = vadd.f32 %v2048_v9, %v4941_v61  ;;  %v2050_v18 = vpop.f32.mrb[61].mxu0  ;;  %v5082_v58 = vadd.f32 %v4958_v55, %v2408_v41 }
 0x21e   : > { %2584 = vst [vmem:[%s5046_s28 + $0x68] sm:$0xff] %v5078_v46 }
 0x21f   : > { %2583 = vst [vmem:[%s5046_s28 + $0x60] sm:$0xff] %v5082_v58  ;;  %v3234_v24 = vpop.f32.mrb[126].mxu1  ;;  %v5089_v63 = vadd.f32 %v3567_v10, %v5003_v28 }
 0x220   : > { %v2053_v56 = vpop.f32.mrb[62].mxu0  ;;  %v5092_v11 = vadd.f32 %v4983_v22, %v3234_v24  ;;  %v2418_v3 = vpop.f32.mrb[127].mxu1 }
 0x221   : > { %v3569_v61 = vadd.f32 %v2053_v56, %v4943_v30  ;;  %v2055_v21 = vpop.f32.mrb[63].mxu0  ;;  %v5096_v55 = vadd.f32 %v4980_v14, %v2418_v3 }
 0x222   : > { %2586 = vst [vmem:[%s5046_s28 + $0x78] sm:$0xff] %v5092_v11 }
 0x223   : > { %2585 = vst [vmem:[%s5046_s28 + $0x70] sm:$0xff] %v5096_v55  ;;  %v3237_v28 = vpop.f32.mrb[128].mxu1  ;;  %v5103_v34 = vadd.f32 %v3569_v61, %v5008_v6 }
 0x224   : > { %v2123_v59 = vpop.f32.mrb[0].mxu0  ;;  %v5106_v22 = vadd.f32 %v4989_v54, %v3237_v28  ;;  %v2428_v0 = vpop.f32.mrb[129].mxu1 }
 0x225   : > { %v3515_v30 = vadd.f32 %v2123_v59, %v4850_v40  ;;  %v2125_v14 = vpop.f32.mrb[1].mxu0  ;;  %v5110_v2 = vadd.f32 %v4986_v13, %v2428_v0 }
 0x226   : > { %2588 = vst [vmem:[%s5046_s28 + $0x88] sm:$0xff] %v5106_v22 }
 0x227   : > { %v2349_v43 = vadd.f32 %v3515_v30, %v5017_v26  ;;  %2587 = vst [vmem:[%s5046_s28 + $0x80] sm:$0xff] %v5110_v2  ;;  %v3240_v6 = vpop.f32.mrb[130].mxu1 }
 0x228   : > { %v2128_v8 = vpop.f32.mrb[2].mxu0  ;;  %v5118_v54 = vadd.f32 %v4995_v19, %v3240_v6  ;;  %v2438_v38 = vpop.f32.mrb[131].mxu1 }
 0x229   : > { %2571 = vst [vmem:[%s5046_s28] sm:$0xff] %v2349_v43  ;;  %v3516_v40 = vadd.f32 %v2128_v8, %v4854_v32  ;;  %v2130_v5 = vpop.f32.mrb[3].mxu0  ;;  %v5123_v13 = vadd.f32 %v4992_v36, %v2438_v38  ;;  %v2708_v50 = vmul.f32 %v2349_v43, %v2349_v43 }
 0x22a   : > { %2590 = vst [vmem:[%s5046_s28 + $0x98] sm:$0xff] %v5118_v54 }
 0x22b   : > { %v2354_v26 = vadd.f32 %v3516_v40, %v5013_v17  ;;  %2589 = vst [vmem:[%s5046_s28 + $0x90] sm:$0xff] %v5123_v13  ;;  %v3243_v4 = vpop.f32.mrb[132].mxu1 }
 0x22c   : > { %v2133_v19 = vpop.f32.mrb[4].mxu0  ;;  %v5131_v35 = vadd.f32 %v5005_v52, %v3243_v4  ;;  %v2448_v32 = vpop.f32.mrb[133].mxu1 }
 0x22d   : > { %2572 = vst [vmem:[%s5046_s28 + $0x8] sm:$0xff] %v2354_v26  ;;  %v2636_v9 = vadd.f32 %v2354_v26, %v2349_v43  ;;  %v2709_v41 = vmul.f32 %v2354_v26, %v2354_v26  ;;  %v3517_v36 = vadd.f32 %v2133_v19, %v4860_v23  ;;  %v2135_v10 = vpop.f32.mrb[5].mxu0  ;;  %v5136_v17 = vadd.f32 %v4998_v37, %v2448_v32 }
 0x22e   : > { %2592 = vst [vmem:[%s5046_s28 + $0xa8] sm:$0xff] %v5131_v35 }
 0x22f   : > { %v2740_v18 = vadd.f32 %v2709_v41, %v2708_v50  ;;  %v2359_v24 = vadd.f32 %v3517_v36, %v5024_v47  ;;  %2591 = vst [vmem:[%s5046_s28 + $0xa0] sm:$0xff] %v5136_v17  ;;  %v3246_v52 = vpop.f32.mrb[134].mxu1 }
 0x230   : > { %v2138_v56 = vpop.f32.mrb[6].mxu0  ;;  %v5144_v3 = vadd.f32 %v5015_v53, %v3246_v52  ;;  %v2458_v23 = vpop.f32.mrb[135].mxu1 }
 0x231   : > { %2573 = vst [vmem:[%s5046_s28 + $0x10] sm:$0xff] %v2359_v24  ;;  %v2637_v61 = vadd.f32 %v2636_v9, %v2359_v24  ;;  %v2710_v21 = vmul.f32 %v2359_v24, %v2359_v24  ;;  %v3518_v37 = vadd.f32 %v2138_v56, %v4864_v57  ;;  %v2140_v28 = vpop.f32.mrb[7].mxu0  ;;  %v5149_v59 = vadd.f32 %v5010_v16, %v2458_v23 }
 0x232   : > { %2594 = vst [vmem:[%s5046_s28 + $0xb8] sm:$0xff] %v5144_v3 }
 0x233   : > { %v2741_v47 = vadd.f32 %v2740_v18, %v2710_v21  ;;  %v2364_v0 = vadd.f32 %v3518_v37, %v5020_v31  ;;  %2593 = vst [vmem:[%s5046_s28 + $0xb0] sm:$0xff] %v5149_v59  ;;  %v3249_v53 = vpop.f32.mrb[136].mxu1 }
 0x234   : > { %v2143_v30 = vpop.f32.mrb[8].mxu0  ;;  %v5157_v14 = vadd.f32 %v5029_v44, %v3249_v53  ;;  %v2468_v57 = vpop.f32.mrb[137].mxu1 }
 0x235   : > { %2574 = vst [vmem:[%s5046_s28 + $0x18] sm:$0xff] %v2364_v0  ;;  %v2638_v43 = vadd.f32 %v2637_v61, %v2364_v0  ;;  %v2711_v6 = vmul.f32 %v2364_v0, %v2364_v0  ;;  %v3519_v16 = vadd.f32 %v2143_v30, %v4867_v29  ;;  %v2145_v8 = vpop.f32.mrb[9].mxu0  ;;  %v5162_v38 = vadd.f32 %v5022_v62, %v2468_v57 }
 0x236   : > { %2596 = vst [vmem:[%s5046_s28 + $0xc8] sm:$0xff] %v5157_v14  ;;  %v2716_v30 = vmul.f32 %v5055_v1, %v5055_v1 }
 0x237   : > { %v2742_v31 = vadd.f32 %v2741_v47, %v2711_v6  ;;  %v2369_v40 = vadd.f32 %v3519_v16, %v5031_v60  ;;  %2595 = vst [vmem:[%s5046_s28 + $0xc0] sm:$0xff] %v5162_v38  ;;  %v3252_v44 = vpop.f32.mrb[138].mxu1 }
 0x238   : > { %v2148_v5 = vpop.f32.mrb[10].mxu0  ;;  %v5170_v26 = vadd.f32 %v5048_v33, %v3252_v44  ;;  %v2478_v29 = vpop.f32.mrb[139].mxu1 }
 0x239   : > { %2575 = vst [vmem:[%s5046_s28 + $0x20] sm:$0xff] %v2369_v40  ;;  %v2639_v4 = vadd.f32 %v2638_v43, %v2369_v40  ;;  %v2712_v50 = vmul.f32 %v2369_v40, %v2369_v40  ;;  %v3520_v62 = vadd.f32 %v2148_v5, %v4870_v39  ;;  %v2150_v19 = vpop.f32.mrb[11].mxu0  ;;  %v5175_v32 = vadd.f32 %v5036_v27, %v2478_v29 }
 0x23a   : > { %2598 = vst [vmem:[%s5046_s28 + $0xd8] sm:$0xff] %v5170_v26 }
 0x23b   : > { %v2743_v60 = vadd.f32 %v2742_v31, %v2712_v50  ;;  %v2374_v9 = vadd.f32 %v3520_v62, %v5027_v49  ;;  %2597 = vst [vmem:[%s5046_s28 + $0xd0] sm:$0xff] %v5175_v32  ;;  %v3255_v33 = vpop.f32.mrb[140].mxu1  ;;  %v2719_v31 = vmul.f32 %v5064_v42, %v5064_v42 }
 0x23c   : > { %v2153_v41 = vpop.f32.mrb[12].mxu0  ;;  %v5183_v36 = vadd.f32 %v5075_v48, %v3255_v33  ;;  %v2488_v39 = vpop.f32.mrb[141].mxu1 }
 0x23d   : > { %2576 = vst [vmem:[%s5046_s28 + $0x28] sm:$0xff] %v2374_v9  ;;  %v2640_v10 = vadd.f32 %v2639_v4, %v2374_v9  ;;  %v2713_v18 = vmul.f32 %v2374_v9, %v2374_v9  ;;  %v3521_v27 = vadd.f32 %v2153_v41, %v4873_v45  ;;  %v2155_v24 = vpop.f32.mrb[13].mxu0  ;;  %v5188_v52 = vadd.f32 %v5061_v20, %v2488_v39 }
 0x23e   : > { %2600 = vst [vmem:[%s5046_s28 + $0xe8] sm:$0xff] %v5183_v36 }
 0x23f   : > { %v2744_v49 = vadd.f32 %v2743_v60, %v2713_v18  ;;  %v2379_v56 = vadd.f32 %v3521_v27, %v5038_v12  ;;  %2599 = vst [vmem:[%s5046_s28 + $0xe0] sm:$0xff] %v5188_v52  ;;  %v3258_v48 = vpop.f32.mrb[142].mxu1 }
 0x240   : > { %v2158_v23 = vpop.f32.mrb[14].mxu0  ;;  %v5196_v61 = vadd.f32 %v5103_v34, %v3258_v48  ;;  %v2498_v45 = vpop.f32.mrb[143].mxu1 }
 0x241   : > { %2577 = vst [vmem:[%s5046_s28 + $0x30] sm:$0xff] %v2379_v56  ;;  %v2641_v21 = vadd.f32 %v2640_v10, %v2379_v56  ;;  %v2714_v37 = vmul.f32 %v2379_v56, %v2379_v56  ;;  %v3522_v20 = vadd.f32 %v2158_v23, %v4876_v7  ;;  %v2160_v28 = vpop.f32.mrb[15].mxu0  ;;  %v5201_v47 = vadd.f32 %v5089_v63, %v2498_v45 }
 0x242   : > { %2602 = vst [vmem:[%s5046_s28 + $0xf8] sm:$0xff] %v5196_v61  ;;  %v2717_v63 = vmul.f32 %v5051_v51, %v5051_v51 }
 0x243   : > { %v2745_v12 = vadd.f32 %v2744_v49, %v2714_v37  ;;  %v2384_v0 = vadd.f32 %v3522_v20, %v5034_v25  ;;  %2601 = vst [vmem:[%s5046_s28 + $0xf0] sm:$0xff] %v5201_v47  ;;  %v2718_v25 = vmul.f32 %v5068_v15, %v5068_v15 }
 0x245   : > { %2578 = vst [vmem:[%s5046_s28 + $0x38] sm:$0xff] %v2384_v0  ;;  %v2642_v34 = vadd.f32 %v2641_v21, %v2384_v0  ;;  %v2715_v53 = vmul.f32 %v2384_v0, %v2384_v0 }
 0x247   : > { %v2643_v57 = vadd.f32 %v2642_v34, %v5055_v1  ;;  %v2746_v7 = vadd.f32 %v2745_v12, %v2715_v53  ;;  %v2720_v1 = vmul.f32 %v5082_v58, %v5082_v58 }
 0x249   : > { %v2644_v43 = vadd.f32 %v2643_v57, %v5051_v51  ;;  %v2747_v6 = vadd.f32 %v2746_v7, %v2716_v30  ;;  %v2721_v51 = vmul.f32 %v5078_v46, %v5078_v46 }
 0x24b   : > { %v2645_v16 = vadd.f32 %v2644_v43, %v5068_v15  ;;  %v2748_v8 = vadd.f32 %v2747_v6, %v2717_v63  ;;  %v2722_v15 = vmul.f32 %v5096_v55, %v5096_v55 }
 0x24d   : > { %v2646_v40 = vadd.f32 %v2645_v16, %v5064_v42  ;;  %v2749_v44 = vadd.f32 %v2748_v8, %v2718_v25  ;;  %v2723_v42 = vmul.f32 %v5092_v11, %v5092_v11  ;;  %v2738_v8 = vmul.f32 %v5201_v47, %v5201_v47 }
 0x24f   : > { %v2647_v5 = vadd.f32 %v2646_v40, %v5082_v58  ;;  %v2750_v29 = vadd.f32 %v2749_v44, %v2719_v31  ;;  %v2724_v58 = vmul.f32 %v5110_v2, %v5110_v2  ;;  %v2739_v31 = vmul.f32 %v5196_v61, %v5196_v61 }
 0x251   : > { %v2648_v4 = vadd.f32 %v2647_v5, %v5078_v46  ;;  %v2751_v50 = vadd.f32 %v2750_v29, %v2720_v1  ;;  %v2725_v46 = vmul.f32 %v5106_v22, %v5106_v22 }
 0x253   : > { %v2649_v62 = vadd.f32 %v2648_v4, %v5096_v55  ;;  %v2752_v19 = vadd.f32 %v2751_v50, %v2721_v51  ;;  %v2726_v55 = vmul.f32 %v5123_v13, %v5123_v13 }
 0x255   : > { %v2650_v60 = vadd.f32 %v2649_v62, %v5092_v11  ;;  %v2753_v9 = vadd.f32 %v2752_v19, %v2722_v15  ;;  %v2727_v11 = vmul.f32 %v5118_v54, %v5118_v54  ;;  %v2603_v62 = vld [vmem:[%s4967_s21] sm:$0x1] }
 0x257   : > { %v2651_v33 = vadd.f32 %v2650_v60, %v5110_v2  ;;  %v2754_v41 = vadd.f32 %v2753_v9, %v2723_v42  ;;  %v2728_v2 = vmul.f32 %v5136_v17, %v5136_v17  ;;  %v2675_v60 = vld [vmem:[%s4973_s24] sm:$0x1] }
 0x259   : > { %v2652_v39 = vadd.f32 %v2651_v33, %v5106_v22  ;;  %v2755_v10 = vadd.f32 %v2754_v41, %v2724_v58  ;;  %v2729_v22 = vmul.f32 %v5131_v35, %v5131_v35 }
 0x25b   : > { %v2756_v18 = vadd.f32 %v2755_v10, %v2725_v46  ;;  %v2653_v27 = vadd.f32 %v2652_v39, %v5123_v13  ;;  %v2730_v13 = vmul.f32 %v5149_v59, %v5149_v59 }
 0x25d   : > { %v2654_v24 = vadd.f32 %v2653_v27, %v5118_v54  ;;  %v2757_v49 = vadd.f32 %v2756_v18, %v2726_v55  ;;  %v2731_v54 = vmul.f32 %v5144_v3, %v5144_v3 }
 0x25f   : > { %v2655_v56 = vadd.f32 %v2654_v24, %v5136_v17  ;;  %v2758_v48 = vadd.f32 %v2757_v49, %v2727_v11  ;;  %v2732_v17 = vmul.f32 %v5162_v38, %v5162_v38 }
 0x261   : > { %v2656_v23 = vadd.f32 %v2655_v56, %v5131_v35  ;;  %v2759_v45 = vadd.f32 %v2758_v48, %v2728_v2  ;;  %v2733_v35 = vmul.f32 %v5157_v14, %v5157_v14 }
 0x263   : > { %v2657_v21 = vadd.f32 %v2656_v23, %v5149_v59  ;;  %v2760_v37 = vadd.f32 %v2759_v45, %v2729_v22  ;;  %v2734_v59 = vmul.f32 %v5175_v32, %v5175_v32 }
 0x265   : > { %v2658_v20 = vadd.f32 %v2657_v21, %v5144_v3  ;;  %v2761_v28 = vadd.f32 %v2760_v37, %v2730_v13  ;;  %v2735_v3 = vmul.f32 %v5170_v26, %v5170_v26 }
 0x267   : > { %v2659_v12 = vadd.f32 %v2658_v20, %v5162_v38  ;;  %v2762_v0 = vadd.f32 %v2761_v28, %v2731_v54  ;;  %v2736_v38 = vmul.f32 %v5188_v52, %v5188_v52 }
 0x269   : > { %v2660_v34 = vadd.f32 %v2659_v12, %v5157_v14  ;;  %v2763_v53 = vadd.f32 %v2762_v0, %v2732_v17  ;;  %v2737_v14 = vmul.f32 %v5183_v36, %v5183_v36 }
 0x26b   : > { %v2661_v30 = vadd.f32 %v2660_v34, %v5175_v32  ;;  %v2764_v57 = vadd.f32 %v2763_v53, %v2733_v35 }
 0x26d   : > { %v2662_v7 = vadd.f32 %v2661_v30, %v5170_v26  ;;  %v2765_v63 = vadd.f32 %v2764_v57, %v2734_v59 }
 0x26f   : > { %v2663_v43 = vadd.f32 %v2662_v7, %v5188_v52  ;;  %v2766_v6 = vadd.f32 %v2765_v63, %v2735_v3 }
 0x271   : > { %v2664_v25 = vadd.f32 %v2663_v43, %v5183_v36  ;;  %v2767_v16 = vadd.f32 %v2766_v6, %v2736_v38 }
 0x273   : > { %v2665_v32 = vadd.f32 %v2664_v25, %v5201_v47  ;;  %v2768_v26 = vadd.f32 %v2767_v16, %v2737_v14 }
 0x275   : > { %v2666_v52 = vadd.f32 %v2665_v32, %v5196_v61  ;;  %v2769_v40 = vadd.f32 %v2768_v26, %v2738_v8 }
 0x277   : > { %v2667_v44 = vrot.slane %v2666_v52, 4  ;;  %v2770_v1 = vadd.f32 %v2769_v40, %v2739_v31 }
 0x279   : > { %v2668_v5 = vadd.f32 %v2667_v44, %v2666_v52  ;;  %v2771_v36 = vrot.slane %v2770_v1, 4 }
 0x27b   : > { %v2669_v29 = vrot.slane %v2668_v5, 2  ;;  %v2772_v51 = vadd.f32 %v2771_v36, %v2770_v1 }
 0x27d   : > { %v2670_v4 = vadd.f32 %v2669_v29, %v2668_v5  ;;  %v2773_v50 = vrot.slane %v2772_v51, 2 }
 0x27f   : > { %v2671_v15 = vrot.slane %v2670_v4, 1  ;;  %v2774_v47 = vadd.f32 %v2773_v50, %v2772_v51 }
 0x281   : > { %v2672_v19 = vadd.f32 %v2671_v15, %v2670_v4  ;;  %v2775_v42 = vrot.slane %v2774_v47, 1 }
 0x283   : > { %v2673_v9 = vadd.f32 %v2672_v19, %v2603_v62  ;;  %v2776_v58 = vadd.f32 %v2775_v42, %v2774_v47 }
 0x285   : > { %2674 = vst [vmem:[%s4967_s21] sm:$0x1] %v2673_v9  ;;  %v2777_v61 = vadd.f32 %v2776_v58, %v2675_v60 }
 0x287   : > { %2778 = vst [vmem:[%s4973_s24] sm:$0x1] %v2777_v61 }
 0x288 PF: > { %s15_s17 = sadd.s32 1, %s3732_s17   ;;  %s5411_s15 = smov %s3728_s16 }
 0x289   : > { %p12_p5 = scmp.ge.s32.totalorder %s15_s17, 4   ;;  %s5412_s16 = smov %s5414_s18 }
 0x28b   :  { %14 = sbr.rel (!%p12_p5) target bundleno = 2 (0x2), region = 90 }

</bundles_post_ra>
